<compile_context>
chip_gen: v6e
topology: v6e:2x2x1
jax: 0.10.0
libtpu: 0.0.40
codegen_flags: <defaults>
</compile_context>

<pallas_src>
import numpy as np
import jax
import jax.numpy as jnp
from jax import lax
from jax.experimental import pallas as pl
from jax.experimental.pallas import tpu as pltpu


# --------------------------- small host-side helpers ---------------------------
def _build_group_proj(C, groups):
    """[C, groups] one-hot: P[c, g] == 1 iff channel c is in GroupNorm group g."""
    gs = C // groups
    proj = np.zeros((C, groups), np.float32)
    proj[np.arange(C), np.arange(C) // gs] = 1.0
    return proj


def _pick_block_batch(B, HW, target_rows=512):
    """Fold images into one grid step up to ~target_rows MXU rows, but keep the
    grid >= 2 steps when B >= 2 (v7x megacore; pipeline overlap everywhere)."""
    max_bt = B if B < 2 else max(1, B // 2)
    cap = max(1, target_rows // max(HW, 1))
    bt = 1
    for d in range(1, B + 1):
        if B % d == 0 and d <= min(max_bt, cap):
            bt = d
    return bt


def _vmem_limit_bytes():
    """Explicit scoped-VMEM budget: ~100 MiB on 128 MiB parts, ~56 MiB on v7x."""
    try:
        cap = int(pltpu.get_tpu_info().vmem_capacity_bytes)
    except Exception:
        cap = 64 * 1024 * 1024
    return int(max(32 * 1024 * 1024,
                   min(cap - 8 * 1024 * 1024, 100 * 1024 * 1024)))


# --------------------------------- kernel ---------------------------------
def resblock_emb_pallas_nhwc(x_bhwc, emb, params, num_groups=32,
                             compute_dtype=jnp.bfloat16):
    """x_bhwc: [B, H, W, C] (channels on the 128-lane axis). Returns [B, H, W, C]."""
    B, H, W, Cin = x_bhwc.shape
    Cout = params["conv1_w"].shape[0]
    assert Cout == Cin, "only the Identity skip_connection path is implemented"
    E = emb.shape[1]
    HW = H * W
    eps = 1e-5                                   # PyTorch GroupNorm default
    n_grp = float((Cin // num_groups) * HW)      # elements per GroupNorm group

    BT = _pick_block_batch(B, HW)
    GB = B // BT

    PAD = ((W + 1 + 7) // 8) * 8                 # halo rows (>= W+1, 8-aligned)
    PADROWS = HW + 2 * PAD

    f32 = jnp.float32

    # ---- glue: layout + weight re-packing (plain JAX, constants are tiny) ----
    x_blk = x_bhwc.reshape(GB, BT, HW, Cin)
    emb_blk = emb.astype(f32).reshape(GB, BT, E)              # emb path stays f32
    proj_np = _build_group_proj(Cin, num_groups)
    proj = jnp.asarray(proj_np)                               # [C, G]
    projT = jnp.asarray(proj_np.T.copy())                     # [G, C]
    # conv weights: [Cout, Cin, 3, 3] -> [9, Cin, Cout], cast for the MXU
    w1 = jnp.transpose(params["conv1_w"], (2, 3, 1, 0)).reshape(9, Cin, Cout)
    w1 = w1.astype(compute_dtype)
    w2 = jnp.transpose(params["conv2_w"], (2, 3, 1, 0)).reshape(9, Cout, Cout)
    w2 = w2.astype(compute_dtype)
    lw = params["lin_w"].T.astype(f32)                        # [E, Cout]

    def kernel(x_ref, emb_ref,
               g1_ref, b1_ref, proj_ref, projT_ref, w1_ref, cb1_ref,
               lw_ref, lb_ref,
               g2_ref, b2_ref, w2_ref, cb2_ref,
               out_ref, pad_ref):
        # Zero the halo bands once per grid step; the interior rows are fully
        # overwritten before every conv, so the bands stay zero thereafter.
        zband = jnp.zeros((PAD, Cin), pad_ref.dtype)
        pad_ref[0:PAD, :] = zband
        pad_ref[PAD + HW:PADROWS, :] = zband

        # Column-boundary masks for the dx=-1 / dx=+1 tap groups (in-kernel iota,
        # applied once per conv to the f32 accumulator — not per tap, not bf16).
        col = lax.broadcasted_iota(jnp.int32, (HW, 1), 0) % W
        mask_l = (col > 0).astype(f32)            # dx = -1 invalid at j == 0
        mask_r = (col < W - 1).astype(f32)        # dx = +1 invalid at j == W-1

        def silu(v):
            return v * jax.nn.sigmoid(v)          # logistic -> EUP

        def group_norm(h, g_ref, b_ref):
            # per-image stats; group reduction via factored one-hot projection
            s = jnp.sum(h, axis=0, keepdims=True)                 # [1, C]
            ss = jnp.sum(h * h, axis=0, keepdims=True)            # [1, C]
            g = jnp.dot(jnp.concatenate([s, ss], axis=0), proj_ref[...],
                        preferred_element_type=f32)               # [2, G]
            gmean = g[0:1] / n_grp
            gvar = jnp.maximum(g[1:2] / n_grp - gmean * gmean, 0.0)
            ginv = lax.rsqrt(gvar + eps)
            mi = jnp.dot(jnp.concatenate([gmean, ginv], axis=0), projT_ref[...],
                         preferred_element_type=f32)              # [2, C]
            return (h - mi[0:1]) * mi[1:2] * g_ref[...] + b_ref[...]

        def conv3x3(w_ref, bias_ref):
            # 9 MXU matmuls on static slice views of the padded scratch slab.
            def tap(k):
                dy, dx = k // 3 - 1, k % 3 - 1
                off = PAD + dy * W + dx
                return jnp.dot(pad_ref[off:off + HW, :], w_ref[k],
                               preferred_element_type=f32)        # [HW, Cout]
            acc_c = tap(1) + tap(4) + tap(7)          # dx == 0 (no mask)
            acc_l = tap(0) + tap(3) + tap(6)          # dx == -1
            acc_r = tap(2) + tap(5) + tap(8)          # dx == +1
            return acc_c + acc_l * mask_l + acc_r * mask_r + bias_ref[...]

        # emb_layers for all images in the block: SiLU -> Linear (f32)
        emb_out = jnp.dot(silu(emb_ref[0]), lw_ref[...],
                          preferred_element_type=f32) + lb_ref[...]   # [BT, Cout]

        for b in range(BT):     # small static fold; conv weights stay resident
            # in_layers: GroupNorm -> SiLU -> Conv3x3
            h = group_norm(x_ref[0, b].astype(f32), g1_ref, b1_ref)
            pad_ref[PAD:PAD + HW, :] = silu(h).astype(pad_ref.dtype)
            h = conv3x3(w1_ref, cb1_ref)                              # [HW, Cout]
            # + timestep embedding (broadcast over spatial)
            h = h + emb_out[b:b + 1, :]
            # out_layers: GroupNorm -> SiLU -> Dropout(p=0 => identity) -> Conv3x3
            h = group_norm(h, g2_ref, b2_ref)
            pad_ref[PAD:PAD + HW, :] = silu(h).astype(pad_ref.dtype)
            h = conv3x3(w2_ref, cb2_ref)
            # skip_connection = Identity; re-read the x block for the residual
            out_ref[0, b] = (x_ref[0, b].astype(f32) + h).astype(out_ref.dtype)

    def build_specs(single_buffer):
        def const_spec(shape):
            zeros = (0,) * len(shape)
            idx = lambda g: zeros
            if single_buffer:
                return pl.BlockSpec(shape, idx, pipeline_mode=pl.Buffered(1))
            return pl.BlockSpec(shape, idx)
        return [
            pl.BlockSpec((1, BT, HW, Cin), lambda g: (g, 0, 0, 0)),   # x
            pl.BlockSpec((1, BT, E), lambda g: (g, 0, 0)),            # emb
            const_spec((1, Cin)),            # gn1 gamma
            const_spec((1, Cin)),            # gn1 beta
            const_spec((Cin, num_groups)),   # group projection P
            const_spec((num_groups, Cin)),   # P^T
            const_spec((9, Cin, Cout)),      # conv1 weights (compute dtype)
            const_spec((1, Cout)),           # conv1 bias
            const_spec((E, Cout)),           # linear weights (f32)
            const_spec((1, Cout)),           # linear bias
            const_spec((1, Cout)),           # gn2 gamma
            const_spec((1, Cout)),           # gn2 beta
            const_spec((9, Cout, Cout)),     # conv2 weights (compute dtype)
            const_spec((1, Cout)),           # conv2 bias
        ]

    def run(single_buffer):
        return pl.pallas_call(
            kernel,
            out_shape=jax.ShapeDtypeStruct((GB, BT, HW, Cout), x_bhwc.dtype),
            grid=(GB,),
            in_specs=build_specs(single_buffer),
            out_specs=pl.BlockSpec((1, BT, HW, Cout), lambda g: (g, 0, 0, 0)),
            scratch_shapes=[pltpu.VMEM((PADROWS, Cin), compute_dtype)],
            compiler_params=pltpu.CompilerParams(
                dimension_semantics=("parallel",),
                vmem_limit_bytes=_vmem_limit_bytes()),
        )(x_blk, emb_blk,
          params["gn1_g"].reshape(1, Cin).astype(f32),
          params["gn1_b"].reshape(1, Cin).astype(f32),
          proj, projT,
          w1, params["conv1_b"].reshape(1, Cout).astype(f32),
          lw, params["lin_b"].reshape(1, Cout).astype(f32),
          params["gn2_g"].reshape(1, Cout).astype(f32),
          params["gn2_b"].reshape(1, Cout).astype(f32),
          w2, params["conv2_b"].reshape(1, Cout).astype(f32))

    try:
        out_blk = run(True)      # single-buffered constants (halves their VMEM)
    except Exception:
        out_blk = run(False)     # fallback: default double-buffered constants

    return out_blk.reshape(B, H, W, Cout)


def resblock_emb_pallas(x_nchw, emb, params, num_groups=32,
                        compute_dtype=jnp.bfloat16):
    """NCHW wrapper matching the PyTorch interface.
    TODO(synk): prefer resblock_emb_pallas_nhwc at the module boundary to avoid
    these two full-tensor relayout passes over HBM."""
    x_bhwc = jnp.transpose(x_nchw, (0, 2, 3, 1))
    out = resblock_emb_pallas_nhwc(x_bhwc, emb, params, num_groups, compute_dtype)
    return jnp.transpose(out, (0, 3, 1, 2))


# ------------------------------ pure-JAX reference ------------------------------
def resblock_emb_ref(x, emb, params, num_groups=32):
    def gn(h, gamma, beta):
        B, C, H, W = h.shape
        hg = h.reshape(B, num_groups, C // num_groups, H, W)
        mean = hg.mean(axis=(2, 3, 4), keepdims=True)
        var = hg.var(axis=(2, 3, 4), keepdims=True)
        hg = (hg - mean) / jnp.sqrt(var + 1e-5)
        h = hg.reshape(B, C, H, W)
        return h * gamma[None, :, None, None] + beta[None, :, None, None]

    def silu(v):
        return v * jax.nn.sigmoid(v)

    def conv(h, w, b):
        out = lax.conv_general_dilated(h, w, (1, 1), "SAME",
                                       dimension_numbers=("NCHW", "OIHW", "NCHW"),
                                       precision=lax.Precision.HIGHEST)
        return out + b[None, :, None, None]

    h = conv(silu(gn(x, params["gn1_g"], params["gn1_b"])),
             params["conv1_w"], params["conv1_b"])
    e = silu(emb) @ params["lin_w"].T + params["lin_b"]
    h = h + e[:, :, None, None]
    h = conv(silu(gn(h, params["gn2_g"], params["gn2_b"])),
             params["conv2_w"], params["conv2_b"])
    return x + h


def init_params(key, channels, emb_channels, out_channels, faithful=True):
    ks = jax.random.split(key, 8)
    C, E, Co = channels, emb_channels, out_channels
    p = {
        "gn1_g": jnp.ones((C,), jnp.float32),
        "gn1_b": jnp.zeros((C,), jnp.float32),
        "conv1_w": 0.1 * jax.random.normal(ks[0], (Co, C, 3, 3), jnp.float32),
        "conv1_b": 0.1 * jax.random.normal(ks[1], (Co,), jnp.float32),
        "lin_w": 0.1 * jax.random.normal(ks[2], (Co, E), jnp.float32),
        "lin_b": 0.1 * jax.random.normal(ks[3], (Co,), jnp.float32),
        "gn2_g": jnp.ones((Co,), jnp.float32),
        "gn2_b": jnp.zeros((Co,), jnp.float32),
        # zero_module(): the last conv of out_layers is zero-initialized
        "conv2_w": jnp.zeros((Co, Co, 3, 3), jnp.float32),
        "conv2_b": jnp.zeros((Co,), jnp.float32),
    }
    if not faithful:
        # non-trivial weights so the numeric cross-check exercises every stage
        p["gn1_g"] = 1.0 + 0.1 * jax.random.normal(ks[4], (C,), jnp.float32)
        p["gn2_g"] = 1.0 + 0.1 * jax.random.normal(ks[5], (Co,), jnp.float32)
        p["gn1_b"] = 0.1 * jax.random.normal(ks[6], (C,), jnp.float32)
        p["conv2_w"] = 0.1 * jax.random.normal(ks[7], (Co, Co, 3, 3), jnp.float32)
    return p


if __name__ == "__main__":
    # GroupNorm(32, C) requires C % 32 == 0, so the smallest channel count is 32.
    B, C, H, W = 2, 32, 8, 8
    E = 32
    key = jax.random.PRNGKey(0)
    kx, ke, kp = jax.random.split(key, 3)
    x = jax.random.normal(kx, (B, C, H, W), jnp.float32)
    emb = jax.random.normal(ke, (B, E), jnp.float32)

    p_test = init_params(kp, C, E, C, faithful=False)
    out_r = jax.block_until_ready(resblock_emb_ref(x, emb, p_test))

    # structural cross-check with f32 MXU operands (tight tolerance)
    out_f32 = jax.block_until_ready(
        resblock_emb_pallas(x, emb, p_test, compute_dtype=jnp.float32))
    np.testing.assert_allclose(np.asarray(out_f32), np.asarray(out_r),
                               rtol=5e-3, atol=5e-3)

    # fast path: bf16 MXU operands, f32 accumulation (bf16-mantissa tolerance)
    out_bf = jax.block_until_ready(resblock_emb_pallas(x, emb, p_test))
    np.testing.assert_allclose(np.asarray(out_bf), np.asarray(out_r),
                               rtol=5e-2, atol=5e-2)

    # faithful-to-__init__ parameters (out conv zero-initialized by zero_module)
    p = init_params(kp, C, E, C, faithful=True)
    out = jax.block_until_ready(resblock_emb_pallas(x, emb, p))
    assert out.shape == (B, C, H, W)
    print("KERNEL_OK")
</pallas_src>

<mosaic_0001>
module attributes {stable_mosaic.version = 11 : i64} {
  func.func @kernel(%arg0: i32, %arg1: memref<1x1x64x32xf32, #tpu.memory_space<vmem>>, %arg2: memref<1x1x32xf32, #tpu.memory_space<vmem>>, %arg3: memref<1x32xf32, #tpu.memory_space<vmem>>, %arg4: memref<1x32xf32, #tpu.memory_space<vmem>>, %arg5: memref<32x32xf32, #tpu.memory_space<vmem>>, %arg6: memref<32x32xf32, #tpu.memory_space<vmem>>, %arg7: memref<9x32x32xf32, #tpu.memory_space<vmem>>, %arg8: memref<1x32xf32, #tpu.memory_space<vmem>>, %arg9: memref<32x32xf32, #tpu.memory_space<vmem>>, %arg10: memref<1x32xf32, #tpu.memory_space<vmem>>, %arg11: memref<1x32xf32, #tpu.memory_space<vmem>>, %arg12: memref<1x32xf32, #tpu.memory_space<vmem>>, %arg13: memref<9x32x32xf32, #tpu.memory_space<vmem>>, %arg14: memref<1x32xf32, #tpu.memory_space<vmem>>, %arg15: memref<1x1x64x32xf32, #tpu.memory_space<vmem>>, %arg16: memref<96x32xf32, #tpu.memory_space<vmem>>) attributes {dimension_semantics = [#tpu.dimension_semantics<parallel>], iteration_bounds = array<i64: 2>, scalar_prefetch = 0 : i64, scratch_operands = 1 : i64, tpu.core_type = #tpu.core_type<tc>, window_params = [{transform_indices = @transform_0, window_bounds = array<i64: 1, 1, 64, 32>}, {transform_indices = @transform_1, window_bounds = array<i64: 1, 1, 32>}, {pipeline_mode = #tpu.pipeline_mode<synchronous>, transform_indices = @transform_2, window_bounds = array<i64: 1, 32>}, {pipeline_mode = #tpu.pipeline_mode<synchronous>, transform_indices = @transform_3, window_bounds = array<i64: 1, 32>}, {pipeline_mode = #tpu.pipeline_mode<synchronous>, transform_indices = @transform_4, window_bounds = array<i64: 32, 32>}, {pipeline_mode = #tpu.pipeline_mode<synchronous>, transform_indices = @transform_5, window_bounds = array<i64: 32, 32>}, {pipeline_mode = #tpu.pipeline_mode<synchronous>, transform_indices = @transform_6, window_bounds = array<i64: 9, 32, 32>}, {pipeline_mode = #tpu.pipeline_mode<synchronous>, transform_indices = @transform_7, window_bounds = array<i64: 1, 32>}, {pipeline_mode = #tpu.pipeline_mode<synchronous>, transform_indices = @transform_8, window_bounds = array<i64: 32, 32>}, {pipeline_mode = #tpu.pipeline_mode<synchronous>, transform_indices = @transform_9, window_bounds = array<i64: 1, 32>}, {pipeline_mode = #tpu.pipeline_mode<synchronous>, transform_indices = @transform_10, window_bounds = array<i64: 1, 32>}, {pipeline_mode = #tpu.pipeline_mode<synchronous>, transform_indices = @transform_11, window_bounds = array<i64: 1, 32>}, {pipeline_mode = #tpu.pipeline_mode<synchronous>, transform_indices = @transform_12, window_bounds = array<i64: 9, 32, 32>}, {pipeline_mode = #tpu.pipeline_mode<synchronous>, transform_indices = @transform_13, window_bounds = array<i64: 1, 32>}, {transform_indices = @transform_14, window_bounds = array<i64: 1, 1, 64, 32>}]} {
    %cst = arith.constant 0.000000e+00 : f32
    %0 = vector.broadcast %cst : f32 to vector<16x32xf32>
    %c0 = arith.constant 0 : index
    %c0_0 = arith.constant 0 : index
    %1 = vector.load %arg16[%c0, %c0_0] : memref<96x32xf32, #tpu.memory_space<vmem>>, vector<16x32xf32>
    tpu.vector_store %arg16[%c0, %c0_0], %0 {strides = array<i32>} : memref<96x32xf32, #tpu.memory_space<vmem>>, vector<16x32xf32>,
    %c80 = arith.constant 80 : index
    %c0_1 = arith.constant 0 : index
    %2 = vector.load %arg16[%c80, %c0_1] : memref<96x32xf32, #tpu.memory_space<vmem>>, vector<16x32xf32>
    tpu.vector_store %arg16[%c80, %c0_1], %0 {strides = array<i32>} : memref<96x32xf32, #tpu.memory_space<vmem>>, vector<16x32xf32>,
    %3 = tpu.iota {dimensions = array<i32: 0>} : vector<64x1xi32>
    %c8_i32 = arith.constant 8 : i32
    %c0_i32 = arith.constant 0 : i32
    %4 = arith.cmpi eq, %c8_i32, %c0_i32 : i32
    %c1_i32 = arith.constant 1 : i32
    %5 = arith.select %4, %c1_i32, %c8_i32 : i32
    %6 = vector.broadcast %5 : i32 to vector<64x1xi32>
    %7 = arith.remsi %3, %6 : vector<64x1xi32>
    %c0_i32_2 = arith.constant 0 : i32
    %8 = vector.broadcast %c0_i32_2 : i32 to vector<64x1xi32>
    %9 = arith.cmpi ne, %7, %8 : vector<64x1xi32>
    %c0_i32_3 = arith.constant 0 : i32
    %10 = vector.broadcast %c0_i32_3 : i32 to vector<64x1xi32>
    %11 = arith.cmpi slt, %7, %10 : vector<64x1xi32>
    %c0_i32_4 = arith.constant 0 : i32
    %12 = arith.cmpi slt, %5, %c0_i32_4 : i32
    %13 = vector.broadcast %12 : i1 to vector<64x1xi1>
    %14 = vector.broadcast %13 : vector<64x1xi1> to vector<64x1xi1>
    %15 = arith.xori %11, %14 : vector<64x1xi1>
    %16 = arith.andi %15, %9 : vector<64x1xi1>
    %17 = vector.broadcast %5 : i32 to vector<64x1xi32>
    %18 = arith.addi %7, %17 : vector<64x1xi32>
    %19 = arith.select %16, %18, %7 : vector<64x1xi1>, vector<64x1xi32>
    %c0_i32_5 = arith.constant 0 : i32
    %20 = vector.broadcast %c0_i32_5 : i32 to vector<64x1xi32>
    %21 = arith.cmpi sgt, %19, %20 : vector<64x1xi32>
    %22 = arith.extui %21 : vector<64x1xi1> to vector<64x1xi32>
    %23 = arith.sitofp %22 : vector<64x1xi32> to vector<64x1xf32>
    %c7_i32 = arith.constant 7 : i32
    %24 = vector.broadcast %c7_i32 : i32 to vector<64x1xi32>
    %25 = arith.cmpi slt, %19, %24 : vector<64x1xi32>
    %26 = arith.extui %25 : vector<64x1xi1> to vector<64x1xi32>
    %27 = arith.sitofp %26 : vector<64x1xi32> to vector<64x1xf32>
    %c0_6 = arith.constant 0 : index
    %c0_7 = arith.constant 0 : index
    %c0_8 = arith.constant 0 : index
    %28 = vector.load %arg2[%c0_6, %c0_7, %c0_8] : memref<1x1x32xf32, #tpu.memory_space<vmem>>, vector<1x1x32xf32>
    %29 = vector.shape_cast %28 : vector<1x1x32xf32> to vector<1x32xf32>
    %30 = arith.negf %29 : vector<1x32xf32>
    %31 = math.exp %30 : vector<1x32xf32>
    %cst_9 = arith.constant 1.000000e+00 : f32
    %32 = vector.broadcast %cst_9 : f32 to vector<1x32xf32>
    %33 = arith.addf %32, %31 : vector<1x32xf32>
    %34 = arith.divf %32, %33 : vector<1x32xf32>
    %35 = arith.mulf %29, %34 : vector<1x32xf32>
    %c0_10 = arith.constant 0 : index
    %c0_11 = arith.constant 0 : index
    %36 = vector.load %arg9[%c0_10, %c0_11] : memref<32x32xf32, #tpu.memory_space<vmem>>, vector<32x32xf32>
    %cst_12 = arith.constant dense<0.000000e+00> : vector<1x32xf32>
    %37 = tpu.matmul %35, %36, %cst_12 {dimension_numbers = #tpu.dot_dimension_numbers<[1], [0], [0], [1], [0, 0, 1, 1], [], []>} : vector<1x32xf32>, vector<32x32xf32>, vector<1x32xf32> -> vector<1x32xf32>
    %c0_13 = arith.constant 0 : index
    %c0_14 = arith.constant 0 : index
    %38 = vector.load %arg10[%c0_13, %c0_14] : memref<1x32xf32, #tpu.memory_space<vmem>>, vector<1x32xf32>
    %39 = arith.addf %37, %38 : vector<1x32xf32>
    %c0_15 = arith.constant 0 : index
    %c0_16 = arith.constant 0 : index
    %c0_17 = arith.constant 0 : index
    %c0_18 = arith.constant 0 : index
    %40 = vector.load %arg1[%c0_15, %c0_16, %c0_17, %c0_18] : memref<1x1x64x32xf32, #tpu.memory_space<vmem>>, vector<1x1x64x32xf32>
    %41 = vector.shape_cast %40 : vector<1x1x64x32xf32> to vector<64x32xf32>
    %cst_19 = arith.constant dense<0.000000e+00> : vector<32xf32>
    %42 = vector.multi_reduction <add>, %41, %cst_19 [0] : vector<64x32xf32> to vector<32xf32>
    %43 = vector.shape_cast %42 : vector<32xf32> to vector<1x32xf32>
    %44 = arith.mulf %41, %41 : vector<64x32xf32>
    %cst_20 = arith.constant dense<0.000000e+00> : vector<32xf32>
    %45 = vector.multi_reduction <add>, %44, %cst_20 [0] : vector<64x32xf32> to vector<32xf32>
    %46 = vector.shape_cast %45 : vector<32xf32> to vector<1x32xf32>
    %47 = tpu.concatenate %43, %46 in 0 : vector<1x32xf32>, vector<1x32xf32> -> vector<2x32xf32>
    %c0_21 = arith.constant 0 : index
    %c0_22 = arith.constant 0 : index
    %48 = vector.load %arg5[%c0_21, %c0_22] : memref<32x32xf32, #tpu.memory_space<vmem>>, vector<32x32xf32>
    %cst_23 = arith.constant dense<0.000000e+00> : vector<2x32xf32>
    %49 = tpu.matmul %47, %48, %cst_23 {dimension_numbers = #tpu.dot_dimension_numbers<[1], [0], [0], [1], [0, 0, 1, 1], [], []>} : vector<2x32xf32>, vector<32x32xf32>, vector<2x32xf32> -> vector<2x32xf32>
    %50 = vector.extract_strided_slice %49 {offsets = [0, 0], sizes = [1, 32], strides = [1, 1]} : vector<2x32xf32> to vector<1x32xf32>
    %cst_24 = arith.constant 6.400000e+01 : f32
    %51 = vector.broadcast %cst_24 : f32 to vector<1x32xf32>
    %52 = arith.divf %50, %51 : vector<1x32xf32>
    %53 = vector.extract_strided_slice %49 {offsets = [1, 0], sizes = [1, 32], strides = [1, 1]} : vector<2x32xf32> to vector<1x32xf32>
    %cst_25 = arith.constant 6.400000e+01 : f32
    %54 = vector.broadcast %cst_25 : f32 to vector<1x32xf32>
    %55 = arith.divf %53, %54 : vector<1x32xf32>
    %56 = arith.mulf %52, %52 : vector<1x32xf32>
    %57 = arith.subf %55, %56 : vector<1x32xf32>
    %cst_26 = arith.constant 0.000000e+00 : f32
    %58 = vector.broadcast %cst_26 : f32 to vector<1x32xf32>
    %59 = arith.maximumf %57, %58 : vector<1x32xf32>
    %cst_27 = arith.constant 9.99999974E-6 : f32
    %60 = vector.broadcast %cst_27 : f32 to vector<1x32xf32>
    %61 = arith.addf %59, %60 : vector<1x32xf32>
    %62 = math.rsqrt %61 : vector<1x32xf32>
    %63 = tpu.concatenate %52, %62 in 0 : vector<1x32xf32>, vector<1x32xf32> -> vector<2x32xf32>
    %c0_28 = arith.constant 0 : index
    %c0_29 = arith.constant 0 : index
    %64 = vector.load %arg6[%c0_28, %c0_29] : memref<32x32xf32, #tpu.memory_space<vmem>>, vector<32x32xf32>
    %cst_30 = arith.constant dense<0.000000e+00> : vector<2x32xf32>
    %65 = tpu.matmul %63, %64, %cst_30 {dimension_numbers = #tpu.dot_dimension_numbers<[1], [0], [0], [1], [0, 0, 1, 1], [], []>} : vector<2x32xf32>, vector<32x32xf32>, vector<2x32xf32> -> vector<2x32xf32>
    %66 = vector.extract_strided_slice %65 {offsets = [0, 0], sizes = [1, 32], strides = [1, 1]} : vector<2x32xf32> to vector<1x32xf32>
    %67 = vector.broadcast %66 : vector<1x32xf32> to vector<64x32xf32>
    %68 = arith.subf %41, %67 : vector<64x32xf32>
    %69 = vector.extract_strided_slice %65 {offsets = [1, 0], sizes = [1, 32], strides = [1, 1]} : vector<2x32xf32> to vector<1x32xf32>
    %70 = vector.broadcast %69 : vector<1x32xf32> to vector<64x32xf32>
    %71 = arith.mulf %68, %70 : vector<64x32xf32>
    %c0_31 = arith.constant 0 : index
    %c0_32 = arith.constant 0 : index
    %72 = vector.load %arg3[%c0_31, %c0_32] : memref<1x32xf32, #tpu.memory_space<vmem>>, vector<1x32xf32>
    %73 = vector.broadcast %72 : vector<1x32xf32> to vector<64x32xf32>
    %74 = arith.mulf %71, %73 : vector<64x32xf32>
    %c0_33 = arith.constant 0 : index
    %c0_34 = arith.constant 0 : index
    %75 = vector.load %arg4[%c0_33, %c0_34] : memref<1x32xf32, #tpu.memory_space<vmem>>, vector<1x32xf32>
    %76 = vector.broadcast %75 : vector<1x32xf32> to vector<64x32xf32>
    %77 = arith.addf %74, %76 : vector<64x32xf32>
    %78 = arith.negf %77 : vector<64x32xf32>
    %79 = math.exp %78 : vector<64x32xf32>
    %cst_35 = arith.constant 1.000000e+00 : f32
    %80 = vector.broadcast %cst_35 : f32 to vector<64x32xf32>
    %81 = arith.addf %80, %79 : vector<64x32xf32>
    %82 = arith.divf %80, %81 : vector<64x32xf32>
    %83 = arith.mulf %77, %82 : vector<64x32xf32>
    %c16 = arith.constant 16 : index
    %c0_36 = arith.constant 0 : index
    %84 = vector.load %arg16[%c16, %c0_36] : memref<96x32xf32, #tpu.memory_space<vmem>>, vector<64x32xf32>
    tpu.vector_store %arg16[%c16, %c0_36], %83 {strides = array<i32>} : memref<96x32xf32, #tpu.memory_space<vmem>>, vector<64x32xf32>,
    %c8 = arith.constant 8 : index
    %c0_37 = arith.constant 0 : index
    %85 = vector.load %arg16[%c8, %c0_37] : memref<96x32xf32, #tpu.memory_space<vmem>>, vector<64x32xf32>
    %c1 = arith.constant 1 : index
    %c0_38 = arith.constant 0 : index
    %c0_39 = arith.constant 0 : index
    %86 = vector.load %arg7[%c1, %c0_38, %c0_39] : memref<9x32x32xf32, #tpu.memory_space<vmem>>, vector<1x32x32xf32>
    %87 = vector.shape_cast %86 : vector<1x32x32xf32> to vector<32x32xf32>
    %cst_40 = arith.constant dense<0.000000e+00> : vector<64x32xf32>
    %88 = tpu.matmul %85, %87, %cst_40 {dimension_numbers = #tpu.dot_dimension_numbers<[1], [0], [0], [1], [0, 0, 1, 1], [], []>} : vector<64x32xf32>, vector<32x32xf32>, vector<64x32xf32> -> vector<64x32xf32>
    %c16_41 = arith.constant 16 : index
    %c0_42 = arith.constant 0 : index
    %89 = vector.load %arg16[%c16_41, %c0_42] : memref<96x32xf32, #tpu.memory_space<vmem>>, vector<64x32xf32>
    %c4 = arith.constant 4 : index
    %c0_43 = arith.constant 0 : index
    %c0_44 = arith.constant 0 : index
    %90 = vector.load %arg7[%c4, %c0_43, %c0_44] : memref<9x32x32xf32, #tpu.memory_space<vmem>>, vector<1x32x32xf32>
    %91 = vector.shape_cast %90 : vector<1x32x32xf32> to vector<32x32xf32>
    %cst_45 = arith.constant dense<0.000000e+00> : vector<64x32xf32>
    %92 = tpu.matmul %89, %91, %cst_45 {dimension_numbers = #tpu.dot_dimension_numbers<[1], [0], [0], [1], [0, 0, 1, 1], [], []>} : vector<64x32xf32>, vector<32x32xf32>, vector<64x32xf32> -> vector<64x32xf32>
    %93 = arith.addf %88, %92 : vector<64x32xf32>
    %c24 = arith.constant 24 : index
    %c0_46 = arith.constant 0 : index
    %94 = vector.load %arg16[%c24, %c0_46] : memref<96x32xf32, #tpu.memory_space<vmem>>, vector<64x32xf32>
    %c7 = arith.constant 7 : index
    %c0_47 = arith.constant 0 : index
    %c0_48 = arith.constant 0 : index
    %95 = vector.load %arg7[%c7, %c0_47, %c0_48] : memref<9x32x32xf32, #tpu.memory_space<vmem>>, vector<1x32x32xf32>
    %96 = vector.shape_cast %95 : vector<1x32x32xf32> to vector<32x32xf32>
    %cst_49 = arith.constant dense<0.000000e+00> : vector<64x32xf32>
    %97 = tpu.matmul %94, %96, %cst_49 {dimension_numbers = #tpu.dot_dimension_numbers<[1], [0], [0], [1], [0, 0, 1, 1], [], []>} : vector<64x32xf32>, vector<32x32xf32>, vector<64x32xf32> -> vector<64x32xf32>
    %98 = arith.addf %93, %97 : vector<64x32xf32>
    %c7_50 = arith.constant 7 : index
    %c0_51 = arith.constant 0 : index
    %99 = vector.load %arg16[%c7_50, %c0_51] : memref<96x32xf32, #tpu.memory_space<vmem>>, vector<64x32xf32>
    %c0_52 = arith.constant 0 : index
    %c0_53 = arith.constant 0 : index
    %c0_54 = arith.constant 0 : index
    %100 = vector.load %arg7[%c0_52, %c0_53, %c0_54] : memref<9x32x32xf32, #tpu.memory_space<vmem>>, vector<1x32x32xf32>
    %101 = vector.shape_cast %100 : vector<1x32x32xf32> to vector<32x32xf32>
    %cst_55 = arith.constant dense<0.000000e+00> : vector<64x32xf32>
    %102 = tpu.matmul %99, %101, %cst_55 {dimension_numbers = #tpu.dot_dimension_numbers<[1], [0], [0], [1], [0, 0, 1, 1], [], []>} : vector<64x32xf32>, vector<32x32xf32>, vector<64x32xf32> -> vector<64x32xf32>
    %c15 = arith.constant 15 : index
    %c0_56 = arith.constant 0 : index
    %103 = vector.load %arg16[%c15, %c0_56] : memref<96x32xf32, #tpu.memory_space<vmem>>, vector<64x32xf32>
    %c3 = arith.constant 3 : index
    %c0_57 = arith.constant 0 : index
    %c0_58 = arith.constant 0 : index
    %104 = vector.load %arg7[%c3, %c0_57, %c0_58] : memref<9x32x32xf32, #tpu.memory_space<vmem>>, vector<1x32x32xf32>
    %105 = vector.shape_cast %104 : vector<1x32x32xf32> to vector<32x32xf32>
    %cst_59 = arith.constant dense<0.000000e+00> : vector<64x32xf32>
    %106 = tpu.matmul %103, %105, %cst_59 {dimension_numbers = #tpu.dot_dimension_numbers<[1], [0], [0], [1], [0, 0, 1, 1], [], []>} : vector<64x32xf32>, vector<32x32xf32>, vector<64x32xf32> -> vector<64x32xf32>
    %107 = arith.addf %102, %106 : vector<64x32xf32>
    %c23 = arith.constant 23 : index
    %c0_60 = arith.constant 0 : index
    %108 = vector.load %arg16[%c23, %c0_60] : memref<96x32xf32, #tpu.memory_space<vmem>>, vector<64x32xf32>
    %c6 = arith.constant 6 : index
    %c0_61 = arith.constant 0 : index
    %c0_62 = arith.constant 0 : index
    %109 = vector.load %arg7[%c6, %c0_61, %c0_62] : memref<9x32x32xf32, #tpu.memory_space<vmem>>, vector<1x32x32xf32>
    %110 = vector.shape_cast %109 : vector<1x32x32xf32> to vector<32x32xf32>
    %cst_63 = arith.constant dense<0.000000e+00> : vector<64x32xf32>
    %111 = tpu.matmul %108, %110, %cst_63 {dimension_numbers = #tpu.dot_dimension_numbers<[1], [0], [0], [1], [0, 0, 1, 1], [], []>} : vector<64x32xf32>, vector<32x32xf32>, vector<64x32xf32> -> vector<64x32xf32>
    %112 = arith.addf %107, %111 : vector<64x32xf32>
    %c9 = arith.constant 9 : index
    %c0_64 = arith.constant 0 : index
    %113 = vector.load %arg16[%c9, %c0_64] : memref<96x32xf32, #tpu.memory_space<vmem>>, vector<64x32xf32>
    %c2 = arith.constant 2 : index
    %c0_65 = arith.constant 0 : index
    %c0_66 = arith.constant 0 : index
    %114 = vector.load %arg7[%c2, %c0_65, %c0_66] : memref<9x32x32xf32, #tpu.memory_space<vmem>>, vector<1x32x32xf32>
    %115 = vector.shape_cast %114 : vector<1x32x32xf32> to vector<32x32xf32>
    %cst_67 = arith.constant dense<0.000000e+00> : vector<64x32xf32>
    %116 = tpu.matmul %113, %115, %cst_67 {dimension_numbers = #tpu.dot_dimension_numbers<[1], [0], [0], [1], [0, 0, 1, 1], [], []>} : vector<64x32xf32>, vector<32x32xf32>, vector<64x32xf32> -> vector<64x32xf32>
    %c17 = arith.constant 17 : index
    %c0_68 = arith.constant 0 : index
    %117 = vector.load %arg16[%c17, %c0_68] : memref<96x32xf32, #tpu.memory_space<vmem>>, vector<64x32xf32>
    %c5 = arith.constant 5 : index
    %c0_69 = arith.constant 0 : index
    %c0_70 = arith.constant 0 : index
    %118 = vector.load %arg7[%c5, %c0_69, %c0_70] : memref<9x32x32xf32, #tpu.memory_space<vmem>>, vector<1x32x32xf32>
    %119 = vector.shape_cast %118 : vector<1x32x32xf32> to vector<32x32xf32>
    %cst_71 = arith.constant dense<0.000000e+00> : vector<64x32xf32>
    %120 = tpu.matmul %117, %119, %cst_71 {dimension_numbers = #tpu.dot_dimension_numbers<[1], [0], [0], [1], [0, 0, 1, 1], [], []>} : vector<64x32xf32>, vector<32x32xf32>, vector<64x32xf32> -> vector<64x32xf32>
    %121 = arith.addf %116, %120 : vector<64x32xf32>
    %c25 = arith.constant 25 : index
    %c0_72 = arith.constant 0 : index
    %122 = vector.load %arg16[%c25, %c0_72] : memref<96x32xf32, #tpu.memory_space<vmem>>, vector<64x32xf32>
    %c8_73 = arith.constant 8 : index
    %c0_74 = arith.constant 0 : index
    %c0_75 = arith.constant 0 : index
    %123 = vector.load %arg7[%c8_73, %c0_74, %c0_75] : memref<9x32x32xf32, #tpu.memory_space<vmem>>, vector<1x32x32xf32>
    %124 = vector.shape_cast %123 : vector<1x32x32xf32> to vector<32x32xf32>
    %cst_76 = arith.constant dense<0.000000e+00> : vector<64x32xf32>
    %125 = tpu.matmul %122, %124, %cst_76 {dimension_numbers = #tpu.dot_dimension_numbers<[1], [0], [0], [1], [0, 0, 1, 1], [], []>} : vector<64x32xf32>, vector<32x32xf32>, vector<64x32xf32> -> vector<64x32xf32>
    %126 = arith.addf %121, %125 : vector<64x32xf32>
    %127 = vector.broadcast %23 : vector<64x1xf32> to vector<64x32xf32>
    %128 = arith.mulf %112, %127 : vector<64x32xf32>
    %129 = arith.addf %98, %128 : vector<64x32xf32>
    %130 = vector.broadcast %27 : vector<64x1xf32> to vector<64x32xf32>
    %131 = arith.mulf %126, %130 : vector<64x32xf32>
    %132 = arith.addf %129, %131 : vector<64x32xf32>
    %c0_77 = arith.constant 0 : index
    %c0_78 = arith.constant 0 : index
    %133 = vector.load %arg8[%c0_77, %c0_78] : memref<1x32xf32, #tpu.memory_space<vmem>>, vector<1x32xf32>
    %134 = vector.broadcast %133 : vector<1x32xf32> to vector<64x32xf32>
    %135 = arith.addf %132, %134 : vector<64x32xf32>
    %136 = vector.broadcast %39 : vector<1x32xf32> to vector<64x32xf32>
    %137 = arith.addf %135, %136 : vector<64x32xf32>
    %cst_79 = arith.constant dense<0.000000e+00> : vector<32xf32>
    %138 = vector.multi_reduction <add>, %137, %cst_79 [0] : vector<64x32xf32> to vector<32xf32>
    %139 = vector.shape_cast %138 : vector<32xf32> to vector<1x32xf32>
    %140 = arith.mulf %137, %137 : vector<64x32xf32>
    %cst_80 = arith.constant dense<0.000000e+00> : vector<32xf32>
    %141 = vector.multi_reduction <add>, %140, %cst_80 [0] : vector<64x32xf32> to vector<32xf32>
    %142 = vector.shape_cast %141 : vector<32xf32> to vector<1x32xf32>
    %143 = tpu.concatenate %139, %142 in 0 : vector<1x32xf32>, vector<1x32xf32> -> vector<2x32xf32>
    %c0_81 = arith.constant 0 : index
    %c0_82 = arith.constant 0 : index
    %144 = vector.load %arg5[%c0_81, %c0_82] : memref<32x32xf32, #tpu.memory_space<vmem>>, vector<32x32xf32>
    %cst_83 = arith.constant dense<0.000000e+00> : vector<2x32xf32>
    %145 = tpu.matmul %143, %144, %cst_83 {dimension_numbers = #tpu.dot_dimension_numbers<[1], [0], [0], [1], [0, 0, 1, 1], [], []>} : vector<2x32xf32>, vector<32x32xf32>, vector<2x32xf32> -> vector<2x32xf32>
    %146 = vector.extract_strided_slice %145 {offsets = [0, 0], sizes = [1, 32], strides = [1, 1]} : vector<2x32xf32> to vector<1x32xf32>
    %cst_84 = arith.constant 6.400000e+01 : f32
    %147 = vector.broadcast %cst_84 : f32 to vector<1x32xf32>
    %148 = arith.divf %146, %147 : vector<1x32xf32>
    %149 = vector.extract_strided_slice %145 {offsets = [1, 0], sizes = [1, 32], strides = [1, 1]} : vector<2x32xf32> to vector<1x32xf32>
    %cst_85 = arith.constant 6.400000e+01 : f32
    %150 = vector.broadcast %cst_85 : f32 to vector<1x32xf32>
    %151 = arith.divf %149, %150 : vector<1x32xf32>
    %152 = arith.mulf %148, %148 : vector<1x32xf32>
    %153 = arith.subf %151, %152 : vector<1x32xf32>
    %cst_86 = arith.constant 0.000000e+00 : f32
    %154 = vector.broadcast %cst_86 : f32 to vector<1x32xf32>
    %155 = arith.maximumf %153, %154 : vector<1x32xf32>
    %cst_87 = arith.constant 9.99999974E-6 : f32
    %156 = vector.broadcast %cst_87 : f32 to vector<1x32xf32>
    %157 = arith.addf %155, %156 : vector<1x32xf32>
    %158 = math.rsqrt %157 : vector<1x32xf32>
    %159 = tpu.concatenate %148, %158 in 0 : vector<1x32xf32>, vector<1x32xf32> -> vector<2x32xf32>
    %c0_88 = arith.constant 0 : index
    %c0_89 = arith.constant 0 : index
    %160 = vector.load %arg6[%c0_88, %c0_89] : memref<32x32xf32, #tpu.memory_space<vmem>>, vector<32x32xf32>
    %cst_90 = arith.constant dense<0.000000e+00> : vector<2x32xf32>
    %161 = tpu.matmul %159, %160, %cst_90 {dimension_numbers = #tpu.dot_dimension_numbers<[1], [0], [0], [1], [0, 0, 1, 1], [], []>} : vector<2x32xf32>, vector<32x32xf32>, vector<2x32xf32> -> vector<2x32xf32>
    %162 = vector.extract_strided_slice %161 {offsets = [0, 0], sizes = [1, 32], strides = [1, 1]} : vector<2x32xf32> to vector<1x32xf32>
    %163 = vector.broadcast %162 : vector<1x32xf32> to vector<64x32xf32>
    %164 = arith.subf %137, %163 : vector<64x32xf32>
    %165 = vector.extract_strided_slice %161 {offsets = [1, 0], sizes = [1, 32], strides = [1, 1]} : vector<2x32xf32> to vector<1x32xf32>
    %166 = vector.broadcast %165 : vector<1x32xf32> to vector<64x32xf32>
    %167 = arith.mulf %164, %166 : vector<64x32xf32>
    %c0_91 = arith.constant 0 : index
    %c0_92 = arith.constant 0 : index
    %168 = vector.load %arg11[%c0_91, %c0_92] : memref<1x32xf32, #tpu.memory_space<vmem>>, vector<1x32xf32>
    %169 = vector.broadcast %168 : vector<1x32xf32> to vector<64x32xf32>
    %170 = arith.mulf %167, %169 : vector<64x32xf32>
    %c0_93 = arith.constant 0 : index
    %c0_94 = arith.constant 0 : index
    %171 = vector.load %arg12[%c0_93, %c0_94] : memref<1x32xf32, #tpu.memory_space<vmem>>, vector<1x32xf32>
    %172 = vector.broadcast %171 : vector<1x32xf32> to vector<64x32xf32>
    %173 = arith.addf %170, %172 : vector<64x32xf32>
    %174 = arith.negf %173 : vector<64x32xf32>
    %175 = math.exp %174 : vector<64x32xf32>
    %cst_95 = arith.constant 1.000000e+00 : f32
    %176 = vector.broadcast %cst_95 : f32 to vector<64x32xf32>
    %177 = arith.addf %176, %175 : vector<64x32xf32>
    %178 = arith.divf %176, %177 : vector<64x32xf32>
    %179 = arith.mulf %173, %178 : vector<64x32xf32>
    %c16_96 = arith.constant 16 : index
    %c0_97 = arith.constant 0 : index
    %180 = vector.load %arg16[%c16_96, %c0_97] : memref<96x32xf32, #tpu.memory_space<vmem>>, vector<64x32xf32>
    tpu.vector_store %arg16[%c16_96, %c0_97], %179 {strides = array<i32>} : memref<96x32xf32, #tpu.memory_space<vmem>>, vector<64x32xf32>,
    %c8_98 = arith.constant 8 : index
    %c0_99 = arith.constant 0 : index
    %181 = vector.load %arg16[%c8_98, %c0_99] : memref<96x32xf32, #tpu.memory_space<vmem>>, vector<64x32xf32>
    %c1_100 = arith.constant 1 : index
    %c0_101 = arith.constant 0 : index
    %c0_102 = arith.constant 0 : index
    %182 = vector.load %arg13[%c1_100, %c0_101, %c0_102] : memref<9x32x32xf32, #tpu.memory_space<vmem>>, vector<1x32x32xf32>
    %183 = vector.shape_cast %182 : vector<1x32x32xf32> to vector<32x32xf32>
    %cst_103 = arith.constant dense<0.000000e+00> : vector<64x32xf32>
    %184 = tpu.matmul %181, %183, %cst_103 {dimension_numbers = #tpu.dot_dimension_numbers<[1], [0], [0], [1], [0, 0, 1, 1], [], []>} : vector<64x32xf32>, vector<32x32xf32>, vector<64x32xf32> -> vector<64x32xf32>
    %c16_104 = arith.constant 16 : index
    %c0_105 = arith.constant 0 : index
    %185 = vector.load %arg16[%c16_104, %c0_105] : memref<96x32xf32, #tpu.memory_space<vmem>>, vector<64x32xf32>
    %c4_106 = arith.constant 4 : index
    %c0_107 = arith.constant 0 : index
    %c0_108 = arith.constant 0 : index
    %186 = vector.load %arg13[%c4_106, %c0_107, %c0_108] : memref<9x32x32xf32, #tpu.memory_space<vmem>>, vector<1x32x32xf32>
    %187 = vector.shape_cast %186 : vector<1x32x32xf32> to vector<32x32xf32>
    %cst_109 = arith.constant dense<0.000000e+00> : vector<64x32xf32>
    %188 = tpu.matmul %185, %187, %cst_109 {dimension_numbers = #tpu.dot_dimension_numbers<[1], [0], [0], [1], [0, 0, 1, 1], [], []>} : vector<64x32xf32>, vector<32x32xf32>, vector<64x32xf32> -> vector<64x32xf32>
    %189 = arith.addf %184, %188 : vector<64x32xf32>
    %c24_110 = arith.constant 24 : index
    %c0_111 = arith.constant 0 : index
    %190 = vector.load %arg16[%c24_110, %c0_111] : memref<96x32xf32, #tpu.memory_space<vmem>>, vector<64x32xf32>
    %c7_112 = arith.constant 7 : index
    %c0_113 = arith.constant 0 : index
    %c0_114 = arith.constant 0 : index
    %191 = vector.load %arg13[%c7_112, %c0_113, %c0_114] : memref<9x32x32xf32, #tpu.memory_space<vmem>>, vector<1x32x32xf32>
    %192 = vector.shape_cast %191 : vector<1x32x32xf32> to vector<32x32xf32>
    %cst_115 = arith.constant dense<0.000000e+00> : vector<64x32xf32>
    %193 = tpu.matmul %190, %192, %cst_115 {dimension_numbers = #tpu.dot_dimension_numbers<[1], [0], [0], [1], [0, 0, 1, 1], [], []>} : vector<64x32xf32>, vector<32x32xf32>, vector<64x32xf32> -> vector<64x32xf32>
    %194 = arith.addf %189, %193 : vector<64x32xf32>
    %c7_116 = arith.constant 7 : index
    %c0_117 = arith.constant 0 : index
    %195 = vector.load %arg16[%c7_116, %c0_117] : memref<96x32xf32, #tpu.memory_space<vmem>>, vector<64x32xf32>
    %c0_118 = arith.constant 0 : index
    %c0_119 = arith.constant 0 : index
    %c0_120 = arith.constant 0 : index
    %196 = vector.load %arg13[%c0_118, %c0_119, %c0_120] : memref<9x32x32xf32, #tpu.memory_space<vmem>>, vector<1x32x32xf32>
    %197 = vector.shape_cast %196 : vector<1x32x32xf32> to vector<32x32xf32>
    %cst_121 = arith.constant dense<0.000000e+00> : vector<64x32xf32>
    %198 = tpu.matmul %195, %197, %cst_121 {dimension_numbers = #tpu.dot_dimension_numbers<[1], [0], [0], [1], [0, 0, 1, 1], [], []>} : vector<64x32xf32>, vector<32x32xf32>, vector<64x32xf32> -> vector<64x32xf32>
    %c15_122 = arith.constant 15 : index
    %c0_123 = arith.constant 0 : index
    %199 = vector.load %arg16[%c15_122, %c0_123] : memref<96x32xf32, #tpu.memory_space<vmem>>, vector<64x32xf32>
    %c3_124 = arith.constant 3 : index
    %c0_125 = arith.constant 0 : index
    %c0_126 = arith.constant 0 : index
    %200 = vector.load %arg13[%c3_124, %c0_125, %c0_126] : memref<9x32x32xf32, #tpu.memory_space<vmem>>, vector<1x32x32xf32>
    %201 = vector.shape_cast %200 : vector<1x32x32xf32> to vector<32x32xf32>
    %cst_127 = arith.constant dense<0.000000e+00> : vector<64x32xf32>
    %202 = tpu.matmul %199, %201, %cst_127 {dimension_numbers = #tpu.dot_dimension_numbers<[1], [0], [0], [1], [0, 0, 1, 1], [], []>} : vector<64x32xf32>, vector<32x32xf32>, vector<64x32xf32> -> vector<64x32xf32>
    %203 = arith.addf %198, %202 : vector<64x32xf32>
    %c23_128 = arith.constant 23 : index
    %c0_129 = arith.constant 0 : index
    %204 = vector.load %arg16[%c23_128, %c0_129] : memref<96x32xf32, #tpu.memory_space<vmem>>, vector<64x32xf32>
    %c6_130 = arith.constant 6 : index
    %c0_131 = arith.constant 0 : index
    %c0_132 = arith.constant 0 : index
    %205 = vector.load %arg13[%c6_130, %c0_131, %c0_132] : memref<9x32x32xf32, #tpu.memory_space<vmem>>, vector<1x32x32xf32>
    %206 = vector.shape_cast %205 : vector<1x32x32xf32> to vector<32x32xf32>
    %cst_133 = arith.constant dense<0.000000e+00> : vector<64x32xf32>
    %207 = tpu.matmul %204, %206, %cst_133 {dimension_numbers = #tpu.dot_dimension_numbers<[1], [0], [0], [1], [0, 0, 1, 1], [], []>} : vector<64x32xf32>, vector<32x32xf32>, vector<64x32xf32> -> vector<64x32xf32>
    %208 = arith.addf %203, %207 : vector<64x32xf32>
    %c9_134 = arith.constant 9 : index
    %c0_135 = arith.constant 0 : index
    %209 = vector.load %arg16[%c9_134, %c0_135] : memref<96x32xf32, #tpu.memory_space<vmem>>, vector<64x32xf32>
    %c2_136 = arith.constant 2 : index
    %c0_137 = arith.constant 0 : index
    %c0_138 = arith.constant 0 : index
    %210 = vector.load %arg13[%c2_136, %c0_137, %c0_138] : memref<9x32x32xf32, #tpu.memory_space<vmem>>, vector<1x32x32xf32>
    %211 = vector.shape_cast %210 : vector<1x32x32xf32> to vector<32x32xf32>
    %cst_139 = arith.constant dense<0.000000e+00> : vector<64x32xf32>
    %212 = tpu.matmul %209, %211, %cst_139 {dimension_numbers = #tpu.dot_dimension_numbers<[1], [0], [0], [1], [0, 0, 1, 1], [], []>} : vector<64x32xf32>, vector<32x32xf32>, vector<64x32xf32> -> vector<64x32xf32>
    %c17_140 = arith.constant 17 : index
    %c0_141 = arith.constant 0 : index
    %213 = vector.load %arg16[%c17_140, %c0_141] : memref<96x32xf32, #tpu.memory_space<vmem>>, vector<64x32xf32>
    %c5_142 = arith.constant 5 : index
    %c0_143 = arith.constant 0 : index
    %c0_144 = arith.constant 0 : index
    %214 = vector.load %arg13[%c5_142, %c0_143, %c0_144] : memref<9x32x32xf32, #tpu.memory_space<vmem>>, vector<1x32x32xf32>
    %215 = vector.shape_cast %214 : vector<1x32x32xf32> to vector<32x32xf32>
    %cst_145 = arith.constant dense<0.000000e+00> : vector<64x32xf32>
    %216 = tpu.matmul %213, %215, %cst_145 {dimension_numbers = #tpu.dot_dimension_numbers<[1], [0], [0], [1], [0, 0, 1, 1], [], []>} : vector<64x32xf32>, vector<32x32xf32>, vector<64x32xf32> -> vector<64x32xf32>
    %217 = arith.addf %212, %216 : vector<64x32xf32>
    %c25_146 = arith.constant 25 : index
    %c0_147 = arith.constant 0 : index
    %218 = vector.load %arg16[%c25_146, %c0_147] : memref<96x32xf32, #tpu.memory_space<vmem>>, vector<64x32xf32>
    %c8_148 = arith.constant 8 : index
    %c0_149 = arith.constant 0 : index
    %c0_150 = arith.constant 0 : index
    %219 = vector.load %arg13[%c8_148, %c0_149, %c0_150] : memref<9x32x32xf32, #tpu.memory_space<vmem>>, vector<1x32x32xf32>
    %220 = vector.shape_cast %219 : vector<1x32x32xf32> to vector<32x32xf32>
    %cst_151 = arith.constant dense<0.000000e+00> : vector<64x32xf32>
    %221 = tpu.matmul %218, %220, %cst_151 {dimension_numbers = #tpu.dot_dimension_numbers<[1], [0], [0], [1], [0, 0, 1, 1], [], []>} : vector<64x32xf32>, vector<32x32xf32>, vector<64x32xf32> -> vector<64x32xf32>
    %222 = arith.addf %217, %221 : vector<64x32xf32>
    %223 = vector.broadcast %23 : vector<64x1xf32> to vector<64x32xf32>
    %224 = arith.mulf %208, %223 : vector<64x32xf32>
    %225 = arith.addf %194, %224 : vector<64x32xf32>
    %226 = vector.broadcast %27 : vector<64x1xf32> to vector<64x32xf32>
    %227 = arith.mulf %222, %226 : vector<64x32xf32>
    %228 = arith.addf %225, %227 : vector<64x32xf32>
    %c0_152 = arith.constant 0 : index
    %c0_153 = arith.constant 0 : index
    %229 = vector.load %arg14[%c0_152, %c0_153] : memref<1x32xf32, #tpu.memory_space<vmem>>, vector<1x32xf32>
    %230 = vector.broadcast %229 : vector<1x32xf32> to vector<64x32xf32>
    %231 = arith.addf %228, %230 : vector<64x32xf32>
    %c0_154 = arith.constant 0 : index
    %c0_155 = arith.constant 0 : index
    %c0_156 = arith.constant 0 : index
    %c0_157 = arith.constant 0 : index
    %232 = vector.load %arg1[%c0_154, %c0_155, %c0_156, %c0_157] : memref<1x1x64x32xf32, #tpu.memory_space<vmem>>, vector<1x1x64x32xf32>
    %233 = vector.shape_cast %232 : vector<1x1x64x32xf32> to vector<64x32xf32>
    %234 = arith.addf %233, %231 : vector<64x32xf32>
    %c0_158 = arith.constant 0 : index
    %c0_159 = arith.constant 0 : index
    %c0_160 = arith.constant 0 : index
    %c0_161 = arith.constant 0 : index
    %235 = vector.load %arg15[%c0_158, %c0_159, %c0_160, %c0_161] : memref<1x1x64x32xf32, #tpu.memory_space<vmem>>, vector<1x1x64x32xf32>
    %236 = vector.shape_cast %235 : vector<1x1x64x32xf32> to vector<64x32xf32>
    %237 = vector.shape_cast %234 : vector<64x32xf32> to vector<1x1x64x32xf32>
    tpu.vector_store %arg15[%c0_158, %c0_159, %c0_160, %c0_161], %237 {strides = array<i32>} : memref<1x1x64x32xf32, #tpu.memory_space<vmem>>, vector<1x1x64x32xf32>,
    return
  }
  func.func @transform_0(%arg0: i32) -> (i32, i32, i32, i32) {
    %c0_i32 = arith.constant 0 : i32
    %c0_i32_0 = arith.constant 0 : i32
    %c0_i32_1 = arith.constant 0 : i32
    %c0_i32_2 = arith.constant 0 : i32
    return %arg0, %c0_i32, %c0_i32_0, %c0_i32_1 : i32, i32, i32, i32
  }
  func.func @transform_1(%arg0: i32) -> (i32, i32, i32) {
    %c0_i32 = arith.constant 0 : i32
    %c0_i32_0 = arith.constant 0 : i32
    %c0_i32_1 = arith.constant 0 : i32
    return %arg0, %c0_i32, %c0_i32_0 : i32, i32, i32
  }
  func.func @transform_2(%arg0: i32) -> (i32, i32) {
    %c0_i32 = arith.constant 0 : i32
    %c0_i32_0 = arith.constant 0 : i32
    %c0_i32_1 = arith.constant 0 : i32
    return %c0_i32, %c0_i32_0 : i32, i32
  }
  func.func @transform_3(%arg0: i32) -> (i32, i32) {
    %c0_i32 = arith.constant 0 : i32
    %c0_i32_0 = arith.constant 0 : i32
    %c0_i32_1 = arith.constant 0 : i32
    return %c0_i32, %c0_i32_0 : i32, i32
  }
  func.func @transform_4(%arg0: i32) -> (i32, i32) {
    %c0_i32 = arith.constant 0 : i32
    %c0_i32_0 = arith.constant 0 : i32
    %c0_i32_1 = arith.constant 0 : i32
    return %c0_i32, %c0_i32_0 : i32, i32
  }
  func.func @transform_5(%arg0: i32) -> (i32, i32) {
    %c0_i32 = arith.constant 0 : i32
    %c0_i32_0 = arith.constant 0 : i32
    %c0_i32_1 = arith.constant 0 : i32
    return %c0_i32, %c0_i32_0 : i32, i32
  }
  func.func @transform_6(%arg0: i32) -> (i32, i32, i32) {
    %c0_i32 = arith.constant 0 : i32
    %c0_i32_0 = arith.constant 0 : i32
    %c0_i32_1 = arith.constant 0 : i32
    %c0_i32_2 = arith.constant 0 : i32
    return %c0_i32, %c0_i32_0, %c0_i32_1 : i32, i32, i32
  }
  func.func @transform_7(%arg0: i32) -> (i32, i32) {
    %c0_i32 = arith.constant 0 : i32
    %c0_i32_0 = arith.constant 0 : i32
    %c0_i32_1 = arith.constant 0 : i32
    return %c0_i32, %c0_i32_0 : i32, i32
  }
  func.func @transform_8(%arg0: i32) -> (i32, i32) {
    %c0_i32 = arith.constant 0 : i32
    %c0_i32_0 = arith.constant 0 : i32
    %c0_i32_1 = arith.constant 0 : i32
    return %c0_i32, %c0_i32_0 : i32, i32
  }
  func.func @transform_9(%arg0: i32) -> (i32, i32) {
    %c0_i32 = arith.constant 0 : i32
    %c0_i32_0 = arith.constant 0 : i32
    %c0_i32_1 = arith.constant 0 : i32
    return %c0_i32, %c0_i32_0 : i32, i32
  }
  func.func @transform_10(%arg0: i32) -> (i32, i32) {
    %c0_i32 = arith.constant 0 : i32
    %c0_i32_0 = arith.constant 0 : i32
    %c0_i32_1 = arith.constant 0 : i32
    return %c0_i32, %c0_i32_0 : i32, i32
  }
  func.func @transform_11(%arg0: i32) -> (i32, i32) {
    %c0_i32 = arith.constant 0 : i32
    %c0_i32_0 = arith.constant 0 : i32
    %c0_i32_1 = arith.constant 0 : i32
    return %c0_i32, %c0_i32_0 : i32, i32
  }
  func.func @transform_12(%arg0: i32) -> (i32, i32, i32) {
    %c0_i32 = arith.constant 0 : i32
    %c0_i32_0 = arith.constant 0 : i32
    %c0_i32_1 = arith.constant 0 : i32
    %c0_i32_2 = arith.constant 0 : i32
    return %c0_i32, %c0_i32_0, %c0_i32_1 : i32, i32, i32
  }
  func.func @transform_13(%arg0: i32) -> (i32, i32) {
    %c0_i32 = arith.constant 0 : i32
    %c0_i32_0 = arith.constant 0 : i32
    %c0_i32_1 = arith.constant 0 : i32
    return %c0_i32, %c0_i32_0 : i32, i32
  }
  func.func @transform_14(%arg0: i32) -> (i32, i32, i32, i32) {
    %c0_i32 = arith.constant 0 : i32
    %c0_i32_0 = arith.constant 0 : i32
    %c0_i32_1 = arith.constant 0 : i32
    %c0_i32_2 = arith.constant 0 : i32
    return %arg0, %c0_i32, %c0_i32_0, %c0_i32_1 : i32, i32, i32, i32
  }
}

module attributes {stable_mosaic.version = 11 : i64} {
  func.func @kernel(%arg0: i32, %arg1: memref<1x1x64x32xf32, #tpu.memory_space<vmem>>, %arg2: memref<1x1x32xf32, #tpu.memory_space<vmem>>, %arg3: memref<1x32xf32, #tpu.memory_space<vmem>>, %arg4: memref<1x32xf32, #tpu.memory_space<vmem>>, %arg5: memref<32x32xf32, #tpu.memory_space<vmem>>, %arg6: memref<32x32xf32, #tpu.memory_space<vmem>>, %arg7: memref<9x32x32xf32, #tpu.memory_space<vmem>>, %arg8: memref<1x32xf32, #tpu.memory_space<vmem>>, %arg9: memref<32x32xf32, #tpu.memory_space<vmem>>, %arg10: memref<1x32xf32, #tpu.memory_space<vmem>>, %arg11: memref<1x32xf32, #tpu.memory_space<vmem>>, %arg12: memref<1x32xf32, #tpu.memory_space<vmem>>, %arg13: memref<9x32x32xf32, #tpu.memory_space<vmem>>, %arg14: memref<1x32xf32, #tpu.memory_space<vmem>>, %arg15: memref<1x1x64x32xf32, #tpu.memory_space<vmem>>, %arg16: memref<96x32xf32, #tpu.memory_space<vmem>>) attributes {dimension_semantics = [#tpu.dimension_semantics<parallel>], iteration_bounds = array<i64: 2>, scalar_prefetch = 0 : i64, scratch_operands = 1 : i64, tpu.core_type = #tpu.core_type<tc>, window_params = [{transform_indices = @transform_0, window_bounds = array<i64: 1, 1, 64, 32>}, {transform_indices = @transform_1, window_bounds = array<i64: 1, 1, 32>}, {pipeline_mode = #tpu.pipeline_mode<synchronous>, transform_indices = @transform_2, window_bounds = array<i64: 1, 32>}, {pipeline_mode = #tpu.pipeline_mode<synchronous>, transform_indices = @transform_3, window_bounds = array<i64: 1, 32>}, {pipeline_mode = #tpu.pipeline_mode<synchronous>, transform_indices = @transform_4, window_bounds = array<i64: 32, 32>}, {pipeline_mode = #tpu.pipeline_mode<synchronous>, transform_indices = @transform_5, window_bounds = array<i64: 32, 32>}, {pipeline_mode = #tpu.pipeline_mode<synchronous>, transform_indices = @transform_6, window_bounds = array<i64: 9, 32, 32>}, {pipeline_mode = #tpu.pipeline_mode<synchronous>, transform_indices = @transform_7, window_bounds = array<i64: 1, 32>}, {pipeline_mode = #tpu.pipeline_mode<synchronous>, transform_indices = @transform_8, window_bounds = array<i64: 32, 32>}, {pipeline_mode = #tpu.pipeline_mode<synchronous>, transform_indices = @transform_9, window_bounds = array<i64: 1, 32>}, {pipeline_mode = #tpu.pipeline_mode<synchronous>, transform_indices = @transform_10, window_bounds = array<i64: 1, 32>}, {pipeline_mode = #tpu.pipeline_mode<synchronous>, transform_indices = @transform_11, window_bounds = array<i64: 1, 32>}, {pipeline_mode = #tpu.pipeline_mode<synchronous>, transform_indices = @transform_12, window_bounds = array<i64: 9, 32, 32>}, {pipeline_mode = #tpu.pipeline_mode<synchronous>, transform_indices = @transform_13, window_bounds = array<i64: 1, 32>}, {transform_indices = @transform_14, window_bounds = array<i64: 1, 1, 64, 32>}]} {
    %cst = arith.constant 0.000000e+00 : f32
    %0 = vector.broadcast %cst : f32 to vector<16x32xf32>
    %c0 = arith.constant 0 : index
    %c0_0 = arith.constant 0 : index
    %1 = vector.load %arg16[%c0, %c0_0] : memref<96x32xf32, #tpu.memory_space<vmem>>, vector<16x32xf32>
    tpu.vector_store %arg16[%c0, %c0_0], %0 {strides = array<i32>} : memref<96x32xf32, #tpu.memory_space<vmem>>, vector<16x32xf32>,
    %c80 = arith.constant 80 : index
    %c0_1 = arith.constant 0 : index
    %2 = vector.load %arg16[%c80, %c0_1] : memref<96x32xf32, #tpu.memory_space<vmem>>, vector<16x32xf32>
    tpu.vector_store %arg16[%c80, %c0_1], %0 {strides = array<i32>} : memref<96x32xf32, #tpu.memory_space<vmem>>, vector<16x32xf32>,
    %3 = tpu.iota {dimensions = array<i32: 0>} : vector<64x1xi32>
    %c8_i32 = arith.constant 8 : i32
    %c0_i32 = arith.constant 0 : i32
    %4 = arith.cmpi eq, %c8_i32, %c0_i32 : i32
    %c1_i32 = arith.constant 1 : i32
    %5 = arith.select %4, %c1_i32, %c8_i32 : i32
    %6 = vector.broadcast %5 : i32 to vector<64x1xi32>
    %7 = arith.remsi %3, %6 : vector<64x1xi32>
    %c0_i32_2 = arith.constant 0 : i32
    %8 = vector.broadcast %c0_i32_2 : i32 to vector<64x1xi32>
    %9 = arith.cmpi ne, %7, %8 : vector<64x1xi32>
    %c0_i32_3 = arith.constant 0 : i32
    %10 = vector.broadcast %c0_i32_3 : i32 to vector<64x1xi32>
    %11 = arith.cmpi slt, %7, %10 : vector<64x1xi32>
    %c0_i32_4 = arith.constant 0 : i32
    %12 = arith.cmpi slt, %5, %c0_i32_4 : i32
    %13 = vector.broadcast %12 : i1 to vector<64x1xi1>
    %14 = vector.broadcast %13 : vector<64x1xi1> to vector<64x1xi1>
    %15 = arith.xori %11, %14 : vector<64x1xi1>
    %16 = arith.andi %15, %9 : vector<64x1xi1>
    %17 = vector.broadcast %5 : i32 to vector<64x1xi32>
    %18 = arith.addi %7, %17 : vector<64x1xi32>
    %19 = arith.select %16, %18, %7 : vector<64x1xi1>, vector<64x1xi32>
    %c0_i32_5 = arith.constant 0 : i32
    %20 = vector.broadcast %c0_i32_5 : i32 to vector<64x1xi32>
    %21 = arith.cmpi sgt, %19, %20 : vector<64x1xi32>
    %22 = arith.extui %21 : vector<64x1xi1> to vector<64x1xi32>
    %23 = arith.sitofp %22 : vector<64x1xi32> to vector<64x1xf32>
    %c7_i32 = arith.constant 7 : i32
    %24 = vector.broadcast %c7_i32 : i32 to vector<64x1xi32>
    %25 = arith.cmpi slt, %19, %24 : vector<64x1xi32>
    %26 = arith.extui %25 : vector<64x1xi1> to vector<64x1xi32>
    %27 = arith.sitofp %26 : vector<64x1xi32> to vector<64x1xf32>
    %c0_6 = arith.constant 0 : index
    %c0_7 = arith.constant 0 : index
    %c0_8 = arith.constant 0 : index
    %28 = vector.load %arg2[%c0_6, %c0_7, %c0_8] : memref<1x1x32xf32, #tpu.memory_space<vmem>>, vector<1x1x32xf32>
    %29 = vector.shape_cast %28 : vector<1x1x32xf32> to vector<1x32xf32>
    %30 = arith.negf %29 : vector<1x32xf32>
    %31 = math.exp %30 : vector<1x32xf32>
    %cst_9 = arith.constant 1.000000e+00 : f32
    %32 = vector.broadcast %cst_9 : f32 to vector<1x32xf32>
    %33 = arith.addf %32, %31 : vector<1x32xf32>
    %34 = arith.divf %32, %33 : vector<1x32xf32>
    %35 = arith.mulf %29, %34 : vector<1x32xf32>
    %c0_10 = arith.constant 0 : index
    %c0_11 = arith.constant 0 : index
    %36 = vector.load %arg9[%c0_10, %c0_11] : memref<32x32xf32, #tpu.memory_space<vmem>>, vector<32x32xf32>
    %cst_12 = arith.constant dense<0.000000e+00> : vector<1x32xf32>
    %37 = tpu.matmul %35, %36, %cst_12 {dimension_numbers = #tpu.dot_dimension_numbers<[1], [0], [0], [1], [0, 0, 1, 1], [], []>} : vector<1x32xf32>, vector<32x32xf32>, vector<1x32xf32> -> vector<1x32xf32>
    %c0_13 = arith.constant 0 : index
    %c0_14 = arith.constant 0 : index
    %38 = vector.load %arg10[%c0_13, %c0_14] : memref<1x32xf32, #tpu.memory_space<vmem>>, vector<1x32xf32>
    %39 = arith.addf %37, %38 : vector<1x32xf32>
    %c0_15 = arith.constant 0 : index
    %c0_16 = arith.constant 0 : index
    %c0_17 = arith.constant 0 : index
    %c0_18 = arith.constant 0 : index
    %40 = vector.load %arg1[%c0_15, %c0_16, %c0_17, %c0_18] : memref<1x1x64x32xf32, #tpu.memory_space<vmem>>, vector<1x1x64x32xf32>
    %41 = vector.shape_cast %40 : vector<1x1x64x32xf32> to vector<64x32xf32>
    %cst_19 = arith.constant dense<0.000000e+00> : vector<32xf32>
    %42 = vector.multi_reduction <add>, %41, %cst_19 [0] : vector<64x32xf32> to vector<32xf32>
    %43 = vector.shape_cast %42 : vector<32xf32> to vector<1x32xf32>
    %44 = arith.mulf %41, %41 : vector<64x32xf32>
    %cst_20 = arith.constant dense<0.000000e+00> : vector<32xf32>
    %45 = vector.multi_reduction <add>, %44, %cst_20 [0] : vector<64x32xf32> to vector<32xf32>
    %46 = vector.shape_cast %45 : vector<32xf32> to vector<1x32xf32>
    %47 = tpu.concatenate %43, %46 in 0 : vector<1x32xf32>, vector<1x32xf32> -> vector<2x32xf32>
    %c0_21 = arith.constant 0 : index
    %c0_22 = arith.constant 0 : index
    %48 = vector.load %arg5[%c0_21, %c0_22] : memref<32x32xf32, #tpu.memory_space<vmem>>, vector<32x32xf32>
    %cst_23 = arith.constant dense<0.000000e+00> : vector<2x32xf32>
    %49 = tpu.matmul %47, %48, %cst_23 {dimension_numbers = #tpu.dot_dimension_numbers<[1], [0], [0], [1], [0, 0, 1, 1], [], []>} : vector<2x32xf32>, vector<32x32xf32>, vector<2x32xf32> -> vector<2x32xf32>
    %50 = vector.extract_strided_slice %49 {offsets = [0, 0], sizes = [1, 32], strides = [1, 1]} : vector<2x32xf32> to vector<1x32xf32>
    %cst_24 = arith.constant 6.400000e+01 : f32
    %51 = vector.broadcast %cst_24 : f32 to vector<1x32xf32>
    %52 = arith.divf %50, %51 : vector<1x32xf32>
    %53 = vector.extract_strided_slice %49 {offsets = [1, 0], sizes = [1, 32], strides = [1, 1]} : vector<2x32xf32> to vector<1x32xf32>
    %cst_25 = arith.constant 6.400000e+01 : f32
    %54 = vector.broadcast %cst_25 : f32 to vector<1x32xf32>
    %55 = arith.divf %53, %54 : vector<1x32xf32>
    %56 = arith.mulf %52, %52 : vector<1x32xf32>
    %57 = arith.subf %55, %56 : vector<1x32xf32>
    %cst_26 = arith.constant 0.000000e+00 : f32
    %58 = vector.broadcast %cst_26 : f32 to vector<1x32xf32>
    %59 = arith.maximumf %57, %58 : vector<1x32xf32>
    %cst_27 = arith.constant 9.99999974E-6 : f32
    %60 = vector.broadcast %cst_27 : f32 to vector<1x32xf32>
    %61 = arith.addf %59, %60 : vector<1x32xf32>
    %62 = math.rsqrt %61 : vector<1x32xf32>
    %63 = tpu.concatenate %52, %62 in 0 : vector<1x32xf32>, vector<1x32xf32> -> vector<2x32xf32>
    %c0_28 = arith.constant 0 : index
    %c0_29 = arith.constant 0 : index
    %64 = vector.load %arg6[%c0_28, %c0_29] : memref<32x32xf32, #tpu.memory_space<vmem>>, vector<32x32xf32>
    %cst_30 = arith.constant dense<0.000000e+00> : vector<2x32xf32>
    %65 = tpu.matmul %63, %64, %cst_30 {dimension_numbers = #tpu.dot_dimension_numbers<[1], [0], [0], [1], [0, 0, 1, 1], [], []>} : vector<2x32xf32>, vector<32x32xf32>, vector<2x32xf32> -> vector<2x32xf32>
    %66 = vector.extract_strided_slice %65 {offsets = [0, 0], sizes = [1, 32], strides = [1, 1]} : vector<2x32xf32> to vector<1x32xf32>
    %67 = vector.broadcast %66 : vector<1x32xf32> to vector<64x32xf32>
    %68 = arith.subf %41, %67 : vector<64x32xf32>
    %69 = vector.extract_strided_slice %65 {offsets = [1, 0], sizes = [1, 32], strides = [1, 1]} : vector<2x32xf32> to vector<1x32xf32>
    %70 = vector.broadcast %69 : vector<1x32xf32> to vector<64x32xf32>
    %71 = arith.mulf %68, %70 : vector<64x32xf32>
    %c0_31 = arith.constant 0 : index
    %c0_32 = arith.constant 0 : index
    %72 = vector.load %arg3[%c0_31, %c0_32] : memref<1x32xf32, #tpu.memory_space<vmem>>, vector<1x32xf32>
    %73 = vector.broadcast %72 : vector<1x32xf32> to vector<64x32xf32>
    %74 = arith.mulf %71, %73 : vector<64x32xf32>
    %c0_33 = arith.constant 0 : index
    %c0_34 = arith.constant 0 : index
    %75 = vector.load %arg4[%c0_33, %c0_34] : memref<1x32xf32, #tpu.memory_space<vmem>>, vector<1x32xf32>
    %76 = vector.broadcast %75 : vector<1x32xf32> to vector<64x32xf32>
    %77 = arith.addf %74, %76 : vector<64x32xf32>
    %78 = arith.negf %77 : vector<64x32xf32>
    %79 = math.exp %78 : vector<64x32xf32>
    %cst_35 = arith.constant 1.000000e+00 : f32
    %80 = vector.broadcast %cst_35 : f32 to vector<64x32xf32>
    %81 = arith.addf %80, %79 : vector<64x32xf32>
    %82 = arith.divf %80, %81 : vector<64x32xf32>
    %83 = arith.mulf %77, %82 : vector<64x32xf32>
    %c16 = arith.constant 16 : index
    %c0_36 = arith.constant 0 : index
    %84 = vector.load %arg16[%c16, %c0_36] : memref<96x32xf32, #tpu.memory_space<vmem>>, vector<64x32xf32>
    tpu.vector_store %arg16[%c16, %c0_36], %83 {strides = array<i32>} : memref<96x32xf32, #tpu.memory_space<vmem>>, vector<64x32xf32>,
    %c8 = arith.constant 8 : index
    %c0_37 = arith.constant 0 : index
    %85 = vector.load %arg16[%c8, %c0_37] : memref<96x32xf32, #tpu.memory_space<vmem>>, vector<64x32xf32>
    %c1 = arith.constant 1 : index
    %c0_38 = arith.constant 0 : index
    %c0_39 = arith.constant 0 : index
    %86 = vector.load %arg7[%c1, %c0_38, %c0_39] : memref<9x32x32xf32, #tpu.memory_space<vmem>>, vector<1x32x32xf32>
    %87 = vector.shape_cast %86 : vector<1x32x32xf32> to vector<32x32xf32>
    %cst_40 = arith.constant dense<0.000000e+00> : vector<64x32xf32>
    %88 = tpu.matmul %85, %87, %cst_40 {dimension_numbers = #tpu.dot_dimension_numbers<[1], [0], [0], [1], [0, 0, 1, 1], [], []>} : vector<64x32xf32>, vector<32x32xf32>, vector<64x32xf32> -> vector<64x32xf32>
    %c16_41 = arith.constant 16 : index
    %c0_42 = arith.constant 0 : index
    %89 = vector.load %arg16[%c16_41, %c0_42] : memref<96x32xf32, #tpu.memory_space<vmem>>, vector<64x32xf32>
    %c4 = arith.constant 4 : index
    %c0_43 = arith.constant 0 : index
    %c0_44 = arith.constant 0 : index
    %90 = vector.load %arg7[%c4, %c0_43, %c0_44] : memref<9x32x32xf32, #tpu.memory_space<vmem>>, vector<1x32x32xf32>
    %91 = vector.shape_cast %90 : vector<1x32x32xf32> to vector<32x32xf32>
    %cst_45 = arith.constant dense<0.000000e+00> : vector<64x32xf32>
    %92 = tpu.matmul %89, %91, %cst_45 {dimension_numbers = #tpu.dot_dimension_numbers<[1], [0], [0], [1], [0, 0, 1, 1], [], []>} : vector<64x32xf32>, vector<32x32xf32>, vector<64x32xf32> -> vector<64x32xf32>
    %93 = arith.addf %88, %92 : vector<64x32xf32>
    %c24 = arith.constant 24 : index
    %c0_46 = arith.constant 0 : index
    %94 = vector.load %arg16[%c24, %c0_46] : memref<96x32xf32, #tpu.memory_space<vmem>>, vector<64x32xf32>
    %c7 = arith.constant 7 : index
    %c0_47 = arith.constant 0 : index
    %c0_48 = arith.constant 0 : index
    %95 = vector.load %arg7[%c7, %c0_47, %c0_48] : memref<9x32x32xf32, #tpu.memory_space<vmem>>, vector<1x32x32xf32>
    %96 = vector.shape_cast %95 : vector<1x32x32xf32> to vector<32x32xf32>
    %cst_49 = arith.constant dense<0.000000e+00> : vector<64x32xf32>
    %97 = tpu.matmul %94, %96, %cst_49 {dimension_numbers = #tpu.dot_dimension_numbers<[1], [0], [0], [1], [0, 0, 1, 1], [], []>} : vector<64x32xf32>, vector<32x32xf32>, vector<64x32xf32> -> vector<64x32xf32>
    %98 = arith.addf %93, %97 : vector<64x32xf32>
    %c7_50 = arith.constant 7 : index
    %c0_51 = arith.constant 0 : index
    %99 = vector.load %arg16[%c7_50, %c0_51] : memref<96x32xf32, #tpu.memory_space<vmem>>, vector<64x32xf32>
    %c0_52 = arith.constant 0 : index
    %c0_53 = arith.constant 0 : index
    %c0_54 = arith.constant 0 : index
    %100 = vector.load %arg7[%c0_52, %c0_53, %c0_54] : memref<9x32x32xf32, #tpu.memory_space<vmem>>, vector<1x32x32xf32>
    %101 = vector.shape_cast %100 : vector<1x32x32xf32> to vector<32x32xf32>
    %cst_55 = arith.constant dense<0.000000e+00> : vector<64x32xf32>
    %102 = tpu.matmul %99, %101, %cst_55 {dimension_numbers = #tpu.dot_dimension_numbers<[1], [0], [0], [1], [0, 0, 1, 1], [], []>} : vector<64x32xf32>, vector<32x32xf32>, vector<64x32xf32> -> vector<64x32xf32>
    %c15 = arith.constant 15 : index
    %c0_56 = arith.constant 0 : index
    %103 = vector.load %arg16[%c15, %c0_56] : memref<96x32xf32, #tpu.memory_space<vmem>>, vector<64x32xf32>
    %c3 = arith.constant 3 : index
    %c0_57 = arith.constant 0 : index
    %c0_58 = arith.constant 0 : index
    %104 = vector.load %arg7[%c3, %c0_57, %c0_58] : memref<9x32x32xf32, #tpu.memory_space<vmem>>, vector<1x32x32xf32>
    %105 = vector.shape_cast %104 : vector<1x32x32xf32> to vector<32x32xf32>
    %cst_59 = arith.constant dense<0.000000e+00> : vector<64x32xf32>
    %106 = tpu.matmul %103, %105, %cst_59 {dimension_numbers = #tpu.dot_dimension_numbers<[1], [0], [0], [1], [0, 0, 1, 1], [], []>} : vector<64x32xf32>, vector<32x32xf32>, vector<64x32xf32> -> vector<64x32xf32>
    %107 = arith.addf %102, %106 : vector<64x32xf32>
    %c23 = arith.constant 23 : index
    %c0_60 = arith.constant 0 : index
    %108 = vector.load %arg16[%c23, %c0_60] : memref<96x32xf32, #tpu.memory_space<vmem>>, vector<64x32xf32>
    %c6 = arith.constant 6 : index
    %c0_61 = arith.constant 0 : index
    %c0_62 = arith.constant 0 : index
    %109 = vector.load %arg7[%c6, %c0_61, %c0_62] : memref<9x32x32xf32, #tpu.memory_space<vmem>>, vector<1x32x32xf32>
    %110 = vector.shape_cast %109 : vector<1x32x32xf32> to vector<32x32xf32>
    %cst_63 = arith.constant dense<0.000000e+00> : vector<64x32xf32>
    %111 = tpu.matmul %108, %110, %cst_63 {dimension_numbers = #tpu.dot_dimension_numbers<[1], [0], [0], [1], [0, 0, 1, 1], [], []>} : vector<64x32xf32>, vector<32x32xf32>, vector<64x32xf32> -> vector<64x32xf32>
    %112 = arith.addf %107, %111 : vector<64x32xf32>
    %c9 = arith.constant 9 : index
    %c0_64 = arith.constant 0 : index
    %113 = vector.load %arg16[%c9, %c0_64] : memref<96x32xf32, #tpu.memory_space<vmem>>, vector<64x32xf32>
    %c2 = arith.constant 2 : index
    %c0_65 = arith.constant 0 : index
    %c0_66 = arith.constant 0 : index
    %114 = vector.load %arg7[%c2, %c0_65, %c0_66] : memref<9x32x32xf32, #tpu.memory_space<vmem>>, vector<1x32x32xf32>
    %115 = vector.shape_cast %114 : vector<1x32x32xf32> to vector<32x32xf32>
    %cst_67 = arith.constant dense<0.000000e+00> : vector<64x32xf32>
    %116 = tpu.matmul %113, %115, %cst_67 {dimension_numbers = #tpu.dot_dimension_numbers<[1], [0], [0], [1], [0, 0, 1, 1], [], []>} : vector<64x32xf32>, vector<32x32xf32>, vector<64x32xf32> -> vector<64x32xf32>
    %c17 = arith.constant 17 : index
    %c0_68 = arith.constant 0 : index
    %117 = vector.load %arg16[%c17, %c0_68] : memref<96x32xf32, #tpu.memory_space<vmem>>, vector<64x32xf32>
    %c5 = arith.constant 5 : index
    %c0_69 = arith.constant 0 : index
    %c0_70 = arith.constant 0 : index
    %118 = vector.load %arg7[%c5, %c0_69, %c0_70] : memref<9x32x32xf32, #tpu.memory_space<vmem>>, vector<1x32x32xf32>
    %119 = vector.shape_cast %118 : vector<1x32x32xf32> to vector<32x32xf32>
    %cst_71 = arith.constant dense<0.000000e+00> : vector<64x32xf32>
    %120 = tpu.matmul %117, %119, %cst_71 {dimension_numbers = #tpu.dot_dimension_numbers<[1], [0], [0], [1], [0, 0, 1, 1], [], []>} : vector<64x32xf32>, vector<32x32xf32>, vector<64x32xf32> -> vector<64x32xf32>
    %121 = arith.addf %116, %120 : vector<64x32xf32>
    %c25 = arith.constant 25 : index
    %c0_72 = arith.constant 0 : index
    %122 = vector.load %arg16[%c25, %c0_72] : memref<96x32xf32, #tpu.memory_space<vmem>>, vector<64x32xf32>
    %c8_73 = arith.constant 8 : index
    %c0_74 = arith.constant 0 : index
    %c0_75 = arith.constant 0 : index
    %123 = vector.load %arg7[%c8_73, %c0_74, %c0_75] : memref<9x32x32xf32, #tpu.memory_space<vmem>>, vector<1x32x32xf32>
    %124 = vector.shape_cast %123 : vector<1x32x32xf32> to vector<32x32xf32>
    %cst_76 = arith.constant dense<0.000000e+00> : vector<64x32xf32>
    %125 = tpu.matmul %122, %124, %cst_76 {dimension_numbers = #tpu.dot_dimension_numbers<[1], [0], [0], [1], [0, 0, 1, 1], [], []>} : vector<64x32xf32>, vector<32x32xf32>, vector<64x32xf32> -> vector<64x32xf32>
    %126 = arith.addf %121, %125 : vector<64x32xf32>
    %127 = vector.broadcast %23 : vector<64x1xf32> to vector<64x32xf32>
    %128 = arith.mulf %112, %127 : vector<64x32xf32>
    %129 = arith.addf %98, %128 : vector<64x32xf32>
    %130 = vector.broadcast %27 : vector<64x1xf32> to vector<64x32xf32>
    %131 = arith.mulf %126, %130 : vector<64x32xf32>
    %132 = arith.addf %129, %131 : vector<64x32xf32>
    %c0_77 = arith.constant 0 : index
    %c0_78 = arith.constant 0 : index
    %133 = vector.load %arg8[%c0_77, %c0_78] : memref<1x32xf32, #tpu.memory_space<vmem>>, vector<1x32xf32>
    %134 = vector.broadcast %133 : vector<1x32xf32> to vector<64x32xf32>
    %135 = arith.addf %132, %134 : vector<64x32xf32>
    %136 = vector.broadcast %39 : vector<1x32xf32> to vector<64x32xf32>
    %137 = arith.addf %135, %136 : vector<64x32xf32>
    %cst_79 = arith.constant dense<0.000000e+00> : vector<32xf32>
    %138 = vector.multi_reduction <add>, %137, %cst_79 [0] : vector<64x32xf32> to vector<32xf32>
    %139 = vector.shape_cast %138 : vector<32xf32> to vector<1x32xf32>
    %140 = arith.mulf %137, %137 : vector<64x32xf32>
    %cst_80 = arith.constant dense<0.000000e+00> : vector<32xf32>
    %141 = vector.multi_reduction <add>, %140, %cst_80 [0] : vector<64x32xf32> to vector<32xf32>
    %142 = vector.shape_cast %141 : vector<32xf32> to vector<1x32xf32>
    %143 = tpu.concatenate %139, %142 in 0 : vector<1x32xf32>, vector<1x32xf32> -> vector<2x32xf32>
    %c0_81 = arith.constant 0 : index
    %c0_82 = arith.constant 0 : index
    %144 = vector.load %arg5[%c0_81, %c0_82] : memref<32x32xf32, #tpu.memory_space<vmem>>, vector<32x32xf32>
    %cst_83 = arith.constant dense<0.000000e+00> : vector<2x32xf32>
    %145 = tpu.matmul %143, %144, %cst_83 {dimension_numbers = #tpu.dot_dimension_numbers<[1], [0], [0], [1], [0, 0, 1, 1], [], []>} : vector<2x32xf32>, vector<32x32xf32>, vector<2x32xf32> -> vector<2x32xf32>
    %146 = vector.extract_strided_slice %145 {offsets = [0, 0], sizes = [1, 32], strides = [1, 1]} : vector<2x32xf32> to vector<1x32xf32>
    %cst_84 = arith.constant 6.400000e+01 : f32
    %147 = vector.broadcast %cst_84 : f32 to vector<1x32xf32>
    %148 = arith.divf %146, %147 : vector<1x32xf32>
    %149 = vector.extract_strided_slice %145 {offsets = [1, 0], sizes = [1, 32], strides = [1, 1]} : vector<2x32xf32> to vector<1x32xf32>
    %cst_85 = arith.constant 6.400000e+01 : f32
    %150 = vector.broadcast %cst_85 : f32 to vector<1x32xf32>
    %151 = arith.divf %149, %150 : vector<1x32xf32>
    %152 = arith.mulf %148, %148 : vector<1x32xf32>
    %153 = arith.subf %151, %152 : vector<1x32xf32>
    %cst_86 = arith.constant 0.000000e+00 : f32
    %154 = vector.broadcast %cst_86 : f32 to vector<1x32xf32>
    %155 = arith.maximumf %153, %154 : vector<1x32xf32>
    %cst_87 = arith.constant 9.99999974E-6 : f32
    %156 = vector.broadcast %cst_87 : f32 to vector<1x32xf32>
    %157 = arith.addf %155, %156 : vector<1x32xf32>
    %158 = math.rsqrt %157 : vector<1x32xf32>
    %159 = tpu.concatenate %148, %158 in 0 : vector<1x32xf32>, vector<1x32xf32> -> vector<2x32xf32>
    %c0_88 = arith.constant 0 : index
    %c0_89 = arith.constant 0 : index
    %160 = vector.load %arg6[%c0_88, %c0_89] : memref<32x32xf32, #tpu.memory_space<vmem>>, vector<32x32xf32>
    %cst_90 = arith.constant dense<0.000000e+00> : vector<2x32xf32>
    %161 = tpu.matmul %159, %160, %cst_90 {dimension_numbers = #tpu.dot_dimension_numbers<[1], [0], [0], [1], [0, 0, 1, 1], [], []>} : vector<2x32xf32>, vector<32x32xf32>, vector<2x32xf32> -> vector<2x32xf32>
    %162 = vector.extract_strided_slice %161 {offsets = [0, 0], sizes = [1, 32], strides = [1, 1]} : vector<2x32xf32> to vector<1x32xf32>
    %163 = vector.broadcast %162 : vector<1x32xf32> to vector<64x32xf32>
    %164 = arith.subf %137, %163 : vector<64x32xf32>
    %165 = vector.extract_strided_slice %161 {offsets = [1, 0], sizes = [1, 32], strides = [1, 1]} : vector<2x32xf32> to vector<1x32xf32>
    %166 = vector.broadcast %165 : vector<1x32xf32> to vector<64x32xf32>
    %167 = arith.mulf %164, %166 : vector<64x32xf32>
    %c0_91 = arith.constant 0 : index
    %c0_92 = arith.constant 0 : index
    %168 = vector.load %arg11[%c0_91, %c0_92] : memref<1x32xf32, #tpu.memory_space<vmem>>, vector<1x32xf32>
    %169 = vector.broadcast %168 : vector<1x32xf32> to vector<64x32xf32>
    %170 = arith.mulf %167, %169 : vector<64x32xf32>
    %c0_93 = arith.constant 0 : index
    %c0_94 = arith.constant 0 : index
    %171 = vector.load %arg12[%c0_93, %c0_94] : memref<1x32xf32, #tpu.memory_space<vmem>>, vector<1x32xf32>
    %172 = vector.broadcast %171 : vector<1x32xf32> to vector<64x32xf32>
    %173 = arith.addf %170, %172 : vector<64x32xf32>
    %174 = arith.negf %173 : vector<64x32xf32>
    %175 = math.exp %174 : vector<64x32xf32>
    %cst_95 = arith.constant 1.000000e+00 : f32
    %176 = vector.broadcast %cst_95 : f32 to vector<64x32xf32>
    %177 = arith.addf %176, %175 : vector<64x32xf32>
    %178 = arith.divf %176, %177 : vector<64x32xf32>
    %179 = arith.mulf %173, %178 : vector<64x32xf32>
    %c16_96 = arith.constant 16 : index
    %c0_97 = arith.constant 0 : index
    %180 = vector.load %arg16[%c16_96, %c0_97] : memref<96x32xf32, #tpu.memory_space<vmem>>, vector<64x32xf32>
    tpu.vector_store %arg16[%c16_96, %c0_97], %179 {strides = array<i32>} : memref<96x32xf32, #tpu.memory_space<vmem>>, vector<64x32xf32>,
    %c8_98 = arith.constant 8 : index
    %c0_99 = arith.constant 0 : index
    %181 = vector.load %arg16[%c8_98, %c0_99] : memref<96x32xf32, #tpu.memory_space<vmem>>, vector<64x32xf32>
    %c1_100 = arith.constant 1 : index
    %c0_101 = arith.constant 0 : index
    %c0_102 = arith.constant 0 : index
    %182 = vector.load %arg13[%c1_100, %c0_101, %c0_102] : memref<9x32x32xf32, #tpu.memory_space<vmem>>, vector<1x32x32xf32>
    %183 = vector.shape_cast %182 : vector<1x32x32xf32> to vector<32x32xf32>
    %cst_103 = arith.constant dense<0.000000e+00> : vector<64x32xf32>
    %184 = tpu.matmul %181, %183, %cst_103 {dimension_numbers = #tpu.dot_dimension_numbers<[1], [0], [0], [1], [0, 0, 1, 1], [], []>} : vector<64x32xf32>, vector<32x32xf32>, vector<64x32xf32> -> vector<64x32xf32>
    %c16_104 = arith.constant 16 : index
    %c0_105 = arith.constant 0 : index
    %185 = vector.load %arg16[%c16_104, %c0_105] : memref<96x32xf32, #tpu.memory_space<vmem>>, vector<64x32xf32>
    %c4_106 = arith.constant 4 : index
    %c0_107 = arith.constant 0 : index
    %c0_108 = arith.constant 0 : index
    %186 = vector.load %arg13[%c4_106, %c0_107, %c0_108] : memref<9x32x32xf32, #tpu.memory_space<vmem>>, vector<1x32x32xf32>
    %187 = vector.shape_cast %186 : vector<1x32x32xf32> to vector<32x32xf32>
    %cst_109 = arith.constant dense<0.000000e+00> : vector<64x32xf32>
    %188 = tpu.matmul %185, %187, %cst_109 {dimension_numbers = #tpu.dot_dimension_numbers<[1], [0], [0], [1], [0, 0, 1, 1], [], []>} : vector<64x32xf32>, vector<32x32xf32>, vector<64x32xf32> -> vector<64x32xf32>
    %189 = arith.addf %184, %188 : vector<64x32xf32>
    %c24_110 = arith.constant 24 : index
    %c0_111 = arith.constant 0 : index
    %190 = vector.load %arg16[%c24_110, %c0_111] : memref<96x32xf32, #tpu.memory_space<vmem>>, vector<64x32xf32>
    %c7_112 = arith.constant 7 : index
    %c0_113 = arith.constant 0 : index
    %c0_114 = arith.constant 0 : index
    %191 = vector.load %arg13[%c7_112, %c0_113, %c0_114] : memref<9x32x32xf32, #tpu.memory_space<vmem>>, vector<1x32x32xf32>
    %192 = vector.shape_cast %191 : vector<1x32x32xf32> to vector<32x32xf32>
    %cst_115 = arith.constant dense<0.000000e+00> : vector<64x32xf32>
    %193 = tpu.matmul %190, %192, %cst_115 {dimension_numbers = #tpu.dot_dimension_numbers<[1], [0], [0], [1], [0, 0, 1, 1], [], []>} : vector<64x32xf32>, vector<32x32xf32>, vector<64x32xf32> -> vector<64x32xf32>
    %194 = arith.addf %189, %193 : vector<64x32xf32>
    %c7_116 = arith.constant 7 : index
    %c0_117 = arith.constant 0 : index
    %195 = vector.load %arg16[%c7_116, %c0_117] : memref<96x32xf32, #tpu.memory_space<vmem>>, vector<64x32xf32>
    %c0_118 = arith.constant 0 : index
    %c0_119 = arith.constant 0 : index
    %c0_120 = arith.constant 0 : index
    %196 = vector.load %arg13[%c0_118, %c0_119, %c0_120] : memref<9x32x32xf32, #tpu.memory_space<vmem>>, vector<1x32x32xf32>
    %197 = vector.shape_cast %196 : vector<1x32x32xf32> to vector<32x32xf32>
    %cst_121 = arith.constant dense<0.000000e+00> : vector<64x32xf32>
    %198 = tpu.matmul %195, %197, %cst_121 {dimension_numbers = #tpu.dot_dimension_numbers<[1], [0], [0], [1], [0, 0, 1, 1], [], []>} : vector<64x32xf32>, vector<32x32xf32>, vector<64x32xf32> -> vector<64x32xf32>
    %c15_122 = arith.constant 15 : index
    %c0_123 = arith.constant 0 : index
    %199 = vector.load %arg16[%c15_122, %c0_123] : memref<96x32xf32, #tpu.memory_space<vmem>>, vector<64x32xf32>
    %c3_124 = arith.constant 3 : index
    %c0_125 = arith.constant 0 : index
    %c0_126 = arith.constant 0 : index
    %200 = vector.load %arg13[%c3_124, %c0_125, %c0_126] : memref<9x32x32xf32, #tpu.memory_space<vmem>>, vector<1x32x32xf32>
    %201 = vector.shape_cast %200 : vector<1x32x32xf32> to vector<32x32xf32>
    %cst_127 = arith.constant dense<0.000000e+00> : vector<64x32xf32>
    %202 = tpu.matmul %199, %201, %cst_127 {dimension_numbers = #tpu.dot_dimension_numbers<[1], [0], [0], [1], [0, 0, 1, 1], [], []>} : vector<64x32xf32>, vector<32x32xf32>, vector<64x32xf32> -> vector<64x32xf32>
    %203 = arith.addf %198, %202 : vector<64x32xf32>
    %c23_128 = arith.constant 23 : index
    %c0_129 = arith.constant 0 : index
    %204 = vector.load %arg16[%c23_128, %c0_129] : memref<96x32xf32, #tpu.memory_space<vmem>>, vector<64x32xf32>
    %c6_130 = arith.constant 6 : index
    %c0_131 = arith.constant 0 : index
    %c0_132 = arith.constant 0 : index
    %205 = vector.load %arg13[%c6_130, %c0_131, %c0_132] : memref<9x32x32xf32, #tpu.memory_space<vmem>>, vector<1x32x32xf32>
    %206 = vector.shape_cast %205 : vector<1x32x32xf32> to vector<32x32xf32>
    %cst_133 = arith.constant dense<0.000000e+00> : vector<64x32xf32>
    %207 = tpu.matmul %204, %206, %cst_133 {dimension_numbers = #tpu.dot_dimension_numbers<[1], [0], [0], [1], [0, 0, 1, 1], [], []>} : vector<64x32xf32>, vector<32x32xf32>, vector<64x32xf32> -> vector<64x32xf32>
    %208 = arith.addf %203, %207 : vector<64x32xf32>
    %c9_134 = arith.constant 9 : index
    %c0_135 = arith.constant 0 : index
    %209 = vector.load %arg16[%c9_134, %c0_135] : memref<96x32xf32, #tpu.memory_space<vmem>>, vector<64x32xf32>
    %c2_136 = arith.constant 2 : index
    %c0_137 = arith.constant 0 : index
    %c0_138 = arith.constant 0 : index
    %210 = vector.load %arg13[%c2_136, %c0_137, %c0_138] : memref<9x32x32xf32, #tpu.memory_space<vmem>>, vector<1x32x32xf32>
    %211 = vector.shape_cast %210 : vector<1x32x32xf32> to vector<32x32xf32>
    %cst_139 = arith.constant dense<0.000000e+00> : vector<64x32xf32>
    %212 = tpu.matmul %209, %211, %cst_139 {dimension_numbers = #tpu.dot_dimension_numbers<[1], [0], [0], [1], [0, 0, 1, 1], [], []>} : vector<64x32xf32>, vector<32x32xf32>, vector<64x32xf32> -> vector<64x32xf32>
    %c17_140 = arith.constant 17 : index
    %c0_141 = arith.constant 0 : index
    %213 = vector.load %arg16[%c17_140, %c0_141] : memref<96x32xf32, #tpu.memory_space<vmem>>, vector<64x32xf32>
    %c5_142 = arith.constant 5 : index
    %c0_143 = arith.constant 0 : index
    %c0_144 = arith.constant 0 : index
    %214 = vector.load %arg13[%c5_142, %c0_143, %c0_144] : memref<9x32x32xf32, #tpu.memory_space<vmem>>, vector<1x32x32xf32>
    %215 = vector.shape_cast %214 : vector<1x32x32xf32> to vector<32x32xf32>
    %cst_145 = arith.constant dense<0.000000e+00> : vector<64x32xf32>
    %216 = tpu.matmul %213, %215, %cst_145 {dimension_numbers = #tpu.dot_dimension_numbers<[1], [0], [0], [1], [0, 0, 1, 1], [], []>} : vector<64x32xf32>, vector<32x32xf32>, vector<64x32xf32> -> vector<64x32xf32>
    %217 = arith.addf %212, %216 : vector<64x32xf32>
    %c25_146 = arith.constant 25 : index
    %c0_147 = arith.constant 0 : index
    %218 = vector.load %arg16[%c25_146, %c0_147] : memref<96x32xf32, #tpu.memory_space<vmem>>, vector<64x32xf32>
    %c8_148 = arith.constant 8 : index
    %c0_149 = arith.constant 0 : index
    %c0_150 = arith.constant 0 : index
    %219 = vector.load %arg13[%c8_148, %c0_149, %c0_150] : memref<9x32x32xf32, #tpu.memory_space<vmem>>, vector<1x32x32xf32>
    %220 = vector.shape_cast %219 : vector<1x32x32xf32> to vector<32x32xf32>
    %cst_151 = arith.constant dense<0.000000e+00> : vector<64x32xf32>
    %221 = tpu.matmul %218, %220, %cst_151 {dimension_numbers = #tpu.dot_dimension_numbers<[1], [0], [0], [1], [0, 0, 1, 1], [], []>} : vector<64x32xf32>, vector<32x32xf32>, vector<64x32xf32> -> vector<64x32xf32>
    %222 = arith.addf %217, %221 : vector<64x32xf32>
    %223 = vector.broadcast %23 : vector<64x1xf32> to vector<64x32xf32>
    %224 = arith.mulf %208, %223 : vector<64x32xf32>
    %225 = arith.addf %194, %224 : vector<64x32xf32>
    %226 = vector.broadcast %27 : vector<64x1xf32> to vector<64x32xf32>
    %227 = arith.mulf %222, %226 : vector<64x32xf32>
    %228 = arith.addf %225, %227 : vector<64x32xf32>
    %c0_152 = arith.constant 0 : index
    %c0_153 = arith.constant 0 : index
    %229 = vector.load %arg14[%c0_152, %c0_153] : memref<1x32xf32, #tpu.memory_space<vmem>>, vector<1x32xf32>
    %230 = vector.broadcast %229 : vector<1x32xf32> to vector<64x32xf32>
    %231 = arith.addf %228, %230 : vector<64x32xf32>
    %c0_154 = arith.constant 0 : index
    %c0_155 = arith.constant 0 : index
    %c0_156 = arith.constant 0 : index
    %c0_157 = arith.constant 0 : index
    %232 = vector.load %arg1[%c0_154, %c0_155, %c0_156, %c0_157] : memref<1x1x64x32xf32, #tpu.memory_space<vmem>>, vector<1x1x64x32xf32>
    %233 = vector.shape_cast %232 : vector<1x1x64x32xf32> to vector<64x32xf32>
    %234 = arith.addf %233, %231 : vector<64x32xf32>
    %c0_158 = arith.constant 0 : index
    %c0_159 = arith.constant 0 : index
    %c0_160 = arith.constant 0 : index
    %c0_161 = arith.constant 0 : index
    %235 = vector.load %arg15[%c0_158, %c0_159, %c0_160, %c0_161] : memref<1x1x64x32xf32, #tpu.memory_space<vmem>>, vector<1x1x64x32xf32>
    %236 = vector.shape_cast %235 : vector<1x1x64x32xf32> to vector<64x32xf32>
    %237 = vector.shape_cast %234 : vector<64x32xf32> to vector<1x1x64x32xf32>
    tpu.vector_store %arg15[%c0_158, %c0_159, %c0_160, %c0_161], %237 {strides = array<i32>} : memref<1x1x64x32xf32, #tpu.memory_space<vmem>>, vector<1x1x64x32xf32>,
    return
  }
  func.func @transform_0(%arg0: i32) -> (i32, i32, i32, i32) {
    %c0_i32 = arith.constant 0 : i32
    %c0_i32_0 = arith.constant 0 : i32
    %c0_i32_1 = arith.constant 0 : i32
    %c0_i32_2 = arith.constant 0 : i32
    return %arg0, %c0_i32, %c0_i32_0, %c0_i32_1 : i32, i32, i32, i32
  }
  func.func @transform_1(%arg0: i32) -> (i32, i32, i32) {
    %c0_i32 = arith.constant 0 : i32
    %c0_i32_0 = arith.constant 0 : i32
    %c0_i32_1 = arith.constant 0 : i32
    return %arg0, %c0_i32, %c0_i32_0 : i32, i32, i32
  }
  func.func @transform_2(%arg0: i32) -> (i32, i32) {
    %c0_i32 = arith.constant 0 : i32
    %c0_i32_0 = arith.constant 0 : i32
    %c0_i32_1 = arith.constant 0 : i32
    return %c0_i32, %c0_i32_0 : i32, i32
  }
  func.func @transform_3(%arg0: i32) -> (i32, i32) {
    %c0_i32 = arith.constant 0 : i32
    %c0_i32_0 = arith.constant 0 : i32
    %c0_i32_1 = arith.constant 0 : i32
    return %c0_i32, %c0_i32_0 : i32, i32
  }
  func.func @transform_4(%arg0: i32) -> (i32, i32) {
    %c0_i32 = arith.constant 0 : i32
    %c0_i32_0 = arith.constant 0 : i32
    %c0_i32_1 = arith.constant 0 : i32
    return %c0_i32, %c0_i32_0 : i32, i32
  }
  func.func @transform_5(%arg0: i32) -> (i32, i32) {
    %c0_i32 = arith.constant 0 : i32
    %c0_i32_0 = arith.constant 0 : i32
    %c0_i32_1 = arith.constant 0 : i32
    return %c0_i32, %c0_i32_0 : i32, i32
  }
  func.func @transform_6(%arg0: i32) -> (i32, i32, i32) {
    %c0_i32 = arith.constant 0 : i32
    %c0_i32_0 = arith.constant 0 : i32
    %c0_i32_1 = arith.constant 0 : i32
    %c0_i32_2 = arith.constant 0 : i32
    return %c0_i32, %c0_i32_0, %c0_i32_1 : i32, i32, i32
  }
  func.func @transform_7(%arg0: i32) -> (i32, i32) {
    %c0_i32 = arith.constant 0 : i32
    %c0_i32_0 = arith.constant 0 : i32
    %c0_i32_1 = arith.constant 0 : i32
    return %c0_i32, %c0_i32_0 : i32, i32
  }
  func.func @transform_8(%arg0: i32) -> (i32, i32) {
    %c0_i32 = arith.constant 0 : i32
    %c0_i32_0 = arith.constant 0 : i32
    %c0_i32_1 = arith.constant 0 : i32
    return %c0_i32, %c0_i32_0 : i32, i32
  }
  func.func @transform_9(%arg0: i32) -> (i32, i32) {
    %c0_i32 = arith.constant 0 : i32
    %c0_i32_0 = arith.constant 0 : i32
    %c0_i32_1 = arith.constant 0 : i32
    return %c0_i32, %c0_i32_0 : i32, i32
  }
  func.func @transform_10(%arg0: i32) -> (i32, i32) {
    %c0_i32 = arith.constant 0 : i32
    %c0_i32_0 = arith.constant 0 : i32
    %c0_i32_1 = arith.constant 0 : i32
    return %c0_i32, %c0_i32_0 : i32, i32
  }
  func.func @transform_11(%arg0: i32) -> (i32, i32) {
    %c0_i32 = arith.constant 0 : i32
    %c0_i32_0 = arith.constant 0 : i32
    %c0_i32_1 = arith.constant 0 : i32
    return %c0_i32, %c0_i32_0 : i32, i32
  }
  func.func @transform_12(%arg0: i32) -> (i32, i32, i32) {
    %c0_i32 = arith.constant 0 : i32
    %c0_i32_0 = arith.constant 0 : i32
    %c0_i32_1 = arith.constant 0 : i32
    %c0_i32_2 = arith.constant 0 : i32
    return %c0_i32, %c0_i32_0, %c0_i32_1 : i32, i32, i32
  }
  func.func @transform_13(%arg0: i32) -> (i32, i32) {
    %c0_i32 = arith.constant 0 : i32
    %c0_i32_0 = arith.constant 0 : i32
    %c0_i32_1 = arith.constant 0 : i32
    return %c0_i32, %c0_i32_0 : i32, i32
  }
  func.func @transform_14(%arg0: i32) -> (i32, i32, i32, i32) {
    %c0_i32 = arith.constant 0 : i32
    %c0_i32_0 = arith.constant 0 : i32
    %c0_i32_1 = arith.constant 0 : i32
    %c0_i32_2 = arith.constant 0 : i32
    return %arg0, %c0_i32, %c0_i32_0, %c0_i32_1 : i32, i32, i32, i32
  }
}

</mosaic_0001>

<bundles_post_ra>
// kernel: tpu_custom_call.1
= control target key start
LH: loop header
LB: loop body
LE: loop exit
PB: predicated region body
PF: predicated region fallthrough
CT: control target
= control target key end

     0   :  { %19 = vsyncpa [#allocation4], 0  ;;  %s6071_s0 = inlined_call_operand.vmem [shape: f32[2,1,64,32], index: 0, kind: input, shape index: {}]   ;;  %s6072_s1 = inlined_call_operand.vmem [shape: f32[2,1,32], index: 1, kind: input, shape index: {}]   ;;  %s6073_s2 = inlined_call_operand.vmem [shape: f32[1,32], index: 2, kind: input, shape index: {}]   ;;  %s6074_s3 = inlined_call_operand.vmem [shape: f32[1,32], index: 3, kind: input, shape index: {}]   ;;  %s6075_s4 = inlined_call_operand.vmem [shape: f32[32,32], index: 4, kind: input, shape index: {}]   ;;  %s6076_s5 = inlined_call_operand.vmem [shape: f32[32,32], index: 5, kind: input, shape index: {}]   ;;  %s6077_s6 = inlined_call_operand.hbm [shape: f32[9,32,32], index: 6, kind: input, shape index: {}]   ;;  %s6078_s7 = inlined_call_operand.vmem [shape: f32[1,32], index: 7, kind: input, shape index: {}]   ;;  %s6079_s8 = inlined_call_operand.vmem [shape: f32[32,32], index: 8, kind: input, shape index: {}]   ;;  %s6080_s9 = inlined_call_operand.vmem [shape: f32[1,32], index: 9, kind: input, shape index: {}]   ;;  %s6081_s10 = inlined_call_operand.vmem [shape: f32[1,32], index: 10, kind: input, shape index: {}]   ;;  %s6082_s11 = inlined_call_operand.vmem [shape: f32[1,32], index: 11, kind: input, shape index: {}]   ;;  %s6083_s12 = inlined_call_operand.hbm [shape: f32[9,32,32], index: 12, kind: input, shape index: {}]   ;;  %s6084_s13 = inlined_call_operand.vmem [shape: f32[1,32], index: 13, kind: input, shape index: {}]   ;;  %s6085_s14 = inlined_call_operand.vmem [shape: f32[2,1,64,32], index: 14, kind: output, shape index: {}]  }
   0x1   :  { %20 = vsyncpa [#allocation6], 0  ;;  %s5205_s29 = smov 0  }
   0x2 LB: > { %s5211_s30 = sadd.s32 4294967295, %s5122_s29   ;;  %p4084_p0 = scmp.ge.s32.totalorder %s5122_s29, 1  ;;  %s5122_s29 = sphi %s5205_s29, %s26_s29  }
   0x3   : > { %p361_p1 = scmp.lt.s32.totalorder %s5122_s29, 3  ;;  %s5124_s15 = smov [#allocation3]  }
   0x4   : > { %s385_s16 = sshll.u32 %s5124_s15, 4  ;;  %p4966_p3 = scmp.eq.s32.totalorder %s5211_s30, 0  ;;  %s386_s16 = int_to_ptr.vmem [resolvable:$true] %s385_s16 }
   0x5   : > { %p5215_p2 = pnand %p4084_p0, %p361_p1  ;;  %s5125_s18 = smov [#allocation5]  }
   0x6   : > { %s413_s19 = sshll.u32 %s5125_s18, 4  ;;  %s5067_s21 = scalar_lea.vmem %s386_s16, 4608  ;;  %s414_s19 = int_to_ptr.vmem [resolvable:$true] %s413_s19 }
   0x7   : > { %p4959_p4 = pneg %p5215_p2  ;;  %p5068_p7 = scmp.ne.s32.totalorder %s386_s16, %s5067_s21 }
   0x8   : > { %p5075_p10 = scmp.lt.s32.totalorder %s386_s16, %s386_s16  ;;  %p5076_p11 = scmp.lt.s32.totalorder %s5067_s21, %s5067_s21 }
   0x9   : > { %p5224_p5 = pnand %p4966_p3, %p4959_p4 }
   0xa   : > { %p5077_p12 = por %p5076_p11, %p5075_p10 }
   0xb   : > { %p5058_p6 = pneg %p5224_p5 }
   0xd   : > { %p5070_p8 = pnand %p5068_p7, %p5058_p6 }
   0xf   : > { %p5071_p9 = pneg %p5070_p8 }
  0x11   : > { %p5078_p13 = pnand %p5077_p12, %p5071_p9 }
  0x13   : > { %5081 = shalt.err (!%p5078_p13)
}
  0x14   : > { %s5126_s22 = smov 128   ;;  %s5127_s23 = smov 8  }
  0x15   : > { %4962 = dma.hbm_to_vmem [thread:$0]  (!%p5224_p5), %s6077_s6, 4608, %s386_s16, [#allocation4], %s5126_s22, %s5126_s22, %s5127_s23  }
  0x16   : > { %s5093_s26 = scalar_lea.vmem %s414_s19, 4608  ;;  %p5101_p7 = scmp.lt.s32.totalorder %s414_s19, %s414_s19 }
  0x17   : > { %p5094_p0 = scmp.ne.s32.totalorder %s414_s19, %s5093_s26  ;;  %p5102_p8 = scmp.lt.s32.totalorder %s5093_s26, %s5093_s26 }
  0x19   : > { %p5096_p1 = pnand %p5094_p0, %p5058_p6  ;;  %p5103_p10 = por %p5102_p8, %p5101_p7 }
  0x1b   : > { %p5097_p4 = pneg %p5096_p1 }
  0x1d   : > { %p5104_p9 = pnand %p5103_p10, %p5097_p4 }
  0x1f   : > { %5107 = shalt.err (!%p5104_p9)
}
  0x20   : > { %4965 = dma.hbm_to_vmem [thread:$0]  (!%p5224_p5), %s6083_s12, 4608, %s414_s19, [#allocation6], %s5126_s22, %s5126_s22, %s5127_s23  }
  0x21   : > { %446 = sbr.rel (%p5215_p2) target bundleno = 1591 (0x637), region = 76 }
  0x26   : > { %5113 = dma.done.wait (%p4966_p3), [#allocation4], 4608  }
  0x27   : > { %5115 = vsyncadd (%p4966_p3), [#allocation4], 4294962688 }
  0x28   : > { %5117 = dma.done.wait (%p4966_p3), [#allocation6], 4608  }
  0x29   : > { %5119 = vsyncadd (%p4966_p3), [#allocation6], 4294962688  ;;  %p499_p6 = scmp.lt.s32.totalorder %s5211_s30, 1  ;;  %vm512_vm0 = vcmask 261120   ;;  %v6087_v0 = vmov 0.0   ;;  %vm5129_vm1 = vmmov 0  }
  0x2a   : > { %4539 = vmatprep.subr.mxu1 %v6087_v0  ;;  %4547 = vmatprep.mubr.msk.f32.mxu1 %vm5129_vm1, %v6087_v0  ;;  %513 = vst.msk [vmem:[#allocation2] sm:$0xff] %vm512_vm0, %v6087_v0  ;;  %514 = vst.msk [vmem:[#allocation2 + $0x8] sm:$0xff] %vm512_vm0, %v6087_v0  ;;  %v819_v1 = vld [vmem:[%s6075_s4 + $0x18] sm:$0xff]  ;;  %v818_v2 = vld [vmem:[%s6075_s4 + $0x10] sm:$0xff]  ;;  %vm814_vm2 = vcmask 1040384  }
  0x2b   : > { %515 = vst.msk [vmem:[#allocation2 + $0x50] sm:$0xff] %vm512_vm0, %v6087_v0  ;;  %516 = vst.msk [vmem:[#allocation2 + $0x58] sm:$0xff] %vm512_vm0, %v6087_v0  ;;  %s6185_s30 = smov (!%p499_p6, %s5211_s30), 1  ;;  %4528 = vmatprep.subr.mxu0 %v6087_v0  ;;  %4536 = vmatprep.mubr.msk.f32.mxu0 %vm5129_vm1, %v6087_v0  ;;  %v817_v5 = vld [vmem:[%s6075_s4 + $0x8] sm:$0xff]  ;;  %v816_v15 = vld [vmem:[%s6075_s4] sm:$0xff] }
  0x2c   : > { %s4285_s15 = sshll.u32 %s6185_s30, 6  ;;  %4540 = vmatpush3.msra.mxu1 %v819_v1  ;;  %s506_s16 = scalar_lea.vmem %s6072_s1, %s6185_s30 }
  0x2d   : > { %s5280_s18 = scalar_lea.vmem %s6071_s0, %s4285_s15  ;;  %4541 = vmatprep.subr.mxu1 %v6087_v0  ;;  %v670_v1 = vld [vmem:[%s506_s16] sm:$0x1]  ;;  %s6037_s17 = scalar_lea.vmem %s6085_s14, %s4285_s15 }
  0x2e   : > { %v5289_v3 = vld [vmem:[%s5280_s18] sm:$0xff]  ;;  %v5292_v4 = vld [vmem:[%s5280_s18 + $0x8] sm:$0xff]  ;;  %v5299_v6 = vld [vmem:[%s5280_s18 + $0x10] sm:$0xff]  ;;  %4542 = vmatpush3.msra.mxu1 %v818_v2  ;;  %v4111_v2 = vmul.f32 -1.442695, %v670_v1 }
  0x2f   : > { %v5302_v7 = vld [vmem:[%s5280_s18 + $0x18] sm:$0xff]  ;;  %v764_v8 = vsel %vm512_vm0, %v5289_v3, 0.0  ;;  %v765_v9 = vsel %vm512_vm0, %v5292_v4, 0.0  ;;  %v785_v10 = vmul.f32 %v5289_v3, %v5289_v3  ;;  %v786_v11 = vmul.f32 %v5292_v4, %v5292_v4  ;;  %v5313_v12 = vld [vmem:[%s5280_s18 + $0x20] sm:$0xff]  ;;  %4543 = vmatprep.subr.mxu1 %v6087_v0  ;;  %v5326_v18 = vld [vmem:[%s5280_s18 + $0x28] sm:$0xff] }
  0x30   : > { %v766_v13 = vadd.f32 %v765_v9, %v764_v8  ;;  %v767_v14 = vsel %vm512_vm0, %v5299_v6, 0.0  ;;  %v769_v16 = vsel %vm512_vm0, %v5302_v7, 0.0  ;;  %v787_v17 = vmul.f32 %v5299_v6, %v5299_v6  ;;  %4544 = vmatpush3.msra.mxu1 %v817_v5  ;;  %v5338_v25 = vld [vmem:[%s5280_s18 + $0x30] sm:$0xff]  ;;  %v5347_v32 = vld [vmem:[%s5280_s18 + $0x38] sm:$0xff] }
  0x31   : > { %v788_v20 = vmul.f32 %v5302_v7, %v5302_v7  ;;  %4545 = vmatprep.subr.mxu1 %v6087_v0  ;;  %v771_v21 = vsel %vm512_vm0, %v5313_v12, 0.0  ;;  %v789_v22 = vmul.f32 %v5313_v12, %v5313_v12  ;;  %v793_v23 = vsel %vm512_vm0, %v785_v10, 0.0  ;;  %v681_v9 = vld [vmem:[%s6079_s8 + $0x18] sm:$0xff]  ;;  %v680_v10 = vld [vmem:[%s6079_s8 + $0x10] sm:$0xff] }
  0x32   : > { %v768_v19 = vadd.f32 %v767_v14, %v766_v13  ;;  %v794_v24 = vsel %vm512_vm0, %v786_v11, 0.0  ;;  %4546 = vmatpush3.msra.mxu1 %v816_v15  ;;  %v796_v28 = vsel %vm512_vm0, %v787_v17, 0.0  ;;  %v773_v29 = vsel %vm512_vm0, %v5326_v18, 0.0  ;;  %4529 = vmatpush3.msra.mxu0 %v681_v9  ;;  %v679_v11 = vld [vmem:[%s6079_s8 + $0x8] sm:$0xff]  ;;  %v678_v14 = vld [vmem:[%s6079_s8] sm:$0xff]  ;;  %v906_v17 = vld [vmem:[%s6076_s5 + $0x10] sm:$0xff] }
  0x33   : > { %v795_v27 = vadd.f32 %v794_v24, %v793_v23  ;;  %v790_v30 = vmul.f32 %v5326_v18, %v5326_v18  ;;  %v798_v31 = vsel %vm512_vm0, %v788_v20, 0.0  ;;  %v775_v35 = vsel %vm512_vm0, %v5338_v25, 0.0  ;;  %4530 = vmatprep.subr.mxu0 %v6087_v0  ;;  %v904_v20 = vld [vmem:[%s6076_s5] sm:$0xff] }
  0x34   : > { %v770_v26 = vadd.f32 %v769_v16, %v768_v19  ;;  %v791_v36 = vmul.f32 %v5338_v25, %v5338_v25  ;;  %v800_v37 = vsel %vm512_vm0, %v789_v22, 0.0  ;;  %v777_v40 = vsel %vm512_vm0, %v5347_v32, 0.0  ;;  %4531 = vmatpush3.msra.mxu0 %v680_v10  ;;  %v907_v16 = vld [vmem:[%s6076_s5 + $0x18] sm:$0xff]  ;;  %v905_v19 = vld [vmem:[%s6076_s5 + $0x8] sm:$0xff] }
  0x35   : > { %v797_v34 = vadd.f32 %v796_v28, %v795_v27  ;;  %v792_v41 = vmul.f32 %v5347_v32, %v5347_v32  ;;  %v802_v42 = vsel %vm512_vm0, %v790_v30, 0.0  ;;  %4984 = vpow2.f32 %v4111_v2  ;;  %4532 = vmatprep.subr.mxu0 %v6087_v0 }
  0x36   : > { %v772_v33 = vadd.f32 %v771_v21, %v770_v26  ;;  %v804_v45 = vsel %vm512_vm0, %v791_v36, 0.0  ;;  %4533 = vmatpush3.msra.mxu0 %v679_v11  ;;  %v1117_v36 = vld [vmem:[#allocation3 + $0x98] sm:$0xff] }
  0x37   : > { %v799_v39 = vadd.f32 %v798_v31, %v797_v34  ;;  %v806_v48 = vsel %vm512_vm0, %v792_v41, 0.0  ;;  %4534 = vmatprep.subr.mxu0 %v6087_v0  ;;  %4561 = vmatprep.subr.mxu1 %v1117_v36  ;;  %v1108_v41 = vld [vmem:[#allocation3 + $0x20] sm:$0xff] }
  0x38   : > { %v774_v38 = vadd.f32 %v773_v29, %v772_v33  ;;  %4535 = vmatpush3.msra.mxu0 %v678_v14 }
  0x39   : > { %v801_v44 = vadd.f32 %v800_v37, %v799_v39  ;;  %4550 = vmatprep.subr.mxu0 %v6087_v0  ;;  %v1116_v37 = vld [vmem:[#allocation3 + $0x90] sm:$0xff]  ;;  %v1109_v39 = vld [vmem:[#allocation3 + $0x28] sm:$0xff] }
  0x3a   : > { %v776_v43 = vadd.f32 %v775_v35, %v774_v38  ;;  %v1111_v35 = vld [vmem:[#allocation3 + $0x38] sm:$0xff]  ;;  %v1110_v38 = vld [vmem:[#allocation3 + $0x30] sm:$0xff] }
  0x3b   : > { %v803_v47 = vadd.f32 %v802_v42, %v801_v44  ;;  %v1114_v42 = vld [vmem:[#allocation3 + $0x80] sm:$0xff]  ;;  %v5405_v44 = vld [vmem:[#allocation3 + $0xf8] sm:$0xff] }
  0x3c   : > { %v778_v46 = vadd.f32 %v777_v40, %v776_v43  ;;  %v1115_v40 = vld [vmem:[#allocation3 + $0x88] sm:$0xff] }
  0x3d   : > { %v805_v50 = vadd.f32 %v804_v45, %v803_v47  ;;  %v1099_v43 = vld [vmem:[#allocation2 + $0x8] sm:$0xff]  ;;  %v5409_v45 = vld [vmem:[#allocation3 + $0x78] sm:$0xff] }
  0x3e   : > { %v779_v49 = vrot.slane %v778_v46, 4 }
  0x3f   : > { %v807_v52 = vadd.f32 %v806_v48, %v805_v50 }
  0x40   : > { %v780_v51 = vadd.f32 %v779_v49, %v778_v46  ;;  %v517_v46 = vlaneseq }
  0x41   : > { %v808_v54 = vrot.slane %v807_v52, 4 }
  0x42   : > { %v781_v53 = vrot.slane %v780_v51, 2  ;;  %v4985_v5 = vpop.eup %4984  ;;  %v5412_v47 = vshrl.u32 %v517_v46, 7 }
  0x43   : > { %v809_v56 = vadd.f32 %v808_v54, %v807_v52  ;;  %v674_v8 = vadd.f32 1.0, %v4985_v5 }
  0x44   : > { %v782_v55 = vadd.f32 %v781_v53, %v780_v51  ;;  %6110 = vst [vmem:[#allocation9_spill] sm:$0xff] %v5412_v47  ;;  %v6086_v48 = vsub.s32 1, %v5412_v47  ;;  %v5416_v49 = vsub.s32 0, %v5412_v47 }
  0x45   : > { %v810_v58 = vrot.slane %v809_v56, 2  ;;  %4986 = vrcp.f32 %v674_v8 }
  0x46   : > { %v783_v57 = vrot.slane %v782_v55, 1  ;;  %6111 = vst [vmem:[#allocation10_spill] sm:$0xff] %v5416_v49 }
  0x47   : > { %v811_v59 = vadd.f32 %v810_v58, %v809_v56 }
  0x48   : > { %v784_v60 = vadd.f32 %v783_v57, %v782_v55 }
  0x49   : > { %v812_v61 = vrot.slane %v811_v59, 1 }
  0x4b   : > { %v813_v62 = vadd.f32 %v812_v61, %v811_v59 }
  0x4d   : > { %v815_v63 = vsel %vm814_vm2, %v784_v60, %v813_v62  ;;  %v4115_v62 = vld [vmem:[%s6073_s2] ss:$0 sm:$0xff] }
  0x4e   : > { %4548 = vmatmul.mubr.msk.f32.vlgmr.msra.gmra.mxu1 %vm512_vm0, %v815_v63 }
  0x4f   : > { %4562 = vmatpush3.msra.mxu1 %v1117_v36 }
  0x50   : > { %4563 = vmatprep.subr.mxu1 %v1116_v37 }
  0x51   : > { %4564 = vmatpush3.msra.mxu1 %v1116_v37 }
  0x52   : > { %v4987_v13 = vpop.eup %4986  ;;  %4565 = vmatprep.subr.mxu1 %v1115_v40 }
  0x53   : > { %v677_v15 = vmul.f32 %v4987_v13, %v670_v1  ;;  %4566 = vmatpush3.msra.mxu1 %v1115_v40 }
  0x54   : > { %4567 = vmatprep.subr.mxu1 %v1114_v42 }
  0x55   : > { %4537 = vmatmul.mubr.msk.f32.vlgmr.msra.gmra.mxu0 %vm512_vm0, %v677_v15  ;;  %4568 = vmatpush3.msra.mxu1 %v1114_v42 }
  0x56   : > { %4558 = vmatprep.mubr.msk.f32.mxu0 %vm5129_vm1, %v6087_v0  ;;  %4551 = vmatpush3.msra.mxu0 %v907_v16 }
  0x57   : > { %4552 = vmatprep.subr.mxu0 %v6087_v0  ;;  %4601 = vmatprep.subr.mxu1 %v5405_v44 }
  0x58   : > { %4553 = vmatpush3.msra.mxu0 %v906_v17 }
  0x59   : > { %4554 = vmatprep.subr.mxu0 %v6087_v0 }
  0x5a   : > { %4555 = vmatpush3.msra.mxu0 %v905_v19 }
  0x5b   : > { %4556 = vmatprep.subr.mxu0 %v6087_v0 }
  0x5c   : > { %4557 = vmatpush3.msra.mxu0 %v904_v20 }
  0x5d   : > { %4581 = vmatprep.subr.mxu0 %v1111_v35 }
 0x10e   : > { %v889_v21 = vpop.f32.mrf.mxu1 }
 0x10f   : > { %v894_v22 = vmul.f32 0.015625, %v889_v21 }
 0x110   : > { %v4549_v23 = vpop.f32.mrf.mxu1 }
 0x111   : > { %v895_v24 = vmul.f32 %v894_v22, %v894_v22 }
 0x113   : > { %v897_v26 = vrot.slane %v895_v24, 7 }
 0x115   : > { %v899_v27 = vsub.f32 %v894_v22, %v897_v26  ;;  %v5403_v33 = vpop.f32.mrf.mxu0 }
 0x117   : > { %v900_v28 = vmax.f32 %v899_v27, 0.0  ;;  %v4538_v34 = vpop.f32.mrf.mxu0 }
 0x119   : > { %v901_v29 = vadd.f32 1e-05, %v900_v28 }
 0x11b   : > { %4988 = vrsqrt.f32 %v901_v29 }
 0x128   : > { %v4989_v30 = vpop.eup %4988 }
 0x129   : > { %v903_v31 = vsel %vm814_vm2, %v894_v22, %v4989_v30 }
 0x12a   : > { %4559 = vmatmul.mubr.msk.f32.vlgmr.msra.gmra.mxu0 %vm512_vm0, %v903_v31 }
 0x12b   : > { %4582 = vmatpush3.msra.mxu0 %v1111_v35  ;;  %4589 = vmatprep.mubr.msk.f32.mxu0 %vm512_vm0, %v1099_v43 }
 0x12c   : > { %4583 = vmatprep.subr.mxu0 %v1110_v38 }
 0x12d   : > { %4584 = vmatpush3.msra.mxu0 %v1110_v38 }
 0x12e   : > { %4585 = vmatprep.subr.mxu0 %v1109_v39 }
 0x12f   : > { %4586 = vmatpush3.msra.mxu0 %v1109_v39 }
 0x130   : > { %4587 = vmatprep.subr.mxu0 %v1108_v41 }
 0x131   : > { %4588 = vmatpush3.msra.mxu0 %v1108_v41 }
 0x132   : > { %4621 = vmatprep.subr.mxu0 %v5409_v45 }
 0x1ea   : > { %v977_v50 = vpop.f32.mrf.mxu0 }
 0x1eb   : > { %v984_v51 = vrot.slane %v977_v50, %v5416_v49  ;;  %v996_v52 = vrot.slane %v977_v50, %v6086_v48 }
 0x1ec   : > { %v4560_v53 = vpop.f32.mrf.mxu0 }
 0x1ed   : > { %v985_v54 = vsub.f32 %v5289_v3, %v984_v51  ;;  %v986_v55 = vsub.f32 %v5292_v4, %v984_v51  ;;  %v987_v56 = vsub.f32 %v5299_v6, %v984_v51  ;;  %v988_v57 = vsub.f32 %v5302_v7, %v984_v51 }
 0x1ee   : > { %v989_v58 = vsub.f32 %v5313_v12, %v984_v51  ;;  %v990_v59 = vsub.f32 %v5326_v18, %v984_v51  ;;  %v991_v60 = vsub.f32 %v5338_v25, %v984_v51  ;;  %v992_v61 = vsub.f32 %v5347_v32, %v984_v51  ;;  %v4116_v12 = vld [vmem:[%s6074_s3] ss:$0 sm:$0xff] }
 0x1ef   : > { %v997_v63 = vmul.f32 %v996_v52, %v985_v54  ;;  %v998_v3 = vmul.f32 %v996_v52, %v986_v55  ;;  %v999_v1 = vmul.f32 %v996_v52, %v987_v56  ;;  %v1000_v4 = vmul.f32 %v996_v52, %v988_v57 }
 0x1f0   : > { %v1001_v2 = vmul.f32 %v996_v52, %v989_v58  ;;  %v1002_v6 = vmul.f32 %v996_v52, %v990_v59  ;;  %v1003_v5 = vmul.f32 %v996_v52, %v991_v60  ;;  %v1004_v7 = vmul.f32 %v996_v52, %v992_v61 }
 0x1f1   : > { %v1012_v18 = vmul.f32 %v4115_v62, %v997_v63  ;;  %v1013_v25 = vmul.f32 %v4115_v62, %v998_v3  ;;  %v1014_v8 = vmul.f32 %v4115_v62, %v999_v1  ;;  %v1015_v32 = vmul.f32 %v4115_v62, %v1000_v4 }
 0x1f2   : > { %v1016_v9 = vmul.f32 %v4115_v62, %v1001_v2  ;;  %v1017_v10 = vmul.f32 %v4115_v62, %v1002_v6  ;;  %v1018_v11 = vmul.f32 %v4115_v62, %v1003_v5  ;;  %v1019_v13 = vmul.f32 %v4115_v62, %v1004_v7 }
 0x1f3   : > { %v1027_v14 = vadd.f32 %v4116_v12, %v1012_v18  ;;  %v1028_v15 = vadd.f32 %v4116_v12, %v1013_v25  ;;  %v1029_v16 = vadd.f32 %v4116_v12, %v1014_v8  ;;  %v1030_v17 = vadd.f32 %v4116_v12, %v1015_v32  ;;  %v1366_v25 = vld [vmem:[#allocation3 + $0xf0] sm:$0xff]  ;;  %v1365_v32 = vld [vmem:[#allocation3 + $0xe8] sm:$0xff] }
 0x1f4   : > { %v1031_v19 = vadd.f32 %v4116_v12, %v1016_v9  ;;  %v1032_v20 = vadd.f32 %v4116_v12, %v1017_v10  ;;  %v1033_v21 = vadd.f32 %v4116_v12, %v1018_v11  ;;  %v1034_v26 = vadd.f32 %v4116_v12, %v1019_v13  ;;  %v1521_v10 = vld [vmem:[#allocation3 + $0x70] sm:$0xff]  ;;  %v1364_v13 = vld [vmem:[#allocation3 + $0xe0] sm:$0xff] }
 0x1f5   : > { %v4117_v22 = vmul.f32 -1.442695, %v1027_v14  ;;  %v4118_v23 = vmul.f32 -1.442695, %v1028_v15  ;;  %v4119_v24 = vmul.f32 -1.442695, %v1029_v16 }
 0x1f6   : > { %v4120_v27 = vmul.f32 -1.442695, %v1030_v17  ;;  %v4121_v28 = vmul.f32 -1.442695, %v1031_v19  ;;  %v4122_v29 = vmul.f32 -1.442695, %v1032_v20 }
 0x1f7   : > { %4990 = vpow2.f32 %v4117_v22  ;;  %v4123_v30 = vmul.f32 -1.442695, %v1033_v21  ;;  %v4124_v31 = vmul.f32 -1.442695, %v1034_v26 }
 0x1f8   : > { %4992 = vpow2.f32 %v4118_v23  ;;  %v1772_v23 = vld [vmem:[#allocation3 + $0xd8] sm:$0xff] }
 0x1f9   : > { %4994 = vpow2.f32 %v4119_v24 }
 0x1fa   : > { %4996 = vpow2.f32 %v4120_v27 }
 0x1fb   : > { %4998 = vpow2.f32 %v4121_v28  ;;  %v1771_v28 = vld [vmem:[#allocation3 + $0xd0] sm:$0xff] }
 0x1fc   : > { %5000 = vpow2.f32 %v4122_v29 }
 0x1fd   : > { %5002 = vpow2.f32 %v4123_v30  ;;  %v1513_v30 = vld [vmem:[#allocation3] sm:$0xff] }
 0x1fe   : > { %5004 = vpow2.f32 %v4124_v31 }
 0x204   : > { %v4991_v34 = vpop.eup %4990 }
 0x205   : > { %v4993_v35 = vpop.eup %4992  ;;  %v1059_v36 = vadd.f32 1.0, %v4991_v34  ;;  %v1770_v34 = vld [vmem:[#allocation3 + $0xc8] sm:$0xff] }
 0x206   : > { %v4995_v37 = vpop.eup %4994  ;;  %v1060_v38 = vadd.f32 1.0, %v4993_v35  ;;  %v1362_v35 = vld [vmem:[#allocation2 + $0x50] sm:$0xff] }
 0x207   : > { %v4997_v39 = vpop.eup %4996  ;;  %v1061_v40 = vadd.f32 1.0, %v4995_v37  ;;  %5006 = vrcp.f32 %v1059_v36  ;;  %v1769_v37 = vld [vmem:[#allocation3 + $0xc0] sm:$0xff] }
 0x208   : > { %v4999_v41 = vpop.eup %4998  ;;  %v1062_v42 = vadd.f32 1.0, %v4997_v39  ;;  %5008 = vrcp.f32 %v1060_v38  ;;  %v1505_v38 = vld [vmem:[#allocation2 + $0x7] sm:$0xff]  ;;  %v1928_v39 = vld [vmem:[#allocation3 + $0xb8] sm:$0xff] }
 0x209   : > { %v5001_v43 = vpop.eup %5000  ;;  %v1063_v46 = vadd.f32 1.0, %v4999_v41  ;;  %5010 = vrcp.f32 %v1061_v40  ;;  %v1927_v40 = vld [vmem:[#allocation3 + $0xb0] sm:$0xff]  ;;  %v1922_v41 = vld [vmem:[#allocation3 + $0x58] sm:$0xff] }
 0x20a   : > { %v5003_v50 = vpop.eup %5002  ;;  %v1064_v51 = vadd.f32 1.0, %v5001_v43  ;;  %5012 = vrcp.f32 %v1062_v42  ;;  %v1926_v42 = vld [vmem:[#allocation3 + $0xa8] sm:$0xff]  ;;  %v1921_v43 = vld [vmem:[#allocation3 + $0x50] sm:$0xff] }
 0x20b   : > { %v5005_v52 = vpop.eup %5004  ;;  %v1065_v53 = vadd.f32 1.0, %v5003_v50  ;;  %5014 = vrcp.f32 %v1063_v46  ;;  %v1925_v46 = vld [vmem:[#allocation3 + $0xa0] sm:$0xff]  ;;  %v1920_v50 = vld [vmem:[#allocation3 + $0x48] sm:$0xff] }
 0x20c   : > { %v1066_v54 = vadd.f32 1.0, %v5005_v52  ;;  %5016 = vrcp.f32 %v1064_v51  ;;  %v1919_v52 = vld [vmem:[#allocation3 + $0x40] sm:$0xff] }
 0x20d   : > { %5018 = vrcp.f32 %v1065_v53 }
 0x20e   : > { %5020 = vrcp.f32 %v1066_v54  ;;  %v2178_v54 = vld [vmem:[#allocation3 + $0x118] sm:$0xff] }
 0x214   : > { %v5007_v55 = vpop.eup %5006 }
 0x215   : > { %v5009_v56 = vpop.eup %5008  ;;  %v1083_v57 = vmul.f32 %v5007_v55, %v1027_v14 }
 0x216   : > { %v5011_v58 = vpop.eup %5010  ;;  %v1084_v59 = vmul.f32 %v5009_v56, %v1028_v15  ;;  %v1516_v15 = vld [vmem:[#allocation3 + $0x18] sm:$0xff] }
 0x217   : > { %v5013_v60 = vpop.eup %5012  ;;  %v1085_v61 = vmul.f32 %v5011_v58, %v1029_v16  ;;  %1091 = vst.msk [vmem:[#allocation2 + $0x10] sm:$0xff] %vm512_vm0, %v1083_v57  ;;  %v2177_v57 = vld [vmem:[#allocation3 + $0x110] sm:$0xff] }
 0x218   : > { %v5015_v62 = vpop.eup %5014  ;;  %v1086_v63 = vmul.f32 %v5013_v60, %v1030_v17  ;;  %1092 = vst.msk [vmem:[#allocation2 + $0x18] sm:$0xff] %vm512_vm0, %v1084_v59  ;;  %v1519_v17 = vld [vmem:[#allocation3 + $0x60] sm:$0xff]  ;;  %v2176_v60 = vld [vmem:[#allocation3 + $0x108] sm:$0xff] }
 0x219   : > { %v5017_v3 = vpop.eup %5016  ;;  %v1087_v1 = vmul.f32 %v5015_v62, %v1031_v19  ;;  %1093 = vst.msk [vmem:[#allocation2 + $0x20] sm:$0xff] %vm512_vm0, %v1085_v61 }
 0x21a   : > { %v5019_v4 = vpop.eup %5018  ;;  %v1088_v2 = vmul.f32 %v5017_v3, %v1032_v20  ;;  %1094 = vst.msk [vmem:[#allocation2 + $0x28] sm:$0xff] %vm512_vm0, %v1086_v63  ;;  %v2175_v63 = vld [vmem:[#allocation3 + $0x100] sm:$0xff] }
 0x21b   : > { %v5021_v6 = vpop.eup %5020  ;;  %v1089_v5 = vmul.f32 %v5019_v4, %v1033_v21  ;;  %1095 = vst.msk [vmem:[#allocation2 + $0x30] sm:$0xff] %vm512_vm0, %v1087_v1  ;;  %v1515_v21 = vld [vmem:[#allocation3 + $0x10] sm:$0xff] }
 0x21c   : > { %v1090_v7 = vmul.f32 %v5021_v6, %v1034_v26  ;;  %1096 = vst.msk [vmem:[#allocation2 + $0x38] sm:$0xff] %vm512_vm0, %v1088_v2  ;;  %v1514_v26 = vld [vmem:[#allocation3 + $0x8] sm:$0xff]  ;;  %v2173_v4 = vld [vmem:[#allocation2 + $0x51] sm:$0xff] }
 0x21d   : > { %1097 = vst.msk [vmem:[#allocation2 + $0x40] sm:$0xff] %vm512_vm0, %v1089_v5  ;;  %v2429_v2 = vld [vmem:[%s6075_s4 + $0x18] sm:$0xff]  ;;  %v2428_v6 = vld [vmem:[%s6075_s4 + $0x10] sm:$0xff]  ;;  %v2427_v5 = vld [vmem:[%s6075_s4 + $0x8] sm:$0xff] }
 0x21e   : > { %1098 = vst.msk [vmem:[#allocation2 + $0x48] sm:$0xff] %vm512_vm0, %v1090_v7  ;;  %v1100_v12 = vld [vmem:[#allocation2 + $0x10] sm:$0xff]  ;;  %v2426_v7 = vld [vmem:[%s6075_s4] sm:$0xff] }
 0x21f   : > { %4569 = vmatprep.mubr.msk.f32.mxu1 %vm512_vm0, %v1100_v12  ;;  %4590 = vmatmul.mubr.msk.f32.vlgmr.msra.gmra.mxu0 %vm512_vm0, %v1100_v12  ;;  %v1101_v18 = vld [vmem:[#allocation2 + $0x18] sm:$0xff]  ;;  %v1506_v19 = vld [vmem:[#allocation2 + $0xf] sm:$0xff] }
 0x220   : > { %4570 = vmatmul.mubr.msk.f32.vlgmr.msra.gmra.mxu1 %vm512_vm0, %v1101_v18  ;;  %4592 = vmatprep.mubr.msk.f32.mxu0 %vm512_vm0, %v1101_v18  ;;  %v1102_v8 = vld [vmem:[#allocation2 + $0x20] sm:$0xff]  ;;  %v1507_v20 = vld [vmem:[#allocation2 + $0x17] sm:$0xff]  ;;  %v1910_v53 = vld [vmem:[#allocation2 + $0x9] sm:$0xff] }
 0x221   : > { %4602 = vmatpush3.msra.mxu1 %v5405_v44  ;;  %4572 = vmatprep.mubr.msk.f32.mxu1 %vm512_vm0, %v1102_v8  ;;  %v1103_v9 = vld [vmem:[#allocation2 + $0x28] sm:$0xff]  ;;  %v1508_v22 = vld [vmem:[#allocation2 + $0x1f] sm:$0xff]  ;;  %v1911_v55 = vld [vmem:[#allocation2 + $0x11] sm:$0xff] }
 0x222   : > { %4603 = vmatprep.subr.mxu1 %v1366_v25  ;;  %4622 = vmatpush3.msra.mxu0 %v5409_v45  ;;  %v1104_v11 = vld [vmem:[#allocation2 + $0x30] sm:$0xff]  ;;  %v1520_v45 = vld [vmem:[#allocation3 + $0x68] sm:$0xff]  ;;  %v1912_v56 = vld [vmem:[#allocation2 + $0x19] sm:$0xff] }
 0x223   : > { %4593 = vmatmul.mubr.msk.f32.gmra.mxu0 %vm512_vm0, %v1102_v8  ;;  %4604 = vmatpush3.msra.mxu1 %v1366_v25  ;;  %v1105_v44 = vld [vmem:[#allocation2 + $0x38] sm:$0xff]  ;;  %v1509_v24 = vld [vmem:[#allocation2 + $0x27] sm:$0xff]  ;;  %v1510_v27 = vld [vmem:[#allocation2 + $0x2f] sm:$0xff] }
 0x224   : > { %4573 = vmatmul.mubr.msk.f32.gmra.mxu1 %vm512_vm0, %v1103_v9  ;;  %4595 = vmatprep.mubr.msk.f32.mxu0 %vm512_vm0, %v1103_v9  ;;  %v1106_v14 = vld [vmem:[#allocation2 + $0x40] sm:$0xff]  ;;  %v1511_v29 = vld [vmem:[#allocation2 + $0x37] sm:$0xff]  ;;  %v1914_v59 = vld [vmem:[#allocation2 + $0x29] sm:$0xff] }
 0x225   : > { %4575 = vmatprep.mubr.msk.f32.mxu1 %vm512_vm0, %v1104_v11  ;;  %4605 = vmatprep.subr.mxu1 %v1365_v32  ;;  %v1112_v16 = vld [vmem:[#allocation2 + $0x48] sm:$0xff]  ;;  %v1512_v31 = vld [vmem:[#allocation2 + $0x3f] sm:$0xff]  ;;  %v1915_v61 = vld [vmem:[#allocation2 + $0x31] sm:$0xff] }
 0x226   : > { %4606 = vmatpush3.msra.mxu1 %v1365_v32  ;;  %4623 = vmatprep.subr.mxu0 %v1521_v10  ;;  %v1517_v36 = vld [vmem:[#allocation2 + $0x47] sm:$0xff]  ;;  %v1767_v51 = vld [vmem:[#allocation2 + $0x4f] sm:$0xff]  ;;  %v1916_v62 = vld [vmem:[#allocation2 + $0x39] sm:$0xff] }
 0x227   : > { %4596 = vmatmul.mubr.msk.f32.gmra.mxu0 %vm512_vm0, %v1104_v11  ;;  %4607 = vmatprep.subr.mxu1 %v1364_v13  ;;  %v1913_v58 = vld [vmem:[#allocation2 + $0x21] sm:$0xff]  ;;  %v1923_v1 = vld [vmem:[#allocation2 + $0x49] sm:$0xff] }
 0x228   : > { %4576 = vmatmul.mubr.msk.f32.gmra.mxu1 %vm512_vm0, %v1105_v44  ;;  %4598 = vmatprep.mubr.msk.f32.mxu0 %vm512_vm0, %v1105_v44  ;;  %v1917_v3 = vld [vmem:[#allocation2 + $0x41] sm:$0xff] }
 0x229   : > { %4578 = vmatprep.mubr.msk.f32.mxu1 %vm512_vm0, %v1106_v14  ;;  %4624 = vmatpush3.msra.mxu0 %v1521_v10 }
 0x22a   : > { %4625 = vmatprep.subr.mxu0 %v1520_v45  ;;  %4608 = vmatpush3.msra.mxu1 %v1364_v13 }
 0x22b   : > { %4599 = vmatmul.mubr.msk.f32.gmra.mxu0 %vm512_vm0, %v1106_v14  ;;  %4641 = vmatprep.subr.mxu1 %v1516_v15 }
 0x22c   : > { %4579 = vmatmul.mubr.msk.f32.gmra.mxu1 %vm512_vm0, %v1112_v16  ;;  %4626 = vmatpush3.msra.mxu0 %v1520_v45 }
 0x22d   : > { %4629 = vmatprep.mubr.msk.f32.mxu0 %vm512_vm0, %v1506_v19  ;;  %4609 = vmatprep.mubr.msk.f32.mxu1 %vm512_vm0, %v1101_v18 }
 0x22e   : > { %4627 = vmatprep.subr.mxu0 %v1519_v17 }
 0x22f   : > { %4628 = vmatpush3.msra.mxu0 %v1519_v17 }
 0x230   : > { %4630 = vmatmul.mubr.msk.f32.vlgmr.msra.gmra.mxu0 %vm512_vm0, %v1507_v20  ;;  %4610 = vmatmul.mubr.msk.f32.vlgmr.msra.gmra.mxu1 %vm512_vm0, %v1102_v8 }
 0x231   : > { %4632 = vmatprep.mubr.msk.f32.mxu0 %vm512_vm0, %v1508_v22  ;;  %4642 = vmatpush3.msra.mxu1 %v1516_v15 }
 0x232   : > { %4612 = vmatprep.mubr.msk.f32.mxu1 %vm512_vm0, %v1103_v9  ;;  %4643 = vmatprep.subr.mxu1 %v1515_v21 }
 0x233   : > { %4644 = vmatpush3.msra.mxu1 %v1515_v21  ;;  %4661 = vmatprep.subr.mxu0 %v1772_v23 }
 0x234   : > { %4633 = vmatmul.mubr.msk.f32.gmra.mxu0 %vm512_vm0, %v1509_v24  ;;  %4613 = vmatmul.mubr.msk.f32.gmra.mxu1 %vm512_vm0, %v1104_v11 }
 0x235   : > { %4635 = vmatprep.mubr.msk.f32.mxu0 %vm512_vm0, %v1510_v27  ;;  %4615 = vmatprep.mubr.msk.f32.mxu1 %vm512_vm0, %v1105_v44 }
 0x236   : > { %4645 = vmatprep.subr.mxu1 %v1514_v26  ;;  %4662 = vmatpush3.msra.mxu0 %v1772_v23 }
 0x237   : > { %4646 = vmatpush3.msra.mxu1 %v1514_v26  ;;  %4663 = vmatprep.subr.mxu0 %v1771_v28 }
 0x238   : > { %4636 = vmatmul.mubr.msk.f32.gmra.mxu0 %vm512_vm0, %v1511_v29  ;;  %4616 = vmatmul.mubr.msk.f32.gmra.mxu1 %vm512_vm0, %v1106_v14 }
 0x239   : > { %4638 = vmatprep.mubr.msk.f32.mxu0 %vm512_vm0, %v1512_v31  ;;  %4618 = vmatprep.mubr.msk.f32.mxu1 %vm512_vm0, %v1112_v16 }
 0x23a   : > { %4664 = vmatpush3.msra.mxu0 %v1771_v28  ;;  %4647 = vmatprep.subr.mxu1 %v1513_v30 }
 0x23b   : > { %4665 = vmatprep.subr.mxu0 %v1770_v34  ;;  %4648 = vmatpush3.msra.mxu1 %v1513_v30 }
 0x23c   : > { %4639 = vmatmul.mubr.msk.f32.gmra.mxu0 %vm512_vm0, %v1517_v36  ;;  %4619 = vmatmul.mubr.msk.f32.gmra.mxu1 %vm512_vm0, %v1362_v35 }
 0x23d   : > { %4666 = vmatpush3.msra.mxu0 %v1770_v34  ;;  %4669 = vmatprep.mubr.msk.f32.mxu0 %vm512_vm0, %v1507_v20 }
 0x23e   : > { %4667 = vmatprep.subr.mxu0 %v1769_v37  ;;  %4649 = vmatprep.mubr.msk.f32.mxu1 %vm512_vm0, %v1505_v38 }
 0x23f   : > { %4668 = vmatpush3.msra.mxu0 %v1769_v37  ;;  %4681 = vmatprep.subr.mxu1 %v1928_v39 }
 0x240   : > { %4670 = vmatmul.mubr.msk.f32.vlgmr.msra.gmra.mxu0 %vm512_vm0, %v1508_v22  ;;  %4650 = vmatmul.mubr.msk.f32.vlgmr.msra.gmra.mxu1 %vm512_vm0, %v1506_v19 }
 0x241   : > { %4672 = vmatprep.mubr.msk.f32.mxu0 %vm512_vm0, %v1509_v24  ;;  %4682 = vmatpush3.msra.mxu1 %v1928_v39 }
 0x242   : > { %4652 = vmatprep.mubr.msk.f32.mxu1 %vm512_vm0, %v1507_v20  ;;  %4683 = vmatprep.subr.mxu1 %v1927_v40 }
 0x243   : > { %4684 = vmatpush3.msra.mxu1 %v1927_v40  ;;  %4701 = vmatprep.subr.mxu0 %v1922_v41 }
 0x244   : > { %4673 = vmatmul.mubr.msk.f32.gmra.mxu0 %vm512_vm0, %v1510_v27  ;;  %4653 = vmatmul.mubr.msk.f32.gmra.mxu1 %vm512_vm0, %v1508_v22 }
 0x245   : > { %4675 = vmatprep.mubr.msk.f32.mxu0 %vm512_vm0, %v1511_v29  ;;  %4655 = vmatprep.mubr.msk.f32.mxu1 %vm512_vm0, %v1509_v24 }
 0x246   : > { %4685 = vmatprep.subr.mxu1 %v1926_v42  ;;  %4702 = vmatpush3.msra.mxu0 %v1922_v41 }
 0x247   : > { %4686 = vmatpush3.msra.mxu1 %v1926_v42  ;;  %4703 = vmatprep.subr.mxu0 %v1921_v43 }
 0x248   : > { %4676 = vmatmul.mubr.msk.f32.gmra.mxu0 %vm512_vm0, %v1512_v31  ;;  %4656 = vmatmul.mubr.msk.f32.gmra.mxu1 %vm512_vm0, %v1510_v27 }
 0x249   : > { %4678 = vmatprep.mubr.msk.f32.mxu0 %vm512_vm0, %v1517_v36  ;;  %4658 = vmatprep.mubr.msk.f32.mxu1 %vm512_vm0, %v1511_v29 }
 0x24a   : > { %4704 = vmatpush3.msra.mxu0 %v1921_v43  ;;  %4687 = vmatprep.subr.mxu1 %v1925_v46 }
 0x24b   : > { %4705 = vmatprep.subr.mxu0 %v1920_v50  ;;  %4688 = vmatpush3.msra.mxu1 %v1925_v46 }
 0x24c   : > { %4679 = vmatmul.mubr.msk.f32.gmra.mxu0 %vm512_vm0, %v1767_v51  ;;  %4659 = vmatmul.mubr.msk.f32.gmra.mxu1 %vm512_vm0, %v1512_v31 }
 0x24d   : > { %4706 = vmatpush3.msra.mxu0 %v1920_v50  ;;  %4709 = vmatprep.mubr.msk.f32.mxu0 %vm512_vm0, %v1910_v53 }
 0x24e   : > { %4689 = vmatprep.mubr.msk.f32.mxu1 %vm512_vm0, %v1911_v55  ;;  %4707 = vmatprep.subr.mxu0 %v1919_v52 }
 0x24f   : > { %4708 = vmatpush3.msra.mxu0 %v1919_v52  ;;  %4721 = vmatprep.subr.mxu1 %v2178_v54  ;;  %v519_v52 = vadd.s32 8, %v5412_v47 }
 0x250   : > { %4710 = vmatmul.mubr.msk.f32.vlgmr.msra.gmra.mxu0 %vm512_vm0, %v1911_v55  ;;  %4690 = vmatmul.mubr.msk.f32.vlgmr.msra.gmra.mxu1 %vm512_vm0, %v1912_v56  ;;  %v521_v55 = vadd.s32 24, %v5412_v47 }
 0x251   : > { %4712 = vmatprep.mubr.msk.f32.mxu0 %vm512_vm0, %v1912_v56  ;;  %4722 = vmatpush3.msra.mxu1 %v2178_v54 }
 0x252   : > { %4692 = vmatprep.mubr.msk.f32.mxu1 %vm512_vm0, %v1913_v58  ;;  %4723 = vmatprep.subr.mxu1 %v2177_v57 }
 0x253   : > { %4724 = vmatpush3.msra.mxu1 %v2177_v57  ;;  %4741 = vmatprep.subr.mxu0 %v6087_v0  ;;  %v523_v57 = vadd.s32 40, %v5412_v47 }
 0x254   : > { %4713 = vmatmul.mubr.msk.f32.gmra.mxu0 %vm512_vm0, %v1913_v58  ;;  %4693 = vmatmul.mubr.msk.f32.gmra.mxu1 %vm512_vm0, %v1914_v59 }
 0x255   : > { %4715 = vmatprep.mubr.msk.f32.mxu0 %vm512_vm0, %v1914_v59  ;;  %4695 = vmatprep.mubr.msk.f32.mxu1 %vm512_vm0, %v1915_v61 }
 0x256   : > { %4725 = vmatprep.subr.mxu1 %v2176_v60  ;;  %4742 = vmatpush3.msra.mxu0 %v2429_v2 }
 0x257   : > { %4726 = vmatpush3.msra.mxu1 %v2176_v60  ;;  %4743 = vmatprep.subr.mxu0 %v6087_v0 }
 0x258   : > { %4716 = vmatmul.mubr.msk.f32.gmra.mxu0 %vm512_vm0, %v1915_v61  ;;  %4696 = vmatmul.mubr.msk.f32.gmra.mxu1 %vm512_vm0, %v1916_v62 }
 0x259   : > { %4718 = vmatprep.mubr.msk.f32.mxu0 %vm512_vm0, %v1916_v62  ;;  %4698 = vmatprep.mubr.msk.f32.mxu1 %vm512_vm0, %v1917_v3 }
 0x25a   : > { %4727 = vmatprep.subr.mxu1 %v2175_v63  ;;  %4744 = vmatpush3.msra.mxu0 %v2428_v6  ;;  %v525_v6 = vadd.s32 56, %v5412_v47 }
 0x25b   : > { %4728 = vmatpush3.msra.mxu1 %v2175_v63  ;;  %4745 = vmatprep.subr.mxu0 %v6087_v0  ;;  %v530_v63 = vand.u32 7, %v5412_v47 }
 0x25c   : > { %4719 = vmatmul.mubr.msk.f32.gmra.mxu0 %vm512_vm0, %v1917_v3  ;;  %4699 = vmatmul.mubr.msk.f32.gmra.mxu1 %vm512_vm0, %v1923_v1 }
 0x25d   : > { %4729 = vmatprep.mubr.msk.f32.mxu1 %vm512_vm0, %v1912_v56  ;;  %4749 = vmatprep.mubr.msk.f32.mxu0 %vm5129_vm1, %v6087_v0  ;;  %v520_v56 = vadd.s32 16, %v5412_v47  ;;  %vm622_vm4 = vcmp.gt.s32.totalorder %v530_v63, 0  ;;  %vm646_vm12 = vcmp.lt.s32.totalorder %v530_v63, 7 }
 0x25e   : > { %4746 = vmatpush3.msra.mxu0 %v2427_v5  ;;  %v524_v5 = vadd.s32 48, %v5412_v47 }
 0x25f   : > { %4747 = vmatprep.subr.mxu0 %v6087_v0  ;;  %v544_v2 = vand.u32 7, %v520_v56 }
 0x260   : > { %4730 = vmatmul.mubr.msk.f32.vlgmr.msra.gmra.mxu1 %vm512_vm0, %v1913_v58  ;;  %4748 = vmatpush3.msra.mxu0 %v2426_v7  ;;  %v565_v7 = vand.u32 7, %v523_v57  ;;  %v572_v56 = vand.u32 7, %v524_v5 }
 0x261   : > { %4732 = vmatprep.mubr.msk.f32.mxu1 %vm512_vm0, %v1914_v59  ;;  %4752 = vmatprep.subr.mxu0 %v6087_v0  ;;  %v522_v59 = vadd.s32 32, %v5412_v47  ;;  %vm624_vm6 = vcmp.gt.s32.totalorder %v544_v2, 0  ;;  %v6120_v47 = vmov 0.0   ;;  %vm648_vm14 = vcmp.lt.s32.totalorder %v544_v2, 7 }
 0x262   : > { %vm627_vm7 = vcmp.gt.s32.totalorder %v565_v7, 0  ;;  %vm628_vm10 = vcmp.gt.s32.totalorder %v572_v56, 0  ;;  %vm651_vm15 = vcmp.lt.s32.totalorder %v565_v7, 7 }
 0x263   : > { %v558_v48 = vand.u32 7, %v522_v59  ;;  %v5697_v63 = vsel %vm651_vm15, 1.0, %v6120_v47 }
 0x264   : > { %4733 = vmatmul.mubr.msk.f32.gmra.mxu1 %vm512_vm0, %v1915_v61  ;;  %v682_v61 = vld [vmem:[%s6080_s9] sm:$0x1]  ;;  %6134 = vst [vmem:[#allocation32_spill] sm:$0xff] %v5697_v63 }
 0x265   : > { %4735 = vmatprep.mubr.msk.f32.mxu1 %vm512_vm0, %v1916_v62  ;;  %v537_v62 = vand.u32 7, %v519_v52  ;;  %v753_v52 = vadd.f32 %v5403_v33, %v682_v61  ;;  %vm626_vm8 = vcmp.gt.s32.totalorder %v558_v48, 0  ;;  %v5652_v33 = vsel %vm622_vm4, 1.0, %v6120_v47 }
 0x266   : > { %6122 = vst [vmem:[#allocation20_spill] sm:$0xff] %v5652_v33 }
 0x267   : > { %vm623_vm3 = vcmp.gt.s32.totalorder %v537_v62, 0  ;;  %v5646_v59 = vrot.slane %v753_v52, %v5416_v49  ;;  %v5666_v52 = vsel %vm626_vm8, 1.0, %v6120_v47  ;;  %vm647_vm11 = vcmp.lt.s32.totalorder %v537_v62, 7 }
 0x268   : > { %4736 = vmatmul.mubr.msk.f32.gmra.mxu1 %vm512_vm0, %v1917_v3  ;;  %6127 = vst [vmem:[#allocation25_spill] sm:$0xff] %v5666_v52  ;;  %v5676_v52 = vsel %vm628_vm10, 1.0, %v6120_v47  ;;  %v5681_v62 = vsel %vm647_vm11, 1.0, %v6120_v47 }
 0x269   : > { %4738 = vmatprep.mubr.msk.f32.mxu1 %vm512_vm0, %v1923_v1  ;;  %6119 = vst [vmem:[#allocation18_spill] sm:$0xff] %v5646_v59  ;;  %6129 = vst [vmem:[#allocation27_spill] sm:$0xff] %v5676_v52 }
 0x26a   : > { %6130 = vst [vmem:[#allocation28_spill] sm:$0xff] %v5681_v62 }
 0x26c   : > { %4739 = vmatmul.mubr.msk.f32.gmra.mxu1 %vm512_vm0, %v2173_v4  ;;  %v551_v4 = vand.u32 7, %v521_v55  ;;  %v579_v55 = vand.u32 7, %v525_v6 }
 0x26e   : > { %vm625_vm5 = vcmp.gt.s32.totalorder %v551_v4, 0  ;;  %vm629_vm9 = vcmp.gt.s32.totalorder %v579_v55, 0  ;;  %vm649_vm13 = vcmp.lt.s32.totalorder %v551_v4, 7  ;;  %vm653_vm4 = vcmp.lt.s32.totalorder %v579_v55, 7 }
 0x26f   : > { %v5655_v61 = vsel %vm625_vm5, 1.0, %v6120_v47  ;;  %vm652_vm5 = vcmp.lt.s32.totalorder %v572_v56, 7  ;;  %v5703_v2 = vsel %vm653_vm4, 1.0, %v6120_v47 }
 0x270   : > { %6123 = vst [vmem:[#allocation21_spill] sm:$0xff] %v5655_v61  ;;  %6136 = vst [vmem:[#allocation34_spill] sm:$0xff] %v5703_v2 }
 0x2df   : > { %v5535_v12 = vpop.f32.mrf.mxu0 }
 0x2e0   : > { %v5537_v18 = vpop.f32.mrf.mxu1 }
 0x2e1   : > { %v5539_v25 = vpop.f32.mrf.mxu0  ;;  %v1322_v7 = vadd.f32 %v5535_v12, %v5537_v18 }
 0x2e2   : > { %v5541_v8 = vpop.f32.mrf.mxu1 }
 0x2e3   : > { %v5543_v32 = vpop.f32.mrf.mxu0  ;;  %v1317_v55 = vadd.f32 %v5539_v25, %v5541_v8 }
 0x2e4   : > { %v5545_v9 = vpop.f32.mrf.mxu1 }
 0x2e5   : > { %v5547_v10 = vpop.f32.mrf.mxu0 }
 0x2e6   : > { %v5549_v11 = vpop.f32.mrf.mxu1 }
 0x2e7   : > { %v5551_v13 = vpop.f32.mrf.mxu0 }
 0x2e8   : > { %v5553_v44 = vpop.f32.mrf.mxu1 }
 0x2e9   : > { %v5555_v45 = vpop.f32.mrf.mxu0  ;;  %v1342_v2 = vadd.f32 %v5551_v13, %v5553_v44 }
 0x2ea   : > { %v5557_v14 = vpop.f32.mrf.mxu1 }
 0x2eb   : > { %v5559_v15 = vpop.f32.mrf.mxu0  ;;  %v1337_v25 = vadd.f32 %v5555_v45, %v5557_v14 }
 0x2ec   : > { %v5561_v16 = vpop.f32.mrf.mxu1 }
 0x2ed   : > { %v5563_v17 = vpop.f32.mrf.mxu0  ;;  %v1352_v8 = vadd.f32 %v5559_v15, %v5561_v16 }
 0x2ee   : > { %v5565_v19 = vpop.f32.mrf.mxu1 }
 0x2f0   : > { %v5567_v20 = vpop.f32.mrf.mxu0  ;;  %v5569_v21 = vpop.f32.mrf.mxu1 }
 0x2f2   : > { %v5571_v22 = vpop.f32.mrf.mxu0  ;;  %v5573_v23 = vpop.f32.mrf.mxu1 }
 0x2f3   : > { %v1497_v14 = vadd.f32 %v5573_v23, %v1317_v55 }
 0x2f4   : > { %v5575_v24 = vpop.f32.mrf.mxu0  ;;  %v5577_v26 = vpop.f32.mrf.mxu1 }
 0x2f6   : > { %v5579_v27 = vpop.f32.mrf.mxu0  ;;  %v5581_v28 = vpop.f32.mrf.mxu1 }
 0x2f8   : > { %v5583_v29 = vpop.f32.mrf.mxu0  ;;  %v5585_v30 = vpop.f32.mrf.mxu1 }
 0x2f9   : > { %v1502_v23 = vadd.f32 %v5585_v30, %v1342_v2 }
 0x2fa   : > { %v5587_v31 = vpop.f32.mrf.mxu0  ;;  %v5589_v34 = vpop.f32.mrf.mxu1 }
 0x2fc   : > { %v5591_v35 = vpop.f32.mrf.mxu0  ;;  %v5593_v36 = vpop.f32.mrf.mxu1 }
 0x2fd   : > { %6112 = vst [vmem:[#allocation11_spill] sm:$0xff] %v5593_v36 }
 0x2fe   : > { %v5595_v37 = vpop.f32.mrf.mxu0  ;;  %v5597_v38 = vpop.f32.mrf.mxu1 }
 0x2ff   : > { %6113 = vst [vmem:[#allocation12_spill] sm:$0xff] %v5597_v38 }
 0x300   : > { %v5599_v39 = vpop.f32.mrf.mxu0  ;;  %v4651_v40 = vpop.f32.mrf.mxu1 }
 0x301   : > { %v1727_v59 = vadd.f32 %v4651_v40, %v5567_v20  ;;  %v5684_v20 = vsel %vm646_vm12, 1.0, %v6120_v47 }
 0x302   : > { %v5601_v41 = vpop.f32.mrf.mxu0  ;;  %v1721_v42 = vpop.f32.mrf.mxu1  ;;  %6131 = vst [vmem:[#allocation29_spill] sm:$0xff] %v5684_v20 }
 0x303   : > { %v1903_v56 = vadd.f32 %v5599_v39, %v1727_v59 }
 0x304   : > { %v5603_v43 = vpop.f32.mrf.mxu0  ;;  %v5605_v46 = vpop.f32.mrf.mxu1 }
 0x305   : > { %v1737_v40 = vadd.f32 %v5605_v46, %v5575_v24  ;;  %v5711_v24 = vsel %vm652_vm5, 1.0, %v6120_v47  ;;  %v1332_v46 = vadd.f32 %v5543_v32, %v5545_v9  ;;  %v1347_v32 = vadd.f32 %v5563_v17, %v5565_v19 }
 0x306   : > { %v5607_v50 = vpop.f32.mrf.mxu0  ;;  %v5609_v51 = vpop.f32.mrf.mxu1  ;;  %6137 = vst [vmem:[#allocation35_spill] sm:$0xff] %v5711_v24  ;;  %v1498_v9 = vadd.f32 %v5569_v21, %v1322_v7  ;;  %v5764_v7 = vld [vmem:[%s6078_s7] ss:$0 sm:$0xff] }
 0x307   : > { %6114 = vst [vmem:[#allocation13_spill] sm:$0xff] %v5607_v50  ;;  %v1500_v15 = vadd.f32 %v5577_v26, %v1332_v46  ;;  %v1501_v26 = vadd.f32 %v5589_v34, %v1337_v25 }
 0x308   : > { %v5612_v53 = vpop.f32.mrf.mxu0  ;;  %v5614_v54 = vpop.f32.mrf.mxu1 }
 0x309   : > { %6115 = vst [vmem:[#allocation14_spill] sm:$0xff] %v5612_v53  ;;  %v5663_v53 = vsel %vm627_vm7, 1.0, %v6120_v47  ;;  %v1747_v13 = vadd.f32 %v5614_v54, %v5583_v29 }
 0x30a   : > { %v5619_v58 = vpop.f32.mrf.mxu0  ;;  %v5622_v60 = vpop.f32.mrf.mxu1  ;;  %6126 = vst [vmem:[#allocation24_spill] sm:$0xff] %v5663_v53  ;;  %v5673_v53 = vsel %vm629_vm9, 1.0, %v6120_v47 }
 0x30b   : > { %6116 = vst [vmem:[#allocation15_spill] sm:$0xff] %v5619_v58  ;;  %v5658_v58 = vsel %vm624_vm6, 1.0, %v6120_v47  ;;  %6128 = vst [vmem:[#allocation26_spill] sm:$0xff] %v5673_v53  ;;  %v1742_v44 = vadd.f32 %v5622_v60, %v5587_v31 }
 0x30c   : > { %v5628_v3 = vpop.f32.mrf.mxu0  ;;  %v5630_v1 = vpop.f32.mrf.mxu1  ;;  %6124 = vst [vmem:[#allocation22_spill] sm:$0xff] %v5658_v58  ;;  %v1722_v58 = vadd.f32 %v1721_v42, %v5571_v22  ;;  %v5690_v22 = vsel %vm648_vm14, 1.0, %v6120_v47 }
 0x30d   : > { %6117 = vst [vmem:[#allocation16_spill] sm:$0xff] %v5628_v3  ;;  %6133 = vst [vmem:[#allocation31_spill] sm:$0xff] %v5690_v22 }
 0x30e   : > { %v5634_v0 = vpop.f32.mrf.mxu0  ;;  %v5636_v38 = vpop.f32.mrf.mxu1  ;;  %v1902_v63 = vadd.f32 %v5601_v41, %v1722_v58 }
 0x30f   : > { %6118 = vst [vmem:[#allocation17_spill] sm:$0xff] %v5634_v0  ;;  %v5649_v0 = vsel %vm623_vm3, 1.0, %v6120_v47  ;;  %vm650_vm3 = vcmp.lt.s32.totalorder %v558_v48, 7  ;;  %v5687_v48 = vsel %vm649_vm13, 1.0, %v6120_v47  ;;  %v1752_v29 = vadd.f32 %v5636_v38, %v5595_v37 }
 0x310   : > { %v5639_v36 = vpop.f32.mrf.mxu0  ;;  %v5641_v3 = vpop.f32.mrf.mxu1  ;;  %6121 = vst [vmem:[#allocation19_spill] sm:$0xff] %v5649_v0  ;;  %6132 = vst [vmem:[#allocation30_spill] sm:$0xff] %v5687_v48  ;;  %v5700_v4 = vsel %vm650_vm3, 1.0, %v6120_v47  ;;  %v2317_v16 = vmul.f32 %v5649_v0, %v1903_v56  ;;  %v2316_v21 = vmul.f32 %v5652_v33, %v1902_v63  ;;  %v6139_v54 = vld [vmem:[#allocation14_spill] sm:$0xff] }
 0x311   : > { %6135 = vst [vmem:[#allocation33_spill] sm:$0xff] %v5700_v4  ;;  %v1327_v4 = vadd.f32 %v5547_v10, %v5549_v11  ;;  %v1905_v10 = vadd.f32 %v5603_v43, %v1737_v40  ;;  %v1732_v11 = vadd.f32 %v5609_v51, %v5579_v27  ;;  %v2133_v17 = vadd.f32 %v5639_v36, %v5641_v3  ;;  %v6142_v40 = vld [vmem:[#allocation11_spill] sm:$0xff] }
 0x312   : > { %v5643_v57 = vpop.f32.mrf.mxu1  ;;  %v2127_v6 = vpop.f32.mrf.mxu0  ;;  %v1757_v27 = vadd.f32 %v5630_v1, %v5591_v35  ;;  %v1907_v58 = vadd.f32 %v6139_v54, %v1747_v13  ;;  %v6140_v60 = vld [vmem:[#allocation15_spill] sm:$0xff]  ;;  %v2325_v38 = vadd.f32 %v2317_v16, %v1498_v9  ;;  %v1504_v34 = vadd.f32 %v6142_v40, %v1352_v8 }
 0x313   : > { %v1499_v19 = vadd.f32 %v5581_v28, %v1327_v4  ;;  %v2128_v41 = vadd.f32 %v2127_v6, %v5643_v57  ;;  %v2319_v36 = vmul.f32 %v5655_v61, %v1905_v10  ;;  %v6138_v28 = vld [vmem:[#allocation13_spill] sm:$0xff]  ;;  %v1906_v35 = vadd.f32 %v6140_v60, %v1742_v44  ;;  %v6145_v10 = vld [vmem:[#allocation22_spill] sm:$0xff] }
 0x314   : > { %v5660_v5 = vpop.f32.mrf.mxu1  ;;  %v1904_v51 = vadd.f32 %v6138_v28, %v1732_v11  ;;  %v6143_v63 = vld [vmem:[#allocation16_spill] sm:$0xff]  ;;  %v2324_v55 = vadd.f32 %v2316_v21, %v1497_v14  ;;  %v6147_v44 = vld [vmem:[#allocation25_spill] sm:$0xff] }
 0x315   : > { %6125 = vst [vmem:[#allocation23_spill] sm:$0xff] %v5660_v5  ;;  %v4714_v5 = vpop.f32.mrf.mxu0  ;;  %v1909_v57 = vadd.f32 %v6143_v63, %v1757_v27  ;;  %v6146_v11 = vld [vmem:[#allocation24_spill] sm:$0xff]  ;;  %v2320_v16 = vmul.f32 %v6147_v44, %v1906_v35 }
 0x316   : > { %v5668_v49 = vpop.f32.mrf.mxu1  ;;  %v6144_v6 = vld [vmem:[#allocation17_spill] sm:$0xff]  ;;  %v2318_v8 = vmul.f32 %v6145_v10, %v1904_v51  ;;  %v2321_v13 = vmul.f32 %v6146_v11, %v1907_v58  ;;  %v6149_v58 = vld [vmem:[#allocation18_spill] sm:$0xff] }
 0x317   : > { %v2137_v12 = vpop.f32.mrf.mxu0  ;;  %v1908_v4 = vadd.f32 %v6144_v6, %v1752_v29 }
 0x318   : > { %v5678_v50 = vpop.f32.mrf.mxu1 }
 0x319   : > { %v4717_v31 = vpop.f32.mrf.mxu0 }
 0x31a   : > { %v5694_v42 = vpop.f32.mrf.mxu1  ;;  %v2153_v28 = vadd.f32 %v4717_v31, %v5678_v50 }
 0x31b   : > { %v2147_v2 = vpop.f32.mrf.mxu0 }
 0x31c   : > { %v5720_v18 = vpop.f32.mrf.mxu1  ;;  %v6141_v1 = vld [vmem:[#allocation23_spill] sm:$0xff] }
 0x31d   : > { %v2143_v37 = vadd.f32 %v4714_v5, %v6141_v1  ;;  %v2138_v5 = vadd.f32 %v2137_v12, %v5668_v49  ;;  %v2323_v12 = vmul.f32 %v5673_v53, %v1909_v57  ;;  %v4720_v51 = vpop.f32.mrf.mxu0  ;;  %v2326_v1 = vadd.f32 %v2318_v8, %v1499_v19  ;;  %v6150_v57 = vld [vmem:[#allocation32_spill] sm:$0xff] }
 0x31e   : > { %v5736_v45 = vpop.f32.mrf.mxu1  ;;  %v2163_v19 = vadd.f32 %v4720_v51, %v5720_v18 }
 0x31f   : > { %v2157_v40 = vpop.f32.mrf.mxu0 }
 0x320   : > { %v4731_v39 = vpop.f32.mrf.mxu1 }
 0x321   : > { %v2309_v43 = vadd.f32 %v4731_v39, %v2133_v17  ;;  %v2327_v17 = vadd.f32 %v2319_v36, %v1500_v15 }
 0x322   : > { %v2269_v3 = vpop.f32.mrf.mxu1 }
 0x323   : > { %v2333_v59 = vmul.f32 %v5681_v62, %v2309_v43  ;;  %v2308_v30 = vadd.f32 %v2269_v3, %v2128_v41  ;;  %v6148_v41 = vld [vmem:[#allocation12_spill] sm:$0xff]  ;;  %v2322_v43 = vmul.f32 %v5676_v52, %v1908_v4  ;;  %v2148_v3 = vadd.f32 %v2147_v2, %v5694_v42 }
 0x324   : > { %v4734_v56 = vpop.f32.mrf.mxu1  ;;  %v1503_v49 = vadd.f32 %v6148_v41, %v1347_v32  ;;  %v2331_v42 = vadd.f32 %v2323_v12, %v1504_v34  ;;  %v2158_v34 = vadd.f32 %v2157_v40, %v5736_v45  ;;  %v6152_v41 = vld [vmem:[#allocation34_spill] sm:$0xff] }
 0x325   : > { %v2341_v46 = vadd.f32 %v2333_v59, %v2325_v38  ;;  %v2332_v25 = vmul.f32 %v5684_v20, %v2308_v30  ;;  %v2311_v9 = vadd.f32 %v4734_v56, %v2143_v37  ;;  %v2329_v37 = vadd.f32 %v2321_v13, %v1502_v23 }
 0x326   : > { %v2279_v27 = vpop.f32.mrf.mxu1  ;;  %v2328_v30 = vadd.f32 %v2320_v16, %v1501_v26  ;;  %v2330_v56 = vadd.f32 %v2322_v43, %v1503_v49 }
 0x327   : > { %v2356_v29 = vadd.f32 %v5764_v7, %v2341_v46  ;;  %v2340_v39 = vadd.f32 %v2332_v25, %v2324_v55  ;;  %v2335_v14 = vmul.f32 %v5687_v48, %v2311_v9  ;;  %v2310_v21 = vadd.f32 %v2279_v27, %v2138_v5  ;;  %v6151_v25 = vld [vmem:[#allocation33_spill] sm:$0xff] }
 0x328   : > { %v4737_v54 = vpop.f32.mrf.mxu1 }
 0x329   : > { %v5778_v60 = vadd.f32 %v6149_v58, %v2356_v29  ;;  %v2355_v15 = vadd.f32 %v5764_v7, %v2340_v39  ;;  %v2343_v36 = vadd.f32 %v2335_v14, %v2327_v17  ;;  %v2334_v35 = vmul.f32 %v5690_v22, %v2310_v21 }
 0x32a   : > { %v2313_v32 = vadd.f32 %v4737_v54, %v2153_v28  ;;  %v2289_v38 = vpop.f32.mrf.mxu1 }
 0x32b   : > { %v2397_v59 = vmul.f32 %v5778_v60, %v5778_v60  ;;  %v5786_v50 = vadd.f32 %v6149_v58, %v2355_v15  ;;  %v2358_v31 = vadd.f32 %v5764_v7, %v2343_v36  ;;  %v2342_v63 = vadd.f32 %v2334_v35, %v2326_v1 }
 0x32c   : > { %v2337_v6 = vmul.f32 %v6150_v57, %v2313_v32  ;;  %v2312_v4 = vadd.f32 %v2289_v38, %v2148_v3  ;;  %v4740_v55 = vpop.f32.mrf.mxu1  ;;  %v2376_v18 = vsel %vm512_vm0, %v5778_v60, 0.0 }
 0x32d   : > { %v2396_v23 = vmul.f32 %v5786_v50, %v5786_v50  ;;  %v5794_v2 = vadd.f32 %v6149_v58, %v2358_v31  ;;  %v2375_v5 = vsel %vm512_vm0, %v5786_v50, 0.0  ;;  %v2357_v26 = vadd.f32 %v5764_v7, %v2342_v63 }
 0x32e   : > { %v2345_v46 = vadd.f32 %v2337_v6, %v2329_v37  ;;  %v2336_v9 = vmul.f32 %v6151_v25, %v2312_v4  ;;  %v2299_v8 = vpop.f32.mrf.mxu1  ;;  %v2405_v13 = vsel %vm512_vm0, %v2397_v59, 0.0  ;;  %v2315_v16 = vadd.f32 %v4740_v55, %v2163_v19 }
 0x32f   : > { %v2404_v17 = vsel %vm512_vm0, %v2396_v23, 0.0  ;;  %v5806_v27 = vadd.f32 %v6149_v58, %v2357_v26  ;;  %v2377_v14 = vadd.f32 %v2376_v18, %v2375_v5  ;;  %v2399_v21 = vmul.f32 %v5794_v2, %v5794_v2 }
 0x330   : > { %v2360_v29 = vadd.f32 %v5764_v7, %v2345_v46  ;;  %v2344_v39 = vadd.f32 %v2336_v9, %v2328_v30  ;;  %v2339_v45 = vmul.f32 %v6152_v41, %v2315_v16  ;;  %v2314_v49 = vadd.f32 %v2299_v8, %v2158_v34 }
 0x331   : > { %v2378_v12 = vsel %vm512_vm0, %v5806_v27, 0.0  ;;  %v2398_v43 = vmul.f32 %v5806_v27, %v5806_v27  ;;  %v2406_v54 = vadd.f32 %v2405_v13, %v2404_v17  ;;  %v2380_v3 = vsel %vm512_vm0, %v5794_v2, 0.0 }
 0x332   : > { %v5817_v28 = vadd.f32 %v6149_v58, %v2360_v29  ;;  %v2359_v51 = vadd.f32 %v5764_v7, %v2344_v39  ;;  %v2379_v15 = vadd.f32 %v2378_v12, %v2377_v14  ;;  %v2347_v36 = vadd.f32 %v2339_v45, %v2331_v42 }
 0x333   : > { %v2338_v35 = vmul.f32 %v5711_v24, %v2314_v49  ;;  %v2407_v1 = vsel %vm512_vm0, %v2398_v43, 0.0  ;;  %v2409_v30 = vsel %vm512_vm0, %v2399_v21, 0.0 }
 0x334   : > { %v5825_v32 = vadd.f32 %v6149_v58, %v2359_v51  ;;  %v2408_v37 = vadd.f32 %v2407_v1, %v2406_v54  ;;  %v2381_v38 = vadd.f32 %v2380_v3, %v2379_v15  ;;  %v2362_v59 = vadd.f32 %v5764_v7, %v2347_v36 }
 0x335   : > { %v2346_v31 = vadd.f32 %v2338_v35, %v2330_v56  ;;  %v2401_v40 = vmul.f32 %v5817_v28, %v5817_v28  ;;  %v2384_v56 = vsel %vm512_vm0, %v5817_v28, 0.0 }
 0x336   : > { %v2382_v63 = vsel %vm512_vm0, %v5825_v32, 0.0  ;;  %v2400_v6 = vmul.f32 %v5825_v32, %v5825_v32  ;;  %v2410_v55 = vadd.f32 %v2409_v30, %v2408_v37  ;;  %v5836_v42 = vadd.f32 %v6149_v58, %v2362_v59  ;;  %v2515_v59 = vld [vmem:[%s6076_s5 + $0x10] sm:$0xff]  ;;  %v2513_v30 = vld [vmem:[%s6076_s5] sm:$0xff] }
 0x337   : > { %v2383_v4 = vadd.f32 %v2382_v63, %v2381_v38  ;;  %v2361_v19 = vadd.f32 %v5764_v7, %v2346_v31  ;;  %v2413_v46 = vsel %vm512_vm0, %v2401_v40, 0.0  ;;  %v2516_v38 = vld [vmem:[%s6076_s5 + $0x18] sm:$0xff]  ;;  %v2514_v31 = vld [vmem:[%s6076_s5 + $0x8] sm:$0xff] }
 0x338   : > { %v2411_v23 = vsel %vm512_vm0, %v2400_v6, 0.0  ;;  %v2403_v8 = vmul.f32 %v5836_v42, %v5836_v42  ;;  %v2388_v16 = vsel %vm512_vm0, %v5836_v42, 0.0 }
 0x339   : > { %v2412_v5 = vadd.f32 %v2411_v23, %v2410_v55  ;;  %v5843_v26 = vadd.f32 %v6149_v58, %v2361_v19  ;;  %v2385_v9 = vadd.f32 %v2384_v56, %v2383_v4 }
 0x33a   : > { %v2417_v39 = vsel %vm512_vm0, %v2403_v8, 0.0  ;;  %v2726_v8 = vld [vmem:[#allocation5 + $0x98] sm:$0xff] }
 0x33b   : > { %v2386_v34 = vsel %vm512_vm0, %v5843_v26, 0.0  ;;  %v2402_v7 = vmul.f32 %v5843_v26, %v5843_v26  ;;  %v2414_v18 = vadd.f32 %v2413_v46, %v2412_v5  ;;  %4763 = vmatprep.subr.mxu1 %v2726_v8 }
 0x33c   : > { %v2387_v13 = vadd.f32 %v2386_v34, %v2385_v9  ;;  %v2720_v9 = vld [vmem:[#allocation5 + $0x38] sm:$0xff]  ;;  %v2725_v34 = vld [vmem:[#allocation5 + $0x90] sm:$0xff]  ;;  %4764 = vmatpush3.msra.mxu1 %v2726_v8 }
 0x33d   : > { %v2415_v58 = vsel %vm512_vm0, %v2402_v7, 0.0  ;;  %v2718_v7 = vld [vmem:[#allocation5 + $0x28] sm:$0xff]  ;;  %4765 = vmatprep.subr.mxu1 %v2725_v34 }
 0x33e   : > { %v2389_v17 = vadd.f32 %v2388_v16, %v2387_v13  ;;  %v2416_v29 = vadd.f32 %v2415_v58, %v2414_v18  ;;  %v2724_v18 = vld [vmem:[#allocation5 + $0x88] sm:$0xff]  ;;  %v2717_v13 = vld [vmem:[#allocation5 + $0x20] sm:$0xff]  ;;  %4766 = vmatpush3.msra.mxu1 %v2725_v34 }
 0x33f   : > { %v2723_v16 = vld [vmem:[#allocation5 + $0x80] sm:$0xff]  ;;  %4767 = vmatprep.subr.mxu1 %v2724_v18  ;;  %v2708_v58 = vld [vmem:[#allocation2 + $0x8] sm:$0xff] }
 0x340   : > { %v2390_v14 = vrot.slane %v2389_v17, 4  ;;  %v2418_v21 = vadd.f32 %v2417_v39, %v2416_v29  ;;  %4768 = vmatpush3.msra.mxu1 %v2724_v18  ;;  %v5881_v29 = vld [vmem:[#allocation5 + $0x78] sm:$0xff] }
 0x341   : > { %4769 = vmatprep.subr.mxu1 %v2723_v16 }
 0x342   : > { %v2391_v45 = vadd.f32 %v2390_v14, %v2389_v17  ;;  %v2419_v49 = vrot.slane %v2418_v21, 4  ;;  %v5877_v17 = vld [vmem:[#allocation5 + $0xf8] sm:$0xff]  ;;  %4770 = vmatpush3.msra.mxu1 %v2723_v16  ;;  %v6153_v14 = vld [vmem:[#allocation10_spill] sm:$0xff] }
 0x343   : > { %4803 = vmatprep.subr.mxu1 %v5877_v17 }
 0x344   : > { %v2392_v12 = vrot.slane %v2391_v45, 2  ;;  %v2420_v43 = vadd.f32 %v2419_v49, %v2418_v21 }
 0x346   : > { %v2393_v51 = vadd.f32 %v2392_v12, %v2391_v45  ;;  %v2421_v54 = vrot.slane %v2420_v43, 2  ;;  %v6154_v45 = vld [vmem:[#allocation9_spill] sm:$0xff] }
 0x347   : > { %v6155_v49 = vsub.s32 1, %v6154_v45 }
 0x348   : > { %v2394_v15 = vrot.slane %v2393_v51, 1  ;;  %v2422_v36 = vadd.f32 %v2421_v54, %v2420_v43 }
 0x34a   : > { %v2423_v35 = vrot.slane %v2422_v36, 1  ;;  %v2395_v3 = vadd.f32 %v2394_v15, %v2393_v51 }
 0x34c   : > { %v2424_v1 = vadd.f32 %v2423_v35, %v2422_v36 }
 0x34e   : > { %v2425_v37 = vsel %vm814_vm2, %v2395_v3, %v2424_v1 }
 0x34f   : > { %4750 = vmatmul.mubr.msk.f32.vlgmr.msra.gmra.mxu0 %vm512_vm0, %v2425_v37 }
 0x350   : > { %4760 = vmatprep.mubr.msk.f32.mxu0 %vm5129_vm1, %v6120_v47  ;;  %4753 = vmatpush3.msra.mxu0 %v2516_v38  ;;  %v4200_v38 = vld [vmem:[%s6081_s10] ss:$0 sm:$0xff] }
 0x351   : > { %4754 = vmatprep.subr.mxu0 %v6120_v47 }
 0x352   : > { %4755 = vmatpush3.msra.mxu0 %v2515_v59 }
 0x353   : > { %4756 = vmatprep.subr.mxu0 %v6120_v47 }
 0x354   : > { %4757 = vmatpush3.msra.mxu0 %v2514_v31 }
 0x355   : > { %4758 = vmatprep.subr.mxu0 %v6120_v47  ;;  %v2719_v47 = vld [vmem:[#allocation5 + $0x30] sm:$0xff] }
 0x356   : > { %4759 = vmatpush3.msra.mxu0 %v2513_v30 }
 0x357   : > { %4783 = vmatprep.subr.mxu0 %v2720_v9 }
 0x40f   : > { %v2499_v40 = vpop.f32.mrf.mxu0 }
 0x410   : > { %v2503_v63 = vmul.f32 0.015625, %v2499_v40 }
 0x411   : > { %v4751_v6 = vpop.f32.mrf.mxu0 }
 0x412   : > { %v2504_v4 = vmul.f32 %v2503_v63, %v2503_v63 }
 0x414   : > { %v2506_v55 = vrot.slane %v2504_v4, 7 }
 0x416   : > { %v2508_v19 = vsub.f32 %v2503_v63, %v2506_v55 }
 0x418   : > { %v2509_v23 = vmax.f32 %v2508_v19, 0.0 }
 0x41a   : > { %v2510_v56 = vadd.f32 1e-05, %v2509_v23 }
 0x41c   : > { %5022 = vrsqrt.f32 %v2510_v56 }
 0x429   : > { %v5023_v5 = vpop.eup %5022 }
 0x42a   : > { %v2512_v46 = vsel %vm814_vm2, %v2503_v63, %v5023_v5 }
 0x42b   : > { %4761 = vmatmul.mubr.msk.f32.vlgmr.msra.gmra.mxu0 %vm512_vm0, %v2512_v46 }
 0x42c   : > { %4784 = vmatpush3.msra.mxu0 %v2720_v9  ;;  %4791 = vmatprep.mubr.msk.f32.mxu0 %vm512_vm0, %v2708_v58 }
 0x42d   : > { %4785 = vmatprep.subr.mxu0 %v2719_v47 }
 0x42e   : > { %4786 = vmatpush3.msra.mxu0 %v2719_v47 }
 0x42f   : > { %4787 = vmatprep.subr.mxu0 %v2718_v7 }
 0x430   : > { %4788 = vmatpush3.msra.mxu0 %v2718_v7 }
 0x431   : > { %4789 = vmatprep.subr.mxu0 %v2717_v13 }
 0x432   : > { %4790 = vmatpush3.msra.mxu0 %v2717_v13 }
 0x433   : > { %4823 = vmatprep.subr.mxu0 %v5881_v29 }
 0x4eb   : > { %v2586_v39 = vpop.f32.mrf.mxu0 }
 0x4ec   : > { %v2593_v21 = vrot.slane %v2586_v39, %v6153_v14  ;;  %v2605_v12 = vrot.slane %v2586_v39, %v6155_v49 }
 0x4ed   : > { %v4762_v43 = vpop.f32.mrf.mxu0 }
 0x4ee   : > { %v2594_v51 = vsub.f32 %v5786_v50, %v2593_v21  ;;  %v2595_v54 = vsub.f32 %v5778_v60, %v2593_v21  ;;  %v2596_v15 = vsub.f32 %v5806_v27, %v2593_v21  ;;  %v2597_v36 = vsub.f32 %v5794_v2, %v2593_v21 }
 0x4ef   : > { %v2598_v35 = vsub.f32 %v5825_v32, %v2593_v21  ;;  %v2599_v3 = vsub.f32 %v5817_v28, %v2593_v21  ;;  %v2600_v1 = vsub.f32 %v5843_v26, %v2593_v21  ;;  %v2601_v37 = vsub.f32 %v5836_v42, %v2593_v21  ;;  %v4201_v28 = vld [vmem:[%s6082_s11] ss:$0 sm:$0xff] }
 0x4f0   : > { %v2606_v59 = vmul.f32 %v2605_v12, %v2594_v51  ;;  %v2607_v50 = vmul.f32 %v2605_v12, %v2595_v54  ;;  %v2608_v31 = vmul.f32 %v2605_v12, %v2596_v15  ;;  %v2609_v60 = vmul.f32 %v2605_v12, %v2597_v36 }
 0x4f1   : > { %v2610_v30 = vmul.f32 %v2605_v12, %v2598_v35  ;;  %v2611_v27 = vmul.f32 %v2605_v12, %v2599_v3  ;;  %v2612_v40 = vmul.f32 %v2605_v12, %v2600_v1  ;;  %v2613_v2 = vmul.f32 %v2605_v12, %v2601_v37 }
 0x4f2   : > { %v2621_v32 = vmul.f32 %v4200_v38, %v2606_v59  ;;  %v2622_v26 = vmul.f32 %v4200_v38, %v2607_v50  ;;  %v2623_v63 = vmul.f32 %v4200_v38, %v2608_v31  ;;  %v2624_v42 = vmul.f32 %v4200_v38, %v2609_v60 }
 0x4f3   : > { %v2625_v6 = vmul.f32 %v4200_v38, %v2610_v30  ;;  %v2626_v4 = vmul.f32 %v4200_v38, %v2611_v27  ;;  %v2627_v55 = vmul.f32 %v4200_v38, %v2612_v40  ;;  %v2628_v19 = vmul.f32 %v4200_v38, %v2613_v2 }
 0x4f4   : > { %v2636_v23 = vadd.f32 %v4201_v28, %v2621_v32  ;;  %v2637_v56 = vadd.f32 %v4201_v28, %v2622_v26  ;;  %v2638_v5 = vadd.f32 %v4201_v28, %v2623_v63  ;;  %v2639_v46 = vadd.f32 %v4201_v28, %v2624_v42 }
 0x4f5   : > { %v2640_v9 = vadd.f32 %v4201_v28, %v2625_v6  ;;  %v2641_v8 = vadd.f32 %v4201_v28, %v2626_v4  ;;  %v2642_v34 = vadd.f32 %v4201_v28, %v2627_v55  ;;  %v2643_v13 = vadd.f32 %v4201_v28, %v2628_v19 }
 0x4f6   : > { %v4202_v47 = vmul.f32 -1.442695, %v2636_v23  ;;  %v4203_v7 = vmul.f32 -1.442695, %v2637_v56  ;;  %v4204_v18 = vmul.f32 -1.442695, %v2638_v5 }
 0x4f7   : > { %v4205_v16 = vmul.f32 -1.442695, %v2639_v46  ;;  %v4206_v58 = vmul.f32 -1.442695, %v2640_v9  ;;  %v4207_v39 = vmul.f32 -1.442695, %v2641_v8 }
 0x4f8   : > { %5024 = vpow2.f32 %v4202_v47  ;;  %v4208_v14 = vmul.f32 -1.442695, %v2642_v34  ;;  %v4209_v21 = vmul.f32 -1.442695, %v2643_v13 }
 0x4f9   : > { %5026 = vpow2.f32 %v4203_v7  ;;  %v3130_v7 = vld [vmem:[#allocation5 + $0x70] sm:$0xff] }
 0x4fa   : > { %5028 = vpow2.f32 %v4204_v18 }
 0x4fb   : > { %5030 = vpow2.f32 %v4205_v16 }
 0x4fc   : > { %5032 = vpow2.f32 %v4206_v58  ;;  %v3125_v58 = vld [vmem:[#allocation5 + $0x18] sm:$0xff] }
 0x4fd   : > { %5034 = vpow2.f32 %v4207_v39 }
 0x4fe   : > { %5036 = vpow2.f32 %v4208_v14  ;;  %v3128_v14 = vld [vmem:[#allocation5 + $0x60] sm:$0xff] }
 0x4ff   : > { %5038 = vpow2.f32 %v4209_v21 }
 0x505   : > { %v5025_v45 = vpop.eup %5024 }
 0x506   : > { %v5027_v49 = vpop.eup %5026  ;;  %v2668_v12 = vadd.f32 1.0, %v5025_v45 }
 0x507   : > { %v5029_v43 = vpop.eup %5028  ;;  %v2669_v51 = vadd.f32 1.0, %v5027_v49  ;;  %v3124_v49 = vld [vmem:[#allocation5 + $0x10] sm:$0xff] }
 0x508   : > { %v5031_v54 = vpop.eup %5030  ;;  %v2670_v15 = vadd.f32 1.0, %v5029_v43  ;;  %5040 = vrcp.f32 %v2668_v12  ;;  %v3381_v43 = vld [vmem:[#allocation5 + $0xd8] sm:$0xff] }
 0x509   : > { %v5033_v36 = vpop.eup %5032  ;;  %v2671_v35 = vadd.f32 1.0, %v5031_v54  ;;  %5042 = vrcp.f32 %v2669_v51  ;;  %v3123_v54 = vld [vmem:[#allocation5 + $0x8] sm:$0xff] }
 0x50a   : > { %v5035_v3 = vpop.eup %5034  ;;  %v2672_v1 = vadd.f32 1.0, %v5033_v36  ;;  %5044 = vrcp.f32 %v2670_v15  ;;  %v3380_v36 = vld [vmem:[#allocation5 + $0xd0] sm:$0xff] }
 0x50b   : > { %v5037_v37 = vpop.eup %5036  ;;  %v2673_v38 = vadd.f32 1.0, %v5035_v3  ;;  %5046 = vrcp.f32 %v2671_v35  ;;  %v3122_v3 = vld [vmem:[#allocation5] sm:$0xff] }
 0x50c   : > { %v5039_v59 = vpop.eup %5038  ;;  %v2674_v50 = vadd.f32 1.0, %v5037_v37  ;;  %5048 = vrcp.f32 %v2672_v1  ;;  %v3379_v37 = vld [vmem:[#allocation5 + $0xc8] sm:$0xff] }
 0x50d   : > { %v2675_v31 = vadd.f32 1.0, %v5039_v59  ;;  %5050 = vrcp.f32 %v2673_v38  ;;  %v2971_v38 = vld [vmem:[#allocation2 + $0x50] sm:$0xff] }
 0x50e   : > { %5052 = vrcp.f32 %v2674_v50  ;;  %v3378_v50 = vld [vmem:[#allocation5 + $0xc0] sm:$0xff] }
 0x50f   : > { %5054 = vrcp.f32 %v2675_v31  ;;  %v3114_v31 = vld [vmem:[#allocation2 + $0x7] sm:$0xff] }
 0x515   : > { %v5041_v60 = vpop.eup %5040 }
 0x516   : > { %v5043_v30 = vpop.eup %5042  ;;  %v2692_v27 = vmul.f32 %v5041_v60, %v2636_v23  ;;  %v3537_v60 = vld [vmem:[#allocation5 + $0xb8] sm:$0xff] }
 0x517   : > { %v5045_v40 = vpop.eup %5044  ;;  %v2693_v2 = vmul.f32 %v5043_v30, %v2637_v56  ;;  %v3536_v30 = vld [vmem:[#allocation5 + $0xb0] sm:$0xff] }
 0x518   : > { %v5047_v28 = vpop.eup %5046  ;;  %v2694_v32 = vmul.f32 %v5045_v40, %v2638_v5  ;;  %2700 = vst.msk [vmem:[#allocation2 + $0x10] sm:$0xff] %vm512_vm0, %v2692_v27  ;;  %v3531_v27 = vld [vmem:[#allocation5 + $0x58] sm:$0xff]  ;;  %v3535_v40 = vld [vmem:[#allocation5 + $0xa8] sm:$0xff] }
 0x519   : > { %v5049_v26 = vpop.eup %5048  ;;  %v2695_v63 = vmul.f32 %v5047_v28, %v2639_v46  ;;  %2701 = vst.msk [vmem:[#allocation2 + $0x18] sm:$0xff] %vm512_vm0, %v2693_v2  ;;  %v3530_v2 = vld [vmem:[#allocation5 + $0x50] sm:$0xff]  ;;  %v3534_v28 = vld [vmem:[#allocation5 + $0xa0] sm:$0xff] }
 0x51a   : > { %v5051_v42 = vpop.eup %5050  ;;  %v2696_v6 = vmul.f32 %v5049_v26, %v2640_v9  ;;  %2702 = vst.msk [vmem:[#allocation2 + $0x20] sm:$0xff] %vm512_vm0, %v2694_v32  ;;  %v2975_v9 = vld [vmem:[#allocation5 + $0xf0] sm:$0xff]  ;;  %v3529_v32 = vld [vmem:[#allocation5 + $0x48] sm:$0xff] }
 0x51b   : > { %v5053_v4 = vpop.eup %5052  ;;  %v2697_v55 = vmul.f32 %v5051_v42, %v2641_v8  ;;  %2703 = vst.msk [vmem:[#allocation2 + $0x28] sm:$0xff] %vm512_vm0, %v2695_v63  ;;  %v3528_v63 = vld [vmem:[#allocation5 + $0x40] sm:$0xff] }
 0x51c   : > { %v5055_v19 = vpop.eup %5054  ;;  %v2698_v23 = vmul.f32 %v5053_v4, %v2642_v34  ;;  %2704 = vst.msk [vmem:[#allocation2 + $0x30] sm:$0xff] %vm512_vm0, %v2696_v6  ;;  %v2974_v34 = vld [vmem:[#allocation5 + $0xe8] sm:$0xff]  ;;  %v3787_v6 = vld [vmem:[#allocation5 + $0x118] sm:$0xff] }
 0x51d   : > { %v2699_v56 = vmul.f32 %v5055_v19, %v2643_v13  ;;  %2705 = vst.msk [vmem:[#allocation2 + $0x38] sm:$0xff] %vm512_vm0, %v2697_v55  ;;  %v2973_v13 = vld [vmem:[#allocation5 + $0xe0] sm:$0xff]  ;;  %v3786_v19 = vld [vmem:[#allocation5 + $0x110] sm:$0xff] }
 0x51e   : > { %2706 = vst.msk [vmem:[#allocation2 + $0x40] sm:$0xff] %vm512_vm0, %v2698_v23 }
 0x51f   : > { %2707 = vst.msk [vmem:[#allocation2 + $0x48] sm:$0xff] %vm512_vm0, %v2699_v56  ;;  %v2709_v5 = vld [vmem:[#allocation2 + $0x10] sm:$0xff] }
 0x520   : > { %4771 = vmatprep.mubr.msk.f32.mxu1 %vm512_vm0, %v2709_v5  ;;  %4792 = vmatmul.mubr.msk.f32.vlgmr.msra.gmra.mxu0 %vm512_vm0, %v2709_v5  ;;  %v2710_v46 = vld [vmem:[#allocation2 + $0x18] sm:$0xff]  ;;  %v3115_v21 = vld [vmem:[#allocation2 + $0xf] sm:$0xff] }
 0x521   : > { %4772 = vmatmul.mubr.msk.f32.vlgmr.msra.gmra.mxu1 %vm512_vm0, %v2710_v46  ;;  %4794 = vmatprep.mubr.msk.f32.mxu0 %vm512_vm0, %v2710_v46  ;;  %v2711_v8 = vld [vmem:[#allocation2 + $0x20] sm:$0xff]  ;;  %v3116_v45 = vld [vmem:[#allocation2 + $0x17] sm:$0xff]  ;;  %v3519_v42 = vld [vmem:[#allocation2 + $0x9] sm:$0xff] }
 0x522   : > { %4804 = vmatpush3.msra.mxu1 %v5877_v17  ;;  %4774 = vmatprep.mubr.msk.f32.mxu1 %vm512_vm0, %v2711_v8  ;;  %v2712_v47 = vld [vmem:[#allocation2 + $0x28] sm:$0xff]  ;;  %v3117_v12 = vld [vmem:[#allocation2 + $0x1f] sm:$0xff]  ;;  %v3520_v4 = vld [vmem:[#allocation2 + $0x11] sm:$0xff] }
 0x523   : > { %4805 = vmatprep.subr.mxu1 %v2975_v9  ;;  %4824 = vmatpush3.msra.mxu0 %v5881_v29  ;;  %v2713_v18 = vld [vmem:[#allocation2 + $0x30] sm:$0xff]  ;;  %v3129_v29 = vld [vmem:[#allocation5 + $0x68] sm:$0xff]  ;;  %v3521_v55 = vld [vmem:[#allocation2 + $0x19] sm:$0xff] }
 0x524   : > { %4795 = vmatmul.mubr.msk.f32.gmra.mxu0 %vm512_vm0, %v2711_v8  ;;  %4806 = vmatpush3.msra.mxu1 %v2975_v9  ;;  %v2714_v17 = vld [vmem:[#allocation2 + $0x38] sm:$0xff]  ;;  %v3118_v51 = vld [vmem:[#allocation2 + $0x27] sm:$0xff]  ;;  %v3119_v15 = vld [vmem:[#allocation2 + $0x2f] sm:$0xff] }
 0x525   : > { %4775 = vmatmul.mubr.msk.f32.gmra.mxu1 %vm512_vm0, %v2712_v47  ;;  %4797 = vmatprep.mubr.msk.f32.mxu0 %vm512_vm0, %v2712_v47  ;;  %v2715_v16 = vld [vmem:[#allocation2 + $0x40] sm:$0xff]  ;;  %v3120_v35 = vld [vmem:[#allocation2 + $0x37] sm:$0xff]  ;;  %v3523_v56 = vld [vmem:[#allocation2 + $0x29] sm:$0xff] }
 0x526   : > { %4777 = vmatprep.mubr.msk.f32.mxu1 %vm512_vm0, %v2713_v18  ;;  %4807 = vmatprep.subr.mxu1 %v2974_v34  ;;  %v2721_v39 = vld [vmem:[#allocation2 + $0x48] sm:$0xff]  ;;  %v3121_v1 = vld [vmem:[#allocation2 + $0x3f] sm:$0xff] }
 0x527   : > { %4808 = vmatpush3.msra.mxu1 %v2974_v34  ;;  %4825 = vmatprep.subr.mxu0 %v3130_v7  ;;  %v3126_v59 = vld [vmem:[#allocation2 + $0x47] sm:$0xff]  ;;  %v3376_v26 = vld [vmem:[#allocation2 + $0x4f] sm:$0xff]  ;;  %v3525_v9 = vld [vmem:[#allocation2 + $0x39] sm:$0xff] }
 0x528   : > { %4798 = vmatmul.mubr.msk.f32.gmra.mxu0 %vm512_vm0, %v2713_v18  ;;  %4809 = vmatprep.subr.mxu1 %v2973_v13  ;;  %v3522_v23 = vld [vmem:[#allocation2 + $0x21] sm:$0xff] }
 0x529   : > { %4778 = vmatmul.mubr.msk.f32.gmra.mxu1 %vm512_vm0, %v2714_v17  ;;  %4800 = vmatprep.mubr.msk.f32.mxu0 %vm512_vm0, %v2714_v17  ;;  %v3785_v5 = vld [vmem:[#allocation5 + $0x108] sm:$0xff] }
 0x52a   : > { %4780 = vmatprep.mubr.msk.f32.mxu1 %vm512_vm0, %v2715_v16  ;;  %4826 = vmatpush3.msra.mxu0 %v3130_v7  ;;  %v3526_v34 = vld [vmem:[#allocation2 + $0x41] sm:$0xff]  ;;  %v3782_v7 = vld [vmem:[#allocation2 + $0x51] sm:$0xff] }
 0x52b   : > { %4827 = vmatprep.subr.mxu0 %v3129_v29  ;;  %4810 = vmatpush3.msra.mxu1 %v2973_v13 }
 0x52c   : > { %4801 = vmatmul.mubr.msk.f32.gmra.mxu0 %vm512_vm0, %v2715_v16  ;;  %4843 = vmatprep.subr.mxu1 %v3125_v58 }
 0x52d   : > { %4781 = vmatmul.mubr.msk.f32.gmra.mxu1 %vm512_vm0, %v2721_v39  ;;  %4828 = vmatpush3.msra.mxu0 %v3129_v29 }
 0x52e   : > { %4831 = vmatprep.mubr.msk.f32.mxu0 %vm512_vm0, %v3115_v21  ;;  %4811 = vmatprep.mubr.msk.f32.mxu1 %vm512_vm0, %v2710_v46  ;;  %v3524_v46 = vld [vmem:[#allocation2 + $0x31] sm:$0xff] }
 0x52f   : > { %4829 = vmatprep.subr.mxu0 %v3128_v14 }
 0x530   : > { %4830 = vmatpush3.msra.mxu0 %v3128_v14 }
 0x531   : > { %4832 = vmatmul.mubr.msk.f32.vlgmr.msra.gmra.mxu0 %vm512_vm0, %v3116_v45  ;;  %4812 = vmatmul.mubr.msk.f32.vlgmr.msra.gmra.mxu1 %vm512_vm0, %v2711_v8  ;;  %v3784_v8 = vld [vmem:[#allocation5 + $0x100] sm:$0xff] }
 0x532   : > { %4834 = vmatprep.mubr.msk.f32.mxu0 %vm512_vm0, %v3117_v12  ;;  %4844 = vmatpush3.msra.mxu1 %v3125_v58 }
 0x533   : > { %4814 = vmatprep.mubr.msk.f32.mxu1 %vm512_vm0, %v2712_v47  ;;  %4845 = vmatprep.subr.mxu1 %v3124_v49  ;;  %v3532_v47 = vld [vmem:[#allocation2 + $0x49] sm:$0xff] }
 0x534   : > { %4846 = vmatpush3.msra.mxu1 %v3124_v49  ;;  %4863 = vmatprep.subr.mxu0 %v3381_v43 }
 0x535   : > { %4835 = vmatmul.mubr.msk.f32.gmra.mxu0 %vm512_vm0, %v3118_v51  ;;  %4815 = vmatmul.mubr.msk.f32.gmra.mxu1 %vm512_vm0, %v2713_v18 }
 0x536   : > { %4837 = vmatprep.mubr.msk.f32.mxu0 %vm512_vm0, %v3119_v15  ;;  %4817 = vmatprep.mubr.msk.f32.mxu1 %vm512_vm0, %v2714_v17 }
 0x537   : > { %4847 = vmatprep.subr.mxu1 %v3123_v54  ;;  %4864 = vmatpush3.msra.mxu0 %v3381_v43 }
 0x538   : > { %4848 = vmatpush3.msra.mxu1 %v3123_v54  ;;  %4865 = vmatprep.subr.mxu0 %v3380_v36 }
 0x539   : > { %4838 = vmatmul.mubr.msk.f32.gmra.mxu0 %vm512_vm0, %v3120_v35  ;;  %4818 = vmatmul.mubr.msk.f32.gmra.mxu1 %vm512_vm0, %v2715_v16 }
 0x53a   : > { %4840 = vmatprep.mubr.msk.f32.mxu0 %vm512_vm0, %v3121_v1  ;;  %4820 = vmatprep.mubr.msk.f32.mxu1 %vm512_vm0, %v2721_v39 }
 0x53b   : > { %4866 = vmatpush3.msra.mxu0 %v3380_v36  ;;  %4849 = vmatprep.subr.mxu1 %v3122_v3 }
 0x53c   : > { %4867 = vmatprep.subr.mxu0 %v3379_v37  ;;  %4850 = vmatpush3.msra.mxu1 %v3122_v3 }
 0x53d   : > { %4841 = vmatmul.mubr.msk.f32.gmra.mxu0 %vm512_vm0, %v3126_v59  ;;  %4821 = vmatmul.mubr.msk.f32.gmra.mxu1 %vm512_vm0, %v2971_v38 }
 0x53e   : > { %4868 = vmatpush3.msra.mxu0 %v3379_v37  ;;  %4871 = vmatprep.mubr.msk.f32.mxu0 %vm512_vm0, %v3116_v45 }
 0x53f   : > { %4869 = vmatprep.subr.mxu0 %v3378_v50  ;;  %4851 = vmatprep.mubr.msk.f32.mxu1 %vm512_vm0, %v3114_v31 }
 0x540   : > { %4870 = vmatpush3.msra.mxu0 %v3378_v50  ;;  %4883 = vmatprep.subr.mxu1 %v3537_v60 }
 0x541   : > { %4872 = vmatmul.mubr.msk.f32.vlgmr.msra.gmra.mxu0 %vm512_vm0, %v3117_v12  ;;  %4852 = vmatmul.mubr.msk.f32.vlgmr.msra.gmra.mxu1 %vm512_vm0, %v3115_v21 }
 0x542   : > { %4874 = vmatprep.mubr.msk.f32.mxu0 %vm512_vm0, %v3118_v51  ;;  %4884 = vmatpush3.msra.mxu1 %v3537_v60 }
 0x543   : > { %4854 = vmatprep.mubr.msk.f32.mxu1 %vm512_vm0, %v3116_v45  ;;  %4885 = vmatprep.subr.mxu1 %v3536_v30 }
 0x544   : > { %4886 = vmatpush3.msra.mxu1 %v3536_v30  ;;  %4903 = vmatprep.subr.mxu0 %v3531_v27 }
 0x545   : > { %4875 = vmatmul.mubr.msk.f32.gmra.mxu0 %vm512_vm0, %v3119_v15  ;;  %4855 = vmatmul.mubr.msk.f32.gmra.mxu1 %vm512_vm0, %v3117_v12 }
 0x546   : > { %4877 = vmatprep.mubr.msk.f32.mxu0 %vm512_vm0, %v3120_v35  ;;  %4857 = vmatprep.mubr.msk.f32.mxu1 %vm512_vm0, %v3118_v51 }
 0x547   : > { %4887 = vmatprep.subr.mxu1 %v3535_v40  ;;  %4904 = vmatpush3.msra.mxu0 %v3531_v27 }
 0x548   : > { %4888 = vmatpush3.msra.mxu1 %v3535_v40  ;;  %4905 = vmatprep.subr.mxu0 %v3530_v2 }
 0x549   : > { %4878 = vmatmul.mubr.msk.f32.gmra.mxu0 %vm512_vm0, %v3121_v1  ;;  %4858 = vmatmul.mubr.msk.f32.gmra.mxu1 %vm512_vm0, %v3119_v15 }
 0x54a   : > { %4880 = vmatprep.mubr.msk.f32.mxu0 %vm512_vm0, %v3126_v59  ;;  %4860 = vmatprep.mubr.msk.f32.mxu1 %vm512_vm0, %v3120_v35 }
 0x54b   : > { %4906 = vmatpush3.msra.mxu0 %v3530_v2  ;;  %4889 = vmatprep.subr.mxu1 %v3534_v28 }
 0x54c   : > { %4907 = vmatprep.subr.mxu0 %v3529_v32  ;;  %4890 = vmatpush3.msra.mxu1 %v3534_v28 }
 0x54d   : > { %4881 = vmatmul.mubr.msk.f32.gmra.mxu0 %vm512_vm0, %v3376_v26  ;;  %4861 = vmatmul.mubr.msk.f32.gmra.mxu1 %vm512_vm0, %v3121_v1 }
 0x54e   : > { %4908 = vmatpush3.msra.mxu0 %v3529_v32  ;;  %4911 = vmatprep.mubr.msk.f32.mxu0 %vm512_vm0, %v3519_v42 }
 0x54f   : > { %4891 = vmatprep.mubr.msk.f32.mxu1 %vm512_vm0, %v3520_v4  ;;  %4909 = vmatprep.subr.mxu0 %v3528_v63 }
 0x550   : > { %4910 = vmatpush3.msra.mxu0 %v3528_v63  ;;  %4943 = vmatprep.subr.mxu1 %v3787_v6 }
 0x551   : > { %4912 = vmatmul.mubr.msk.f32.vlgmr.msra.gmra.mxu0 %vm512_vm0, %v3520_v4  ;;  %4892 = vmatmul.mubr.msk.f32.vlgmr.msra.gmra.mxu1 %vm512_vm0, %v3521_v55 }
 0x552   : > { %4914 = vmatprep.mubr.msk.f32.mxu0 %vm512_vm0, %v3521_v55  ;;  %4947 = vmatpush3.msra.mxu1 %v3787_v6 }
 0x553   : > { %4894 = vmatprep.mubr.msk.f32.mxu1 %vm512_vm0, %v3522_v23  ;;  %4944 = vmatprep.subr.mxu1 %v3786_v19 }
 0x554   : > { %4948 = vmatpush3.msra.mxu1 %v3786_v19  ;;  %4923 = vmatprep.subr.mxu0 %v3787_v6 }
 0x555   : > { %4915 = vmatmul.mubr.msk.f32.gmra.mxu0 %vm512_vm0, %v3522_v23  ;;  %4895 = vmatmul.mubr.msk.f32.gmra.mxu1 %vm512_vm0, %v3523_v56 }
 0x556   : > { %4917 = vmatprep.mubr.msk.f32.mxu0 %vm512_vm0, %v3523_v56  ;;  %4897 = vmatprep.mubr.msk.f32.mxu1 %vm512_vm0, %v3524_v46 }
 0x557   : > { %4945 = vmatprep.subr.mxu1 %v3785_v5  ;;  %4924 = vmatpush3.msra.mxu0 %v3787_v6 }
 0x558   : > { %4949 = vmatpush3.msra.mxu1 %v3785_v5  ;;  %4925 = vmatprep.subr.mxu0 %v3786_v19 }
 0x559   : > { %4918 = vmatmul.mubr.msk.f32.gmra.mxu0 %vm512_vm0, %v3524_v46  ;;  %4898 = vmatmul.mubr.msk.f32.gmra.mxu1 %vm512_vm0, %v3525_v9 }
 0x55a   : > { %4920 = vmatprep.mubr.msk.f32.mxu0 %vm512_vm0, %v3525_v9  ;;  %4900 = vmatprep.mubr.msk.f32.mxu1 %vm512_vm0, %v3526_v34 }
 0x55b   : > { %4926 = vmatpush3.msra.mxu0 %v3786_v19  ;;  %4946 = vmatprep.subr.mxu1 %v3784_v8 }
 0x55c   : > { %4927 = vmatprep.subr.mxu0 %v3785_v5  ;;  %4950 = vmatpush3.msra.mxu1 %v3784_v8 }
 0x55d   : > { %4921 = vmatmul.mubr.msk.f32.gmra.mxu0 %vm512_vm0, %v3526_v34  ;;  %4901 = vmatmul.mubr.msk.f32.gmra.mxu1 %vm512_vm0, %v3532_v47 }
 0x55e   : > { %4928 = vmatpush3.msra.mxu0 %v3785_v5  ;;  %4931 = vmatprep.mubr.msk.f32.mxu0 %vm512_vm0, %v3521_v55 }
 0x55f   : > { %4929 = vmatprep.subr.mxu0 %v3784_v8  ;;  %4934 = vmatprep.mubr.msk.f32.mxu1 %vm512_vm0, %v3523_v56 }
 0x560   : > { %4930 = vmatpush3.msra.mxu0 %v3784_v8 }
 0x561   : > { %4932 = vmatmul.mubr.msk.f32.vlgmr.msra.gmra.mxu0 %vm512_vm0, %v3522_v23  ;;  %4935 = vmatmul.mubr.msk.f32.vlgmr.msra.gmra.mxu1 %vm512_vm0, %v3524_v46 }
 0x562   : > { %4937 = vmatprep.mubr.msk.f32.mxu1 %vm512_vm0, %v3525_v9 }
 0x565   : > { %4938 = vmatmul.mubr.msk.f32.gmra.mxu1 %vm512_vm0, %v3526_v34 }
 0x566   : > { %4940 = vmatprep.mubr.msk.f32.mxu1 %vm512_vm0, %v3532_v47 }
 0x569   : > { %4941 = vmatmul.mubr.msk.f32.gmra.mxu1 %vm512_vm0, %v3782_v7 }
 0x5e0   : > { %v5982_v18 = vpop.f32.mrf.mxu0 }
 0x5e1   : > { %v5984_v13 = vpop.f32.mrf.mxu1 }
 0x5e2   : > { %v5986_v17 = vpop.f32.mrf.mxu0 }
 0x5e3   : > { %v2817_v29 = vpop.f32.mrf.mxu1 }
 0x5e4   : > { %v4796_v16 = vpop.f32.mrf.mxu0  ;;  %v2926_v61 = vadd.f32 %v5986_v17, %v2817_v29 }
 0x5e5   : > { %v4776_v58 = vpop.f32.mrf.mxu1 }
 0x5e6   : > { %v2935_v39 = vpop.f32.mrf.mxu0  ;;  %v2941_v33 = vadd.f32 %v4796_v16, %v4776_v58 }
 0x5e7   : > { %v2827_v14 = vpop.f32.mrf.mxu1 }
 0x5e8   : > { %v4799_v21 = vpop.f32.mrf.mxu0 }
 0x5e9   : > { %v4779_v45 = vpop.f32.mrf.mxu1 }
 0x5ea   : > { %v5988_v49 = vpop.f32.mrf.mxu0 }
 0x5eb   : > { %v2837_v12 = vpop.f32.mrf.mxu1 }
 0x5ec   : > { %v4802_v43 = vpop.f32.mrf.mxu0 }
 0x5ed   : > { %v4782_v51 = vpop.f32.mrf.mxu1 }
 0x5ee   : > { %v2955_v54 = vpop.f32.mrf.mxu0 }
 0x5ef   : > { %v2847_v15 = vpop.f32.mrf.mxu1 }
 0x5f1   : > { %v4833_v36 = vpop.f32.mrf.mxu0  ;;  %v4813_v35 = vpop.f32.mrf.mxu1 }
 0x5f3   : > { %v3222_v3 = vpop.f32.mrf.mxu0  ;;  %v5990_v1 = vpop.f32.mrf.mxu1 }
 0x5f4   : > { %6156 = vst [vmem:[#allocation13_spill] sm:$0xff] %v5990_v1  ;;  %v2951_v1 = vadd.f32 %v4799_v21, %v4779_v45  ;;  %v6166_v45 = vld [vmem:[#allocation21_spill] sm:$0xff] }
 0x5f5   : > { %v4836_v37 = vpop.f32.mrf.mxu0  ;;  %v5992_v38 = vpop.f32.mrf.mxu1 }
 0x5f6   : > { %6157 = vst [vmem:[#allocation14_spill] sm:$0xff] %v5992_v38  ;;  %v2936_v38 = vadd.f32 %v2935_v39, %v2827_v14  ;;  %v6165_v14 = vld [vmem:[#allocation20_spill] sm:$0xff] }
 0x5f7   : > { %v3232_v59 = vpop.f32.mrf.mxu0  ;;  %v3077_v50 = vpop.f32.mrf.mxu1 }
 0x5f9   : > { %v4839_v31 = vpop.f32.mrf.mxu0  ;;  %v4819_v60 = vpop.f32.mrf.mxu1 }
 0x5fa   : > { %v3111_v39 = vadd.f32 %v4819_v60, %v2951_v1 }
 0x5fb   : > { %v3242_v30 = vpop.f32.mrf.mxu0  ;;  %v5994_v27 = vpop.f32.mrf.mxu1  ;;  %v6163_v29 = vld [vmem:[#allocation13_spill] sm:$0xff] }
 0x5fc   : > { %6158 = vst [vmem:[#allocation15_spill] sm:$0xff] %v5994_v27  ;;  %v3106_v16 = vadd.f32 %v6163_v29, %v2926_v61  ;;  %v6169_v61 = vld [vmem:[#allocation22_spill] sm:$0xff] }
 0x5fd   : > { %v4842_v40 = vpop.f32.mrf.mxu0  ;;  %v5996_v2 = vpop.f32.mrf.mxu1  ;;  %v6164_v58 = vld [vmem:[#allocation14_spill] sm:$0xff] }
 0x5fe   : > { %6159 = vst [vmem:[#allocation23_spill] sm:$0xff] %v5996_v2 }
 0x5ff   : > { %v3252_v28 = vpop.f32.mrf.mxu0  ;;  %v5998_v32 = vpop.f32.mrf.mxu1 }
 0x600   : > { %6160 = vst [vmem:[#allocation11_spill] sm:$0xff] %v5998_v32 }
 0x601   : > { %v4873_v26 = vpop.f32.mrf.mxu0  ;;  %v4853_v63 = vpop.f32.mrf.mxu1 }
 0x602   : > { %v3336_v57 = vadd.f32 %v4853_v63, %v4833_v36 }
 0x603   : > { %v3472_v42 = vpop.f32.mrf.mxu0  ;;  %v3330_v6 = vpop.f32.mrf.mxu1 }
 0x604   : > { %v3331_v22 = vadd.f32 %v3330_v6, %v3222_v3  ;;  %v3512_v62 = vadd.f32 %v4873_v26, %v3336_v57  ;;  %v2961_v6 = vadd.f32 %v4802_v43, %v4782_v51  ;;  %v6006_v57 = vadd.f32 %v2955_v54, %v2847_v15 }
 0x605   : > { %v4876_v4 = vpop.f32.mrf.mxu0  ;;  %v4856_v55 = vpop.f32.mrf.mxu1 }
 0x606   : > { %v3346_v20 = vadd.f32 %v4856_v55, %v4836_v37  ;;  %v3511_v36 = vadd.f32 %v3472_v42, %v3331_v22  ;;  %v2946_v37 = vadd.f32 %v5988_v49, %v2837_v12  ;;  %v3109_v22 = vadd.f32 %v6164_v58, %v2941_v33  ;;  %v6170_v33 = vld [vmem:[#allocation24_spill] sm:$0xff] }
 0x607   : > { %v3482_v19 = vpop.f32.mrf.mxu0  ;;  %v3340_v23 = vpop.f32.mrf.mxu1 }
 0x608   : > { %v3341_v11 = vadd.f32 %v3340_v23, %v3232_v59  ;;  %v3514_v63 = vadd.f32 %v4876_v4, %v3346_v20  ;;  %v3108_v20 = vadd.f32 %v3077_v50, %v2936_v38  ;;  %v3925_v21 = vmul.f32 %v6165_v14, %v3511_v36  ;;  %v3973_v14 = vld [vmem:[%s5280_s18 + $0x8] sm:$0xff] }
 0x609   : > { %v4879_v56 = vpop.f32.mrf.mxu0  ;;  %v4859_v5 = vpop.f32.mrf.mxu1 }
 0x60a   : > { %v3356_v10 = vadd.f32 %v4859_v5, %v4839_v31  ;;  %v6162_v31 = vld [vmem:[#allocation19_spill] sm:$0xff]  ;;  %v3513_v55 = vadd.f32 %v3482_v19, %v3341_v11  ;;  %v3928_v49 = vmul.f32 %v6166_v45, %v3514_v63  ;;  %v3933_v36 = vadd.f32 %v3925_v21, %v3106_v16  ;;  %v6177_v16 = vld [vmem:[#allocation26_spill] sm:$0xff]  ;;  %v3975_v21 = vld [vmem:[%s5280_s18 + $0x18] sm:$0xff] }
 0x60b   : > { %v3492_v46 = vpop.f32.mrf.mxu0  ;;  %v3350_v9 = vpop.f32.mrf.mxu1  ;;  %v3926_v26 = vmul.f32 %v6162_v31, %v3512_v62  ;;  %v6167_v62 = vld [vmem:[#allocation15_spill] sm:$0xff] }
 0x60c   : > { %v3516_v23 = vadd.f32 %v4879_v56, %v3356_v10  ;;  %v3110_v11 = vadd.f32 %v6167_v62, %v2946_v37  ;;  %v6168_v10 = vld [vmem:[#allocation23_spill] sm:$0xff]  ;;  %v3927_v42 = vmul.f32 %v6169_v61, %v3513_v55  ;;  %v6175_v55 = vld [vmem:[#allocation29_spill] sm:$0xff] }
 0x60d   : > { %v6000_v8 = vpop.f32.mrf.mxu0  ;;  %v4862_v34 = vpop.f32.mrf.mxu1  ;;  %v6015_v15 = vadd.f32 %v6168_v10, %v2961_v6  ;;  %v6174_v6 = vld [vmem:[#allocation25_spill] sm:$0xff] }
 0x60e   : > { %6161 = vst [vmem:[#allocation16_spill] sm:$0xff] %v6000_v8  ;;  %v2931_v8 = vadd.f32 %v5982_v18, %v5984_v13  ;;  %v3351_v18 = vadd.f32 %v3350_v9, %v3242_v30  ;;  %v3366_v12 = vadd.f32 %v4862_v34, %v4842_v40  ;;  %v3930_v38 = vmul.f32 %v6170_v33, %v3516_v23 }
 0x60f   : > { %v3502_v47 = vpop.f32.mrf.mxu0  ;;  %v3360_v7 = vpop.f32.mrf.mxu1  ;;  %v3936_v34 = vadd.f32 %v3928_v49, %v3109_v22  ;;  %v6178_v22 = vld [vmem:[#allocation27_spill] sm:$0xff] }
 0x610   : > { %v3107_v59 = vadd.f32 %v4813_v35, %v2931_v8  ;;  %v3361_v43 = vadd.f32 %v3360_v7, %v3252_v28  ;;  %v3515_v1 = vadd.f32 %v3492_v46, %v3351_v18  ;;  %v6176_v18 = vld [vmem:[#allocation31_spill] sm:$0xff] }
 0x611   : > { %v4913_v24 = vpop.f32.mrf.mxu0  ;;  %v4893_v41 = vpop.f32.mrf.mxu1 }
 0x612   : > { %v3742_v35 = vadd.f32 %v4913_v24, %v4893_v41  ;;  %v3934_v60 = vadd.f32 %v3926_v26, %v3107_v59  ;;  %v3517_v8 = vadd.f32 %v3502_v47, %v3361_v43  ;;  %v6173_v41 = vld [vmem:[#allocation30_spill] sm:$0xff]  ;;  %v3938_v59 = vadd.f32 %v3930_v38, %v3111_v39 }
 0x613   : > { %v3736_v32 = vpop.f32.mrf.mxu0  ;;  %v3628_v25 = vpop.f32.mrf.mxu1 }
 0x614   : > { %v3737_v19 = vadd.f32 %v3736_v32, %v3628_v25  ;;  %v3929_v25 = vmul.f32 %v6174_v6, %v3515_v1  ;;  %v3935_v32 = vadd.f32 %v3927_v42, %v3108_v20 }
 0x615   : > { %v4916_v52 = vpop.f32.mrf.mxu0  ;;  %v4896_v53 = vpop.f32.mrf.mxu1  ;;  %v6171_v5 = vld [vmem:[#allocation16_spill] sm:$0xff] }
 0x616   : > { %v3752_v30 = vadd.f32 %v4916_v52, %v4896_v53  ;;  %v3518_v9 = vadd.f32 %v6171_v5, %v3366_v12  ;;  %v6172_v53 = vld [vmem:[#allocation28_spill] sm:$0xff]  ;;  %v3977_v5 = vld [vmem:[%s5280_s18 + $0x28] sm:$0xff] }
 0x617   : > { %v3746_v44 = vpop.f32.mrf.mxu0  ;;  %v3638_v48 = vpop.f32.mrf.mxu1 }
 0x618   : > { %v3747_v40 = vadd.f32 %v3746_v44, %v3638_v48  ;;  %v4282_v44 = vld [vmem:[%s6084_s13] ss:$0 sm:$0xff]  ;;  %v3932_v58 = vmul.f32 %v6177_v16, %v3518_v9 }
 0x619   : > { %v4919_v2 = vpop.f32.mrf.mxu0  ;;  %v4899_v27 = vpop.f32.mrf.mxu1 }
 0x61a   : > { %v3762_v48 = vadd.f32 %v4919_v2, %v4899_v27  ;;  %v3931_v27 = vmul.f32 %v6178_v22, %v3517_v8 }
 0x61b   : > { %v3756_v0 = vpop.f32.mrf.mxu0  ;;  %v3648_v3 = vpop.f32.mrf.mxu1 }
 0x61c   : > { %v3757_v2 = vadd.f32 %v3756_v0, %v3648_v3  ;;  %v3974_v0 = vld [vmem:[%s5280_s18 + $0x10] sm:$0xff]  ;;  %v6179_v3 = vld [vmem:[#allocation32_spill] sm:$0xff] }
 0x61d   : > { %v4922_v13 = vpop.f32.mrf.mxu0  ;;  %v4902_v17 = vpop.f32.mrf.mxu1 }
 0x61e   : > { %v3772_v62 = vadd.f32 %v4922_v13, %v4902_v17 }
 0x61f   : > { %v3766_v51 = vpop.f32.mrf.mxu0  ;;  %v3658_v54 = vpop.f32.mrf.mxu1 }
 0x620   : > { %v3767_v10 = vadd.f32 %v3766_v51, %v3658_v54  ;;  %v3937_v51 = vadd.f32 %v3929_v25, %v3110_v11  ;;  %v6180_v54 = vld [vmem:[#allocation33_spill] sm:$0xff] }
 0x621   : > { %v4933_v50 = vpop.f32.mrf.mxu0  ;;  %v4936_v4 = vpop.f32.mrf.mxu1 }
 0x622   : > { %v3918_v28 = vadd.f32 %v4933_v50, %v3742_v35  ;;  %v3920_v56 = vadd.f32 %v4936_v4, %v3752_v30  ;;  %v3972_v35 = vld [vmem:[%s5280_s18] sm:$0xff] }
 0x623   : > { %v3878_v7 = vpop.f32.mrf.mxu0  ;;  %v3888_v24 = vpop.f32.mrf.mxu1 }
 0x624   : > { %v3942_v52 = vmul.f32 %v6172_v53, %v3918_v28  ;;  %v3944_v63 = vmul.f32 %v6173_v41, %v3920_v56  ;;  %v3917_v46 = vadd.f32 %v3878_v7, %v3737_v19  ;;  %v3919_v37 = vadd.f32 %v3888_v24, %v3747_v40  ;;  %v6181_v19 = vld [vmem:[#allocation11_spill] sm:$0xff]  ;;  %v6182_v7 = vld [vmem:[#allocation34_spill] sm:$0xff] }
 0x625   : > { %v4939_v47 = vpop.f32.mrf.mxu1  ;;  %v3112_v40 = vadd.f32 %v6181_v19, %v6006_v57  ;;  %v3976_v57 = vld [vmem:[%s5280_s18 + $0x20] sm:$0xff]  ;;  %v6183_v53 = vld [vmem:[#allocation35_spill] sm:$0xff] }
 0x626   : > { %v3950_v31 = vadd.f32 %v3942_v52, %v3934_v60  ;;  %v3952_v26 = vadd.f32 %v3944_v63, %v3936_v34  ;;  %v3941_v23 = vmul.f32 %v6175_v55, %v3917_v46  ;;  %v3943_v29 = vmul.f32 %v6176_v18, %v3919_v37  ;;  %v3979_v37 = vld [vmem:[%s5280_s18 + $0x38] sm:$0xff] }
 0x627   : > { %v3922_v45 = vadd.f32 %v4939_v47, %v3762_v48  ;;  %v3898_v20 = vpop.f32.mrf.mxu1  ;;  %v3940_v34 = vadd.f32 %v3932_v58, %v6015_v15  ;;  %v3939_v24 = vadd.f32 %v3931_v27, %v3112_v40  ;;  %v3978_v48 = vld [vmem:[%s5280_s18 + $0x30] sm:$0xff] }
 0x628   : > { %v3965_v49 = vadd.f32 %v4282_v44, %v3950_v31  ;;  %v3967_v39 = vadd.f32 %v4282_v44, %v3952_v26  ;;  %v3949_v12 = vadd.f32 %v3941_v23, %v3933_v36  ;;  %v3951_v43 = vadd.f32 %v3943_v29, %v3935_v32 }
 0x629   : > { %v3946_v30 = vmul.f32 %v6179_v3, %v3922_v45  ;;  %v3921_v61 = vadd.f32 %v3898_v20, %v3757_v2  ;;  %v4942_v42 = vpop.f32.mrf.mxu1 }
 0x62a   : > { %v3981_v33 = vadd.f32 %v3973_v14, %v3965_v49  ;;  %v3983_v38 = vadd.f32 %v3975_v21, %v3967_v39  ;;  %v3964_v1 = vadd.f32 %v4282_v44, %v3949_v12  ;;  %v3966_v13 = vadd.f32 %v4282_v44, %v3951_v43 }
 0x62b   : > { %v3954_v17 = vadd.f32 %v3946_v30, %v3938_v59  ;;  %v3945_v50 = vmul.f32 %v6180_v54, %v3921_v61  ;;  %v3924_v60 = vadd.f32 %v4942_v42, %v3772_v62  ;;  %v3908_v4 = vpop.f32.mrf.mxu1 }
 0x62c   : > { %3989 = vst.msk [vmem:[%s6037_s17 + $0x8] sm:$0xff] %vm512_vm0, %v3981_v33  ;;  %3991 = vst.msk [vmem:[%s6037_s17 + $0x18] sm:$0xff] %vm512_vm0, %v3983_v38  ;;  %v3980_v28 = vadd.f32 %v3972_v35, %v3964_v1  ;;  %v3982_v56 = vadd.f32 %v3974_v0, %v3966_v13  ;;  %v3923_v9 = vadd.f32 %v3908_v4, %v3767_v10 }
 0x62d   : > { %v3969_v11 = vadd.f32 %v4282_v44, %v3954_v17  ;;  %v3953_v8 = vadd.f32 %v3945_v50, %v3937_v51  ;;  %v3948_v36 = vmul.f32 %v6182_v7, %v3924_v60 }
 0x62e   : > { %3988 = vst.msk [vmem:[%s6037_s17] sm:$0xff] %vm512_vm0, %v3980_v28  ;;  %3990 = vst.msk [vmem:[%s6037_s17 + $0x10] sm:$0xff] %vm512_vm0, %v3982_v56  ;;  %v3947_v52 = vmul.f32 %v6183_v53, %v3923_v9 }
 0x62f   : > { %v3985_v41 = vadd.f32 %v3977_v5, %v3969_v11  ;;  %v3968_v63 = vadd.f32 %v4282_v44, %v3953_v8  ;;  %v3956_v46 = vadd.f32 %v3948_v36, %v3940_v34 }
 0x630   : > { %v3955_v6 = vadd.f32 %v3947_v52, %v3939_v24 }
 0x631   : > { %3993 = vst.msk [vmem:[%s6037_s17 + $0x28] sm:$0xff] %vm512_vm0, %v3985_v41  ;;  %v3984_v15 = vadd.f32 %v3976_v57, %v3968_v63  ;;  %v3971_v25 = vadd.f32 %v4282_v44, %v3956_v46 }
 0x632   : > { %v3970_v32 = vadd.f32 %v4282_v44, %v3955_v6 }
 0x633   : > { %3992 = vst.msk [vmem:[%s6037_s17 + $0x20] sm:$0xff] %vm512_vm0, %v3984_v15  ;;  %v3987_v47 = vadd.f32 %v3979_v37, %v3971_v25 }
 0x634   : > { %v3986_v59 = vadd.f32 %v3978_v48, %v3970_v32 }
 0x635   : > { %3995 = vst.msk [vmem:[%s6037_s17 + $0x38] sm:$0xff] %vm512_vm0, %v3987_v47 }
 0x636   : > { %3994 = vst.msk [vmem:[%s6037_s17 + $0x30] sm:$0xff] %vm512_vm0, %v3986_v59 }
 0x637 PF: > { %s26_s29 = sadd.s32 1, %s5122_s29  }
 0x638   : > { %p23_p2 = scmp.ge.s32.totalorder %s26_s29, 4  }
 0x63a   :  { %25 = sbr.rel (!%p23_p2) target bundleno = 2 (0x2), region = 134 }
 0x63f   :  { %4017 = vsyncpa [#allocation4], 1 }
 0x640   :  { %4019 = vsyncpa [#allocation4 + $0x1], 1 }
 0x641   :  { %4020 = vsyncpa [#allocation6], 1 }

// kernel: tpu_custom_call.1
= control target key start
LH: loop header
LB: loop body
LE: loop exit
PB: predicated region body
PF: predicated region fallthrough
CT: control target
= control target key end

     0   :  { %19 = vsyncpa [#allocation4], 0  ;;  %s6071_s0 = inlined_call_operand.vmem [shape: f32[2,1,64,32], index: 0, kind: input, shape index: {}]   ;;  %s6072_s1 = inlined_call_operand.vmem [shape: f32[2,1,32], index: 1, kind: input, shape index: {}]   ;;  %s6073_s2 = inlined_call_operand.vmem [shape: f32[1,32], index: 2, kind: input, shape index: {}]   ;;  %s6074_s3 = inlined_call_operand.vmem [shape: f32[1,32], index: 3, kind: input, shape index: {}]   ;;  %s6075_s4 = inlined_call_operand.vmem [shape: f32[32,32], index: 4, kind: input, shape index: {}]   ;;  %s6076_s5 = inlined_call_operand.vmem [shape: f32[32,32], index: 5, kind: input, shape index: {}]   ;;  %s6077_s6 = inlined_call_operand.hbm [shape: f32[9,32,32], index: 6, kind: input, shape index: {}]   ;;  %s6078_s7 = inlined_call_operand.vmem [shape: f32[1,32], index: 7, kind: input, shape index: {}]   ;;  %s6079_s8 = inlined_call_operand.vmem [shape: f32[32,32], index: 8, kind: input, shape index: {}]   ;;  %s6080_s9 = inlined_call_operand.vmem [shape: f32[1,32], index: 9, kind: input, shape index: {}]   ;;  %s6081_s10 = inlined_call_operand.vmem [shape: f32[1,32], index: 10, kind: input, shape index: {}]   ;;  %s6082_s11 = inlined_call_operand.vmem [shape: f32[1,32], index: 11, kind: input, shape index: {}]   ;;  %s6083_s12 = inlined_call_operand.hbm [shape: f32[9,32,32], index: 12, kind: input, shape index: {}]   ;;  %s6084_s13 = inlined_call_operand.vmem [shape: f32[1,32], index: 13, kind: input, shape index: {}]   ;;  %s6085_s14 = inlined_call_operand.vmem [shape: f32[2,1,64,32], index: 14, kind: output, shape index: {}]  }
   0x1   :  { %20 = vsyncpa [#allocation6], 0  ;;  %s5205_s29 = smov 0  }
   0x2 LB: > { %s5211_s30 = sadd.s32 4294967295, %s5122_s29   ;;  %p4084_p0 = scmp.ge.s32.totalorder %s5122_s29, 1  ;;  %s5122_s29 = sphi %s5205_s29, %s26_s29  }
   0x3   : > { %p361_p1 = scmp.lt.s32.totalorder %s5122_s29, 3  ;;  %s5124_s15 = smov [#allocation3]  }
   0x4   : > { %s385_s16 = sshll.u32 %s5124_s15, 4  ;;  %p4966_p3 = scmp.eq.s32.totalorder %s5211_s30, 0  ;;  %s386_s16 = int_to_ptr.vmem [resolvable:$true] %s385_s16 }
   0x5   : > { %p5215_p2 = pnand %p4084_p0, %p361_p1  ;;  %s5125_s18 = smov [#allocation5]  }
   0x6   : > { %s413_s19 = sshll.u32 %s5125_s18, 4  ;;  %s5067_s21 = scalar_lea.vmem %s386_s16, 4608  ;;  %s414_s19 = int_to_ptr.vmem [resolvable:$true] %s413_s19 }
   0x7   : > { %p4959_p4 = pneg %p5215_p2  ;;  %p5068_p7 = scmp.ne.s32.totalorder %s386_s16, %s5067_s21 }
   0x8   : > { %p5075_p10 = scmp.lt.s32.totalorder %s386_s16, %s386_s16  ;;  %p5076_p11 = scmp.lt.s32.totalorder %s5067_s21, %s5067_s21 }
   0x9   : > { %p5224_p5 = pnand %p4966_p3, %p4959_p4 }
   0xa   : > { %p5077_p12 = por %p5076_p11, %p5075_p10 }
   0xb   : > { %p5058_p6 = pneg %p5224_p5 }
   0xd   : > { %p5070_p8 = pnand %p5068_p7, %p5058_p6 }
   0xf   : > { %p5071_p9 = pneg %p5070_p8 }
  0x11   : > { %p5078_p13 = pnand %p5077_p12, %p5071_p9 }
  0x13   : > { %5081 = shalt.err (!%p5078_p13)
}
  0x14   : > { %s5126_s22 = smov 128   ;;  %s5127_s23 = smov 8  }
  0x15   : > { %4962 = dma.hbm_to_vmem [thread:$0]  (!%p5224_p5), %s6077_s6, 4608, %s386_s16, [#allocation4], %s5126_s22, %s5126_s22, %s5127_s23  }
  0x16   : > { %s5093_s26 = scalar_lea.vmem %s414_s19, 4608  ;;  %p5101_p7 = scmp.lt.s32.totalorder %s414_s19, %s414_s19 }
  0x17   : > { %p5094_p0 = scmp.ne.s32.totalorder %s414_s19, %s5093_s26  ;;  %p5102_p8 = scmp.lt.s32.totalorder %s5093_s26, %s5093_s26 }
  0x19   : > { %p5096_p1 = pnand %p5094_p0, %p5058_p6  ;;  %p5103_p10 = por %p5102_p8, %p5101_p7 }
  0x1b   : > { %p5097_p4 = pneg %p5096_p1 }
  0x1d   : > { %p5104_p9 = pnand %p5103_p10, %p5097_p4 }
  0x1f   : > { %5107 = shalt.err (!%p5104_p9)
}
  0x20   : > { %4965 = dma.hbm_to_vmem [thread:$0]  (!%p5224_p5), %s6083_s12, 4608, %s414_s19, [#allocation6], %s5126_s22, %s5126_s22, %s5127_s23  }
  0x21   : > { %446 = sbr.rel (%p5215_p2) target bundleno = 1591 (0x637), region = 76 }
  0x26   : > { %5113 = dma.done.wait (%p4966_p3), [#allocation4], 4608  }
  0x27   : > { %5115 = vsyncadd (%p4966_p3), [#allocation4], 4294962688 }
  0x28   : > { %5117 = dma.done.wait (%p4966_p3), [#allocation6], 4608  }
  0x29   : > { %5119 = vsyncadd (%p4966_p3), [#allocation6], 4294962688  ;;  %p499_p6 = scmp.lt.s32.totalorder %s5211_s30, 1  ;;  %vm512_vm0 = vcmask 261120   ;;  %v6087_v0 = vmov 0.0   ;;  %vm5129_vm1 = vmmov 0  }
  0x2a   : > { %4539 = vmatprep.subr.mxu1 %v6087_v0  ;;  %4547 = vmatprep.mubr.msk.f32.mxu1 %vm5129_vm1, %v6087_v0  ;;  %513 = vst.msk [vmem:[#allocation2] sm:$0xff] %vm512_vm0, %v6087_v0  ;;  %514 = vst.msk [vmem:[#allocation2 + $0x8] sm:$0xff] %vm512_vm0, %v6087_v0  ;;  %v819_v1 = vld [vmem:[%s6075_s4 + $0x18] sm:$0xff]  ;;  %v818_v2 = vld [vmem:[%s6075_s4 + $0x10] sm:$0xff]  ;;  %vm814_vm2 = vcmask 1040384  }
  0x2b   : > { %515 = vst.msk [vmem:[#allocation2 + $0x50] sm:$0xff] %vm512_vm0, %v6087_v0  ;;  %516 = vst.msk [vmem:[#allocation2 + $0x58] sm:$0xff] %vm512_vm0, %v6087_v0  ;;  %s6185_s30 = smov (!%p499_p6, %s5211_s30), 1  ;;  %4528 = vmatprep.subr.mxu0 %v6087_v0  ;;  %4536 = vmatprep.mubr.msk.f32.mxu0 %vm5129_vm1, %v6087_v0  ;;  %v817_v5 = vld [vmem:[%s6075_s4 + $0x8] sm:$0xff]  ;;  %v816_v15 = vld [vmem:[%s6075_s4] sm:$0xff] }
  0x2c   : > { %s4285_s15 = sshll.u32 %s6185_s30, 6  ;;  %4540 = vmatpush3.msra.mxu1 %v819_v1  ;;  %s506_s16 = scalar_lea.vmem %s6072_s1, %s6185_s30 }
  0x2d   : > { %s5280_s18 = scalar_lea.vmem %s6071_s0, %s4285_s15  ;;  %4541 = vmatprep.subr.mxu1 %v6087_v0  ;;  %v670_v1 = vld [vmem:[%s506_s16] sm:$0x1]  ;;  %s6037_s17 = scalar_lea.vmem %s6085_s14, %s4285_s15 }
  0x2e   : > { %v5289_v3 = vld [vmem:[%s5280_s18] sm:$0xff]  ;;  %v5292_v4 = vld [vmem:[%s5280_s18 + $0x8] sm:$0xff]  ;;  %v5299_v6 = vld [vmem:[%s5280_s18 + $0x10] sm:$0xff]  ;;  %4542 = vmatpush3.msra.mxu1 %v818_v2  ;;  %v4111_v2 = vmul.f32 -1.442695, %v670_v1 }
  0x2f   : > { %v5302_v7 = vld [vmem:[%s5280_s18 + $0x18] sm:$0xff]  ;;  %v764_v8 = vsel %vm512_vm0, %v5289_v3, 0.0  ;;  %v765_v9 = vsel %vm512_vm0, %v5292_v4, 0.0  ;;  %v785_v10 = vmul.f32 %v5289_v3, %v5289_v3  ;;  %v786_v11 = vmul.f32 %v5292_v4, %v5292_v4  ;;  %v5313_v12 = vld [vmem:[%s5280_s18 + $0x20] sm:$0xff]  ;;  %4543 = vmatprep.subr.mxu1 %v6087_v0  ;;  %v5326_v18 = vld [vmem:[%s5280_s18 + $0x28] sm:$0xff] }
  0x30   : > { %v766_v13 = vadd.f32 %v765_v9, %v764_v8  ;;  %v767_v14 = vsel %vm512_vm0, %v5299_v6, 0.0  ;;  %v769_v16 = vsel %vm512_vm0, %v5302_v7, 0.0  ;;  %v787_v17 = vmul.f32 %v5299_v6, %v5299_v6  ;;  %4544 = vmatpush3.msra.mxu1 %v817_v5  ;;  %v5338_v25 = vld [vmem:[%s5280_s18 + $0x30] sm:$0xff]  ;;  %v5347_v32 = vld [vmem:[%s5280_s18 + $0x38] sm:$0xff] }
  0x31   : > { %v788_v20 = vmul.f32 %v5302_v7, %v5302_v7  ;;  %4545 = vmatprep.subr.mxu1 %v6087_v0  ;;  %v771_v21 = vsel %vm512_vm0, %v5313_v12, 0.0  ;;  %v789_v22 = vmul.f32 %v5313_v12, %v5313_v12  ;;  %v793_v23 = vsel %vm512_vm0, %v785_v10, 0.0  ;;  %v681_v9 = vld [vmem:[%s6079_s8 + $0x18] sm:$0xff]  ;;  %v680_v10 = vld [vmem:[%s6079_s8 + $0x10] sm:$0xff] }
  0x32   : > { %v768_v19 = vadd.f32 %v767_v14, %v766_v13  ;;  %v794_v24 = vsel %vm512_vm0, %v786_v11, 0.0  ;;  %4546 = vmatpush3.msra.mxu1 %v816_v15  ;;  %v796_v28 = vsel %vm512_vm0, %v787_v17, 0.0  ;;  %v773_v29 = vsel %vm512_vm0, %v5326_v18, 0.0  ;;  %4529 = vmatpush3.msra.mxu0 %v681_v9  ;;  %v679_v11 = vld [vmem:[%s6079_s8 + $0x8] sm:$0xff]  ;;  %v678_v14 = vld [vmem:[%s6079_s8] sm:$0xff]  ;;  %v906_v17 = vld [vmem:[%s6076_s5 + $0x10] sm:$0xff] }
  0x33   : > { %v795_v27 = vadd.f32 %v794_v24, %v793_v23  ;;  %v790_v30 = vmul.f32 %v5326_v18, %v5326_v18  ;;  %v798_v31 = vsel %vm512_vm0, %v788_v20, 0.0  ;;  %v775_v35 = vsel %vm512_vm0, %v5338_v25, 0.0  ;;  %4530 = vmatprep.subr.mxu0 %v6087_v0  ;;  %v904_v20 = vld [vmem:[%s6076_s5] sm:$0xff] }
  0x34   : > { %v770_v26 = vadd.f32 %v769_v16, %v768_v19  ;;  %v791_v36 = vmul.f32 %v5338_v25, %v5338_v25  ;;  %v800_v37 = vsel %vm512_vm0, %v789_v22, 0.0  ;;  %v777_v40 = vsel %vm512_vm0, %v5347_v32, 0.0  ;;  %4531 = vmatpush3.msra.mxu0 %v680_v10  ;;  %v907_v16 = vld [vmem:[%s6076_s5 + $0x18] sm:$0xff]  ;;  %v905_v19 = vld [vmem:[%s6076_s5 + $0x8] sm:$0xff] }
  0x35   : > { %v797_v34 = vadd.f32 %v796_v28, %v795_v27  ;;  %v792_v41 = vmul.f32 %v5347_v32, %v5347_v32  ;;  %v802_v42 = vsel %vm512_vm0, %v790_v30, 0.0  ;;  %4984 = vpow2.f32 %v4111_v2  ;;  %4532 = vmatprep.subr.mxu0 %v6087_v0 }
  0x36   : > { %v772_v33 = vadd.f32 %v771_v21, %v770_v26  ;;  %v804_v45 = vsel %vm512_vm0, %v791_v36, 0.0  ;;  %4533 = vmatpush3.msra.mxu0 %v679_v11  ;;  %v1117_v36 = vld [vmem:[#allocation3 + $0x98] sm:$0xff] }
  0x37   : > { %v799_v39 = vadd.f32 %v798_v31, %v797_v34  ;;  %v806_v48 = vsel %vm512_vm0, %v792_v41, 0.0  ;;  %4534 = vmatprep.subr.mxu0 %v6087_v0  ;;  %4561 = vmatprep.subr.mxu1 %v1117_v36  ;;  %v1108_v41 = vld [vmem:[#allocation3 + $0x20] sm:$0xff] }
  0x38   : > { %v774_v38 = vadd.f32 %v773_v29, %v772_v33  ;;  %4535 = vmatpush3.msra.mxu0 %v678_v14 }
  0x39   : > { %v801_v44 = vadd.f32 %v800_v37, %v799_v39  ;;  %4550 = vmatprep.subr.mxu0 %v6087_v0  ;;  %v1116_v37 = vld [vmem:[#allocation3 + $0x90] sm:$0xff]  ;;  %v1109_v39 = vld [vmem:[#allocation3 + $0x28] sm:$0xff] }
  0x3a   : > { %v776_v43 = vadd.f32 %v775_v35, %v774_v38  ;;  %v1111_v35 = vld [vmem:[#allocation3 + $0x38] sm:$0xff]  ;;  %v1110_v38 = vld [vmem:[#allocation3 + $0x30] sm:$0xff] }
  0x3b   : > { %v803_v47 = vadd.f32 %v802_v42, %v801_v44  ;;  %v1114_v42 = vld [vmem:[#allocation3 + $0x80] sm:$0xff]  ;;  %v5405_v44 = vld [vmem:[#allocation3 + $0xf8] sm:$0xff] }
  0x3c   : > { %v778_v46 = vadd.f32 %v777_v40, %v776_v43  ;;  %v1115_v40 = vld [vmem:[#allocation3 + $0x88] sm:$0xff] }
  0x3d   : > { %v805_v50 = vadd.f32 %v804_v45, %v803_v47  ;;  %v1099_v43 = vld [vmem:[#allocation2 + $0x8] sm:$0xff]  ;;  %v5409_v45 = vld [vmem:[#allocation3 + $0x78] sm:$0xff] }
  0x3e   : > { %v779_v49 = vrot.slane %v778_v46, 4 }
  0x3f   : > { %v807_v52 = vadd.f32 %v806_v48, %v805_v50 }
  0x40   : > { %v780_v51 = vadd.f32 %v779_v49, %v778_v46  ;;  %v517_v46 = vlaneseq }
  0x41   : > { %v808_v54 = vrot.slane %v807_v52, 4 }
  0x42   : > { %v781_v53 = vrot.slane %v780_v51, 2  ;;  %v4985_v5 = vpop.eup %4984  ;;  %v5412_v47 = vshrl.u32 %v517_v46, 7 }
  0x43   : > { %v809_v56 = vadd.f32 %v808_v54, %v807_v52  ;;  %v674_v8 = vadd.f32 1.0, %v4985_v5 }
  0x44   : > { %v782_v55 = vadd.f32 %v781_v53, %v780_v51  ;;  %6110 = vst [vmem:[#allocation9_spill] sm:$0xff] %v5412_v47  ;;  %v6086_v48 = vsub.s32 1, %v5412_v47  ;;  %v5416_v49 = vsub.s32 0, %v5412_v47 }
  0x45   : > { %v810_v58 = vrot.slane %v809_v56, 2  ;;  %4986 = vrcp.f32 %v674_v8 }
  0x46   : > { %v783_v57 = vrot.slane %v782_v55, 1  ;;  %6111 = vst [vmem:[#allocation10_spill] sm:$0xff] %v5416_v49 }
  0x47   : > { %v811_v59 = vadd.f32 %v810_v58, %v809_v56 }
  0x48   : > { %v784_v60 = vadd.f32 %v783_v57, %v782_v55 }
  0x49   : > { %v812_v61 = vrot.slane %v811_v59, 1 }
  0x4b   : > { %v813_v62 = vadd.f32 %v812_v61, %v811_v59 }
  0x4d   : > { %v815_v63 = vsel %vm814_vm2, %v784_v60, %v813_v62  ;;  %v4115_v62 = vld [vmem:[%s6073_s2] ss:$0 sm:$0xff] }
  0x4e   : > { %4548 = vmatmul.mubr.msk.f32.vlgmr.msra.gmra.mxu1 %vm512_vm0, %v815_v63 }
  0x4f   : > { %4562 = vmatpush3.msra.mxu1 %v1117_v36 }
  0x50   : > { %4563 = vmatprep.subr.mxu1 %v1116_v37 }
  0x51   : > { %4564 = vmatpush3.msra.mxu1 %v1116_v37 }
  0x52   : > { %v4987_v13 = vpop.eup %4986  ;;  %4565 = vmatprep.subr.mxu1 %v1115_v40 }
  0x53   : > { %v677_v15 = vmul.f32 %v4987_v13, %v670_v1  ;;  %4566 = vmatpush3.msra.mxu1 %v1115_v40 }
  0x54   : > { %4567 = vmatprep.subr.mxu1 %v1114_v42 }
  0x55   : > { %4537 = vmatmul.mubr.msk.f32.vlgmr.msra.gmra.mxu0 %vm512_vm0, %v677_v15  ;;  %4568 = vmatpush3.msra.mxu1 %v1114_v42 }
  0x56   : > { %4558 = vmatprep.mubr.msk.f32.mxu0 %vm5129_vm1, %v6087_v0  ;;  %4551 = vmatpush3.msra.mxu0 %v907_v16 }
  0x57   : > { %4552 = vmatprep.subr.mxu0 %v6087_v0  ;;  %4601 = vmatprep.subr.mxu1 %v5405_v44 }
  0x58   : > { %4553 = vmatpush3.msra.mxu0 %v906_v17 }
  0x59   : > { %4554 = vmatprep.subr.mxu0 %v6087_v0 }
  0x5a   : > { %4555 = vmatpush3.msra.mxu0 %v905_v19 }
  0x5b   : > { %4556 = vmatprep.subr.mxu0 %v6087_v0 }
  0x5c   : > { %4557 = vmatpush3.msra.mxu0 %v904_v20 }
  0x5d   : > { %4581 = vmatprep.subr.mxu0 %v1111_v35 }
 0x10e   : > { %v889_v21 = vpop.f32.mrf.mxu1 }
 0x10f   : > { %v894_v22 = vmul.f32 0.015625, %v889_v21 }
 0x110   : > { %v4549_v23 = vpop.f32.mrf.mxu1 }
 0x111   : > { %v895_v24 = vmul.f32 %v894_v22, %v894_v22 }
 0x113   : > { %v897_v26 = vrot.slane %v895_v24, 7 }
 0x115   : > { %v899_v27 = vsub.f32 %v894_v22, %v897_v26  ;;  %v5403_v33 = vpop.f32.mrf.mxu0 }
 0x117   : > { %v900_v28 = vmax.f32 %v899_v27, 0.0  ;;  %v4538_v34 = vpop.f32.mrf.mxu0 }
 0x119   : > { %v901_v29 = vadd.f32 1e-05, %v900_v28 }
 0x11b   : > { %4988 = vrsqrt.f32 %v901_v29 }
 0x128   : > { %v4989_v30 = vpop.eup %4988 }
 0x129   : > { %v903_v31 = vsel %vm814_vm2, %v894_v22, %v4989_v30 }
 0x12a   : > { %4559 = vmatmul.mubr.msk.f32.vlgmr.msra.gmra.mxu0 %vm512_vm0, %v903_v31 }
 0x12b   : > { %4582 = vmatpush3.msra.mxu0 %v1111_v35  ;;  %4589 = vmatprep.mubr.msk.f32.mxu0 %vm512_vm0, %v1099_v43 }
 0x12c   : > { %4583 = vmatprep.subr.mxu0 %v1110_v38 }
 0x12d   : > { %4584 = vmatpush3.msra.mxu0 %v1110_v38 }
 0x12e   : > { %4585 = vmatprep.subr.mxu0 %v1109_v39 }
 0x12f   : > { %4586 = vmatpush3.msra.mxu0 %v1109_v39 }
 0x130   : > { %4587 = vmatprep.subr.mxu0 %v1108_v41 }
 0x131   : > { %4588 = vmatpush3.msra.mxu0 %v1108_v41 }
 0x132   : > { %4621 = vmatprep.subr.mxu0 %v5409_v45 }
 0x1ea   : > { %v977_v50 = vpop.f32.mrf.mxu0 }
 0x1eb   : > { %v984_v51 = vrot.slane %v977_v50, %v5416_v49  ;;  %v996_v52 = vrot.slane %v977_v50, %v6086_v48 }
 0x1ec   : > { %v4560_v53 = vpop.f32.mrf.mxu0 }
 0x1ed   : > { %v985_v54 = vsub.f32 %v5289_v3, %v984_v51  ;;  %v986_v55 = vsub.f32 %v5292_v4, %v984_v51  ;;  %v987_v56 = vsub.f32 %v5299_v6, %v984_v51  ;;  %v988_v57 = vsub.f32 %v5302_v7, %v984_v51 }
 0x1ee   : > { %v989_v58 = vsub.f32 %v5313_v12, %v984_v51  ;;  %v990_v59 = vsub.f32 %v5326_v18, %v984_v51  ;;  %v991_v60 = vsub.f32 %v5338_v25, %v984_v51  ;;  %v992_v61 = vsub.f32 %v5347_v32, %v984_v51  ;;  %v4116_v12 = vld [vmem:[%s6074_s3] ss:$0 sm:$0xff] }
 0x1ef   : > { %v997_v63 = vmul.f32 %v996_v52, %v985_v54  ;;  %v998_v3 = vmul.f32 %v996_v52, %v986_v55  ;;  %v999_v1 = vmul.f32 %v996_v52, %v987_v56  ;;  %v1000_v4 = vmul.f32 %v996_v52, %v988_v57 }
 0x1f0   : > { %v1001_v2 = vmul.f32 %v996_v52, %v989_v58  ;;  %v1002_v6 = vmul.f32 %v996_v52, %v990_v59  ;;  %v1003_v5 = vmul.f32 %v996_v52, %v991_v60  ;;  %v1004_v7 = vmul.f32 %v996_v52, %v992_v61 }
 0x1f1   : > { %v1012_v18 = vmul.f32 %v4115_v62, %v997_v63  ;;  %v1013_v25 = vmul.f32 %v4115_v62, %v998_v3  ;;  %v1014_v8 = vmul.f32 %v4115_v62, %v999_v1  ;;  %v1015_v32 = vmul.f32 %v4115_v62, %v1000_v4 }
 0x1f2   : > { %v1016_v9 = vmul.f32 %v4115_v62, %v1001_v2  ;;  %v1017_v10 = vmul.f32 %v4115_v62, %v1002_v6  ;;  %v1018_v11 = vmul.f32 %v4115_v62, %v1003_v5  ;;  %v1019_v13 = vmul.f32 %v4115_v62, %v1004_v7 }
 0x1f3   : > { %v1027_v14 = vadd.f32 %v4116_v12, %v1012_v18  ;;  %v1028_v15 = vadd.f32 %v4116_v12, %v1013_v25  ;;  %v1029_v16 = vadd.f32 %v4116_v12, %v1014_v8  ;;  %v1030_v17 = vadd.f32 %v4116_v12, %v1015_v32  ;;  %v1366_v25 = vld [vmem:[#allocation3 + $0xf0] sm:$0xff]  ;;  %v1365_v32 = vld [vmem:[#allocation3 + $0xe8] sm:$0xff] }
 0x1f4   : > { %v1031_v19 = vadd.f32 %v4116_v12, %v1016_v9  ;;  %v1032_v20 = vadd.f32 %v4116_v12, %v1017_v10  ;;  %v1033_v21 = vadd.f32 %v4116_v12, %v1018_v11  ;;  %v1034_v26 = vadd.f32 %v4116_v12, %v1019_v13  ;;  %v1521_v10 = vld [vmem:[#allocation3 + $0x70] sm:$0xff]  ;;  %v1364_v13 = vld [vmem:[#allocation3 + $0xe0] sm:$0xff] }
 0x1f5   : > { %v4117_v22 = vmul.f32 -1.442695, %v1027_v14  ;;  %v4118_v23 = vmul.f32 -1.442695, %v1028_v15  ;;  %v4119_v24 = vmul.f32 -1.442695, %v1029_v16 }
 0x1f6   : > { %v4120_v27 = vmul.f32 -1.442695, %v1030_v17  ;;  %v4121_v28 = vmul.f32 -1.442695, %v1031_v19  ;;  %v4122_v29 = vmul.f32 -1.442695, %v1032_v20 }
 0x1f7   : > { %4990 = vpow2.f32 %v4117_v22  ;;  %v4123_v30 = vmul.f32 -1.442695, %v1033_v21  ;;  %v4124_v31 = vmul.f32 -1.442695, %v1034_v26 }
 0x1f8   : > { %4992 = vpow2.f32 %v4118_v23  ;;  %v1772_v23 = vld [vmem:[#allocation3 + $0xd8] sm:$0xff] }
 0x1f9   : > { %4994 = vpow2.f32 %v4119_v24 }
 0x1fa   : > { %4996 = vpow2.f32 %v4120_v27 }
 0x1fb   : > { %4998 = vpow2.f32 %v4121_v28  ;;  %v1771_v28 = vld [vmem:[#allocation3 + $0xd0] sm:$0xff] }
 0x1fc   : > { %5000 = vpow2.f32 %v4122_v29 }
 0x1fd   : > { %5002 = vpow2.f32 %v4123_v30  ;;  %v1513_v30 = vld [vmem:[#allocation3] sm:$0xff] }
 0x1fe   : > { %5004 = vpow2.f32 %v4124_v31 }
 0x204   : > { %v4991_v34 = vpop.eup %4990 }
 0x205   : > { %v4993_v35 = vpop.eup %4992  ;;  %v1059_v36 = vadd.f32 1.0, %v4991_v34  ;;  %v1770_v34 = vld [vmem:[#allocation3 + $0xc8] sm:$0xff] }
 0x206   : > { %v4995_v37 = vpop.eup %4994  ;;  %v1060_v38 = vadd.f32 1.0, %v4993_v35  ;;  %v1362_v35 = vld [vmem:[#allocation2 + $0x50] sm:$0xff] }
 0x207   : > { %v4997_v39 = vpop.eup %4996  ;;  %v1061_v40 = vadd.f32 1.0, %v4995_v37  ;;  %5006 = vrcp.f32 %v1059_v36  ;;  %v1769_v37 = vld [vmem:[#allocation3 + $0xc0] sm:$0xff] }
 0x208   : > { %v4999_v41 = vpop.eup %4998  ;;  %v1062_v42 = vadd.f32 1.0, %v4997_v39  ;;  %5008 = vrcp.f32 %v1060_v38  ;;  %v1505_v38 = vld [vmem:[#allocation2 + $0x7] sm:$0xff]  ;;  %v1928_v39 = vld [vmem:[#allocation3 + $0xb8] sm:$0xff] }
 0x209   : > { %v5001_v43 = vpop.eup %5000  ;;  %v1063_v46 = vadd.f32 1.0, %v4999_v41  ;;  %5010 = vrcp.f32 %v1061_v40  ;;  %v1927_v40 = vld [vmem:[#allocation3 + $0xb0] sm:$0xff]  ;;  %v1922_v41 = vld [vmem:[#allocation3 + $0x58] sm:$0xff] }
 0x20a   : > { %v5003_v50 = vpop.eup %5002  ;;  %v1064_v51 = vadd.f32 1.0, %v5001_v43  ;;  %5012 = vrcp.f32 %v1062_v42  ;;  %v1926_v42 = vld [vmem:[#allocation3 + $0xa8] sm:$0xff]  ;;  %v1921_v43 = vld [vmem:[#allocation3 + $0x50] sm:$0xff] }
 0x20b   : > { %v5005_v52 = vpop.eup %5004  ;;  %v1065_v53 = vadd.f32 1.0, %v5003_v50  ;;  %5014 = vrcp.f32 %v1063_v46  ;;  %v1925_v46 = vld [vmem:[#allocation3 + $0xa0] sm:$0xff]  ;;  %v1920_v50 = vld [vmem:[#allocation3 + $0x48] sm:$0xff] }
 0x20c   : > { %v1066_v54 = vadd.f32 1.0, %v5005_v52  ;;  %5016 = vrcp.f32 %v1064_v51  ;;  %v1919_v52 = vld [vmem:[#allocation3 + $0x40] sm:$0xff] }
 0x20d   : > { %5018 = vrcp.f32 %v1065_v53 }
 0x20e   : > { %5020 = vrcp.f32 %v1066_v54  ;;  %v2178_v54 = vld [vmem:[#allocation3 + $0x118] sm:$0xff] }
 0x214   : > { %v5007_v55 = vpop.eup %5006 }
 0x215   : > { %v5009_v56 = vpop.eup %5008  ;;  %v1083_v57 = vmul.f32 %v5007_v55, %v1027_v14 }
 0x216   : > { %v5011_v58 = vpop.eup %5010  ;;  %v1084_v59 = vmul.f32 %v5009_v56, %v1028_v15  ;;  %v1516_v15 = vld [vmem:[#allocation3 + $0x18] sm:$0xff] }
 0x217   : > { %v5013_v60 = vpop.eup %5012  ;;  %v1085_v61 = vmul.f32 %v5011_v58, %v1029_v16  ;;  %1091 = vst.msk [vmem:[#allocation2 + $0x10] sm:$0xff] %vm512_vm0, %v1083_v57  ;;  %v2177_v57 = vld [vmem:[#allocation3 + $0x110] sm:$0xff] }
 0x218   : > { %v5015_v62 = vpop.eup %5014  ;;  %v1086_v63 = vmul.f32 %v5013_v60, %v1030_v17  ;;  %1092 = vst.msk [vmem:[#allocation2 + $0x18] sm:$0xff] %vm512_vm0, %v1084_v59  ;;  %v1519_v17 = vld [vmem:[#allocation3 + $0x60] sm:$0xff]  ;;  %v2176_v60 = vld [vmem:[#allocation3 + $0x108] sm:$0xff] }
 0x219   : > { %v5017_v3 = vpop.eup %5016  ;;  %v1087_v1 = vmul.f32 %v5015_v62, %v1031_v19  ;;  %1093 = vst.msk [vmem:[#allocation2 + $0x20] sm:$0xff] %vm512_vm0, %v1085_v61 }
 0x21a   : > { %v5019_v4 = vpop.eup %5018  ;;  %v1088_v2 = vmul.f32 %v5017_v3, %v1032_v20  ;;  %1094 = vst.msk [vmem:[#allocation2 + $0x28] sm:$0xff] %vm512_vm0, %v1086_v63  ;;  %v2175_v63 = vld [vmem:[#allocation3 + $0x100] sm:$0xff] }
 0x21b   : > { %v5021_v6 = vpop.eup %5020  ;;  %v1089_v5 = vmul.f32 %v5019_v4, %v1033_v21  ;;  %1095 = vst.msk [vmem:[#allocation2 + $0x30] sm:$0xff] %vm512_vm0, %v1087_v1  ;;  %v1515_v21 = vld [vmem:[#allocation3 + $0x10] sm:$0xff] }
 0x21c   : > { %v1090_v7 = vmul.f32 %v5021_v6, %v1034_v26  ;;  %1096 = vst.msk [vmem:[#allocation2 + $0x38] sm:$0xff] %vm512_vm0, %v1088_v2  ;;  %v1514_v26 = vld [vmem:[#allocation3 + $0x8] sm:$0xff]  ;;  %v2173_v4 = vld [vmem:[#allocation2 + $0x51] sm:$0xff] }
 0x21d   : > { %1097 = vst.msk [vmem:[#allocation2 + $0x40] sm:$0xff] %vm512_vm0, %v1089_v5  ;;  %v2429_v2 = vld [vmem:[%s6075_s4 + $0x18] sm:$0xff]  ;;  %v2428_v6 = vld [vmem:[%s6075_s4 + $0x10] sm:$0xff]  ;;  %v2427_v5 = vld [vmem:[%s6075_s4 + $0x8] sm:$0xff] }
 0x21e   : > { %1098 = vst.msk [vmem:[#allocation2 + $0x48] sm:$0xff] %vm512_vm0, %v1090_v7  ;;  %v1100_v12 = vld [vmem:[#allocation2 + $0x10] sm:$0xff]  ;;  %v2426_v7 = vld [vmem:[%s6075_s4] sm:$0xff] }
 0x21f   : > { %4569 = vmatprep.mubr.msk.f32.mxu1 %vm512_vm0, %v1100_v12  ;;  %4590 = vmatmul.mubr.msk.f32.vlgmr.msra.gmra.mxu0 %vm512_vm0, %v1100_v12  ;;  %v1101_v18 = vld [vmem:[#allocation2 + $0x18] sm:$0xff]  ;;  %v1506_v19 = vld [vmem:[#allocation2 + $0xf] sm:$0xff] }
 0x220   : > { %4570 = vmatmul.mubr.msk.f32.vlgmr.msra.gmra.mxu1 %vm512_vm0, %v1101_v18  ;;  %4592 = vmatprep.mubr.msk.f32.mxu0 %vm512_vm0, %v1101_v18  ;;  %v1102_v8 = vld [vmem:[#allocation2 + $0x20] sm:$0xff]  ;;  %v1507_v20 = vld [vmem:[#allocation2 + $0x17] sm:$0xff]  ;;  %v1910_v53 = vld [vmem:[#allocation2 + $0x9] sm:$0xff] }
 0x221   : > { %4602 = vmatpush3.msra.mxu1 %v5405_v44  ;;  %4572 = vmatprep.mubr.msk.f32.mxu1 %vm512_vm0, %v1102_v8  ;;  %v1103_v9 = vld [vmem:[#allocation2 + $0x28] sm:$0xff]  ;;  %v1508_v22 = vld [vmem:[#allocation2 + $0x1f] sm:$0xff]  ;;  %v1911_v55 = vld [vmem:[#allocation2 + $0x11] sm:$0xff] }
 0x222   : > { %4603 = vmatprep.subr.mxu1 %v1366_v25  ;;  %4622 = vmatpush3.msra.mxu0 %v5409_v45  ;;  %v1104_v11 = vld [vmem:[#allocation2 + $0x30] sm:$0xff]  ;;  %v1520_v45 = vld [vmem:[#allocation3 + $0x68] sm:$0xff]  ;;  %v1912_v56 = vld [vmem:[#allocation2 + $0x19] sm:$0xff] }
 0x223   : > { %4593 = vmatmul.mubr.msk.f32.gmra.mxu0 %vm512_vm0, %v1102_v8  ;;  %4604 = vmatpush3.msra.mxu1 %v1366_v25  ;;  %v1105_v44 = vld [vmem:[#allocation2 + $0x38] sm:$0xff]  ;;  %v1509_v24 = vld [vmem:[#allocation2 + $0x27] sm:$0xff]  ;;  %v1510_v27 = vld [vmem:[#allocation2 + $0x2f] sm:$0xff] }
 0x224   : > { %4573 = vmatmul.mubr.msk.f32.gmra.mxu1 %vm512_vm0, %v1103_v9  ;;  %4595 = vmatprep.mubr.msk.f32.mxu0 %vm512_vm0, %v1103_v9  ;;  %v1106_v14 = vld [vmem:[#allocation2 + $0x40] sm:$0xff]  ;;  %v1511_v29 = vld [vmem:[#allocation2 + $0x37] sm:$0xff]  ;;  %v1914_v59 = vld [vmem:[#allocation2 + $0x29] sm:$0xff] }
 0x225   : > { %4575 = vmatprep.mubr.msk.f32.mxu1 %vm512_vm0, %v1104_v11  ;;  %4605 = vmatprep.subr.mxu1 %v1365_v32  ;;  %v1112_v16 = vld [vmem:[#allocation2 + $0x48] sm:$0xff]  ;;  %v1512_v31 = vld [vmem:[#allocation2 + $0x3f] sm:$0xff]  ;;  %v1915_v61 = vld [vmem:[#allocation2 + $0x31] sm:$0xff] }
 0x226   : > { %4606 = vmatpush3.msra.mxu1 %v1365_v32  ;;  %4623 = vmatprep.subr.mxu0 %v1521_v10  ;;  %v1517_v36 = vld [vmem:[#allocation2 + $0x47] sm:$0xff]  ;;  %v1767_v51 = vld [vmem:[#allocation2 + $0x4f] sm:$0xff]  ;;  %v1916_v62 = vld [vmem:[#allocation2 + $0x39] sm:$0xff] }
 0x227   : > { %4596 = vmatmul.mubr.msk.f32.gmra.mxu0 %vm512_vm0, %v1104_v11  ;;  %4607 = vmatprep.subr.mxu1 %v1364_v13  ;;  %v1913_v58 = vld [vmem:[#allocation2 + $0x21] sm:$0xff]  ;;  %v1923_v1 = vld [vmem:[#allocation2 + $0x49] sm:$0xff] }
 0x228   : > { %4576 = vmatmul.mubr.msk.f32.gmra.mxu1 %vm512_vm0, %v1105_v44  ;;  %4598 = vmatprep.mubr.msk.f32.mxu0 %vm512_vm0, %v1105_v44  ;;  %v1917_v3 = vld [vmem:[#allocation2 + $0x41] sm:$0xff] }
 0x229   : > { %4578 = vmatprep.mubr.msk.f32.mxu1 %vm512_vm0, %v1106_v14  ;;  %4624 = vmatpush3.msra.mxu0 %v1521_v10 }
 0x22a   : > { %4625 = vmatprep.subr.mxu0 %v1520_v45  ;;  %4608 = vmatpush3.msra.mxu1 %v1364_v13 }
 0x22b   : > { %4599 = vmatmul.mubr.msk.f32.gmra.mxu0 %vm512_vm0, %v1106_v14  ;;  %4641 = vmatprep.subr.mxu1 %v1516_v15 }
 0x22c   : > { %4579 = vmatmul.mubr.msk.f32.gmra.mxu1 %vm512_vm0, %v1112_v16  ;;  %4626 = vmatpush3.msra.mxu0 %v1520_v45 }
 0x22d   : > { %4629 = vmatprep.mubr.msk.f32.mxu0 %vm512_vm0, %v1506_v19  ;;  %4609 = vmatprep.mubr.msk.f32.mxu1 %vm512_vm0, %v1101_v18 }
 0x22e   : > { %4627 = vmatprep.subr.mxu0 %v1519_v17 }
 0x22f   : > { %4628 = vmatpush3.msra.mxu0 %v1519_v17 }
 0x230   : > { %4630 = vmatmul.mubr.msk.f32.vlgmr.msra.gmra.mxu0 %vm512_vm0, %v1507_v20  ;;  %4610 = vmatmul.mubr.msk.f32.vlgmr.msra.gmra.mxu1 %vm512_vm0, %v1102_v8 }
 0x231   : > { %4632 = vmatprep.mubr.msk.f32.mxu0 %vm512_vm0, %v1508_v22  ;;  %4642 = vmatpush3.msra.mxu1 %v1516_v15 }
 0x232   : > { %4612 = vmatprep.mubr.msk.f32.mxu1 %vm512_vm0, %v1103_v9  ;;  %4643 = vmatprep.subr.mxu1 %v1515_v21 }
 0x233   : > { %4644 = vmatpush3.msra.mxu1 %v1515_v21  ;;  %4661 = vmatprep.subr.mxu0 %v1772_v23 }
 0x234   : > { %4633 = vmatmul.mubr.msk.f32.gmra.mxu0 %vm512_vm0, %v1509_v24  ;;  %4613 = vmatmul.mubr.msk.f32.gmra.mxu1 %vm512_vm0, %v1104_v11 }
 0x235   : > { %4635 = vmatprep.mubr.msk.f32.mxu0 %vm512_vm0, %v1510_v27  ;;  %4615 = vmatprep.mubr.msk.f32.mxu1 %vm512_vm0, %v1105_v44 }
 0x236   : > { %4645 = vmatprep.subr.mxu1 %v1514_v26  ;;  %4662 = vmatpush3.msra.mxu0 %v1772_v23 }
 0x237   : > { %4646 = vmatpush3.msra.mxu1 %v1514_v26  ;;  %4663 = vmatprep.subr.mxu0 %v1771_v28 }
 0x238   : > { %4636 = vmatmul.mubr.msk.f32.gmra.mxu0 %vm512_vm0, %v1511_v29  ;;  %4616 = vmatmul.mubr.msk.f32.gmra.mxu1 %vm512_vm0, %v1106_v14 }
 0x239   : > { %4638 = vmatprep.mubr.msk.f32.mxu0 %vm512_vm0, %v1512_v31  ;;  %4618 = vmatprep.mubr.msk.f32.mxu1 %vm512_vm0, %v1112_v16 }
 0x23a   : > { %4664 = vmatpush3.msra.mxu0 %v1771_v28  ;;  %4647 = vmatprep.subr.mxu1 %v1513_v30 }
 0x23b   : > { %4665 = vmatprep.subr.mxu0 %v1770_v34  ;;  %4648 = vmatpush3.msra.mxu1 %v1513_v30 }
 0x23c   : > { %4639 = vmatmul.mubr.msk.f32.gmra.mxu0 %vm512_vm0, %v1517_v36  ;;  %4619 = vmatmul.mubr.msk.f32.gmra.mxu1 %vm512_vm0, %v1362_v35 }
 0x23d   : > { %4666 = vmatpush3.msra.mxu0 %v1770_v34  ;;  %4669 = vmatprep.mubr.msk.f32.mxu0 %vm512_vm0, %v1507_v20 }
 0x23e   : > { %4667 = vmatprep.subr.mxu0 %v1769_v37  ;;  %4649 = vmatprep.mubr.msk.f32.mxu1 %vm512_vm0, %v1505_v38 }
 0x23f   : > { %4668 = vmatpush3.msra.mxu0 %v1769_v37  ;;  %4681 = vmatprep.subr.mxu1 %v1928_v39 }
 0x240   : > { %4670 = vmatmul.mubr.msk.f32.vlgmr.msra.gmra.mxu0 %vm512_vm0, %v1508_v22  ;;  %4650 = vmatmul.mubr.msk.f32.vlgmr.msra.gmra.mxu1 %vm512_vm0, %v1506_v19 }
 0x241   : > { %4672 = vmatprep.mubr.msk.f32.mxu0 %vm512_vm0, %v1509_v24  ;;  %4682 = vmatpush3.msra.mxu1 %v1928_v39 }
 0x242   : > { %4652 = vmatprep.mubr.msk.f32.mxu1 %vm512_vm0, %v1507_v20  ;;  %4683 = vmatprep.subr.mxu1 %v1927_v40 }
 0x243   : > { %4684 = vmatpush3.msra.mxu1 %v1927_v40  ;;  %4701 = vmatprep.subr.mxu0 %v1922_v41 }
 0x244   : > { %4673 = vmatmul.mubr.msk.f32.gmra.mxu0 %vm512_vm0, %v1510_v27  ;;  %4653 = vmatmul.mubr.msk.f32.gmra.mxu1 %vm512_vm0, %v1508_v22 }
 0x245   : > { %4675 = vmatprep.mubr.msk.f32.mxu0 %vm512_vm0, %v1511_v29  ;;  %4655 = vmatprep.mubr.msk.f32.mxu1 %vm512_vm0, %v1509_v24 }
 0x246   : > { %4685 = vmatprep.subr.mxu1 %v1926_v42  ;;  %4702 = vmatpush3.msra.mxu0 %v1922_v41 }
 0x247   : > { %4686 = vmatpush3.msra.mxu1 %v1926_v42  ;;  %4703 = vmatprep.subr.mxu0 %v1921_v43 }
 0x248   : > { %4676 = vmatmul.mubr.msk.f32.gmra.mxu0 %vm512_vm0, %v1512_v31  ;;  %4656 = vmatmul.mubr.msk.f32.gmra.mxu1 %vm512_vm0, %v1510_v27 }
 0x249   : > { %4678 = vmatprep.mubr.msk.f32.mxu0 %vm512_vm0, %v1517_v36  ;;  %4658 = vmatprep.mubr.msk.f32.mxu1 %vm512_vm0, %v1511_v29 }
 0x24a   : > { %4704 = vmatpush3.msra.mxu0 %v1921_v43  ;;  %4687 = vmatprep.subr.mxu1 %v1925_v46 }
 0x24b   : > { %4705 = vmatprep.subr.mxu0 %v1920_v50  ;;  %4688 = vmatpush3.msra.mxu1 %v1925_v46 }
 0x24c   : > { %4679 = vmatmul.mubr.msk.f32.gmra.mxu0 %vm512_vm0, %v1767_v51  ;;  %4659 = vmatmul.mubr.msk.f32.gmra.mxu1 %vm512_vm0, %v1512_v31 }
 0x24d   : > { %4706 = vmatpush3.msra.mxu0 %v1920_v50  ;;  %4709 = vmatprep.mubr.msk.f32.mxu0 %vm512_vm0, %v1910_v53 }
 0x24e   : > { %4689 = vmatprep.mubr.msk.f32.mxu1 %vm512_vm0, %v1911_v55  ;;  %4707 = vmatprep.subr.mxu0 %v1919_v52 }
 0x24f   : > { %4708 = vmatpush3.msra.mxu0 %v1919_v52  ;;  %4721 = vmatprep.subr.mxu1 %v2178_v54  ;;  %v519_v52 = vadd.s32 8, %v5412_v47 }
 0x250   : > { %4710 = vmatmul.mubr.msk.f32.vlgmr.msra.gmra.mxu0 %vm512_vm0, %v1911_v55  ;;  %4690 = vmatmul.mubr.msk.f32.vlgmr.msra.gmra.mxu1 %vm512_vm0, %v1912_v56  ;;  %v521_v55 = vadd.s32 24, %v5412_v47 }
 0x251   : > { %4712 = vmatprep.mubr.msk.f32.mxu0 %vm512_vm0, %v1912_v56  ;;  %4722 = vmatpush3.msra.mxu1 %v2178_v54 }
 0x252   : > { %4692 = vmatprep.mubr.msk.f32.mxu1 %vm512_vm0, %v1913_v58  ;;  %4723 = vmatprep.subr.mxu1 %v2177_v57 }
 0x253   : > { %4724 = vmatpush3.msra.mxu1 %v2177_v57  ;;  %4741 = vmatprep.subr.mxu0 %v6087_v0  ;;  %v523_v57 = vadd.s32 40, %v5412_v47 }
 0x254   : > { %4713 = vmatmul.mubr.msk.f32.gmra.mxu0 %vm512_vm0, %v1913_v58  ;;  %4693 = vmatmul.mubr.msk.f32.gmra.mxu1 %vm512_vm0, %v1914_v59 }
 0x255   : > { %4715 = vmatprep.mubr.msk.f32.mxu0 %vm512_vm0, %v1914_v59  ;;  %4695 = vmatprep.mubr.msk.f32.mxu1 %vm512_vm0, %v1915_v61 }
 0x256   : > { %4725 = vmatprep.subr.mxu1 %v2176_v60  ;;  %4742 = vmatpush3.msra.mxu0 %v2429_v2 }
 0x257   : > { %4726 = vmatpush3.msra.mxu1 %v2176_v60  ;;  %4743 = vmatprep.subr.mxu0 %v6087_v0 }
 0x258   : > { %4716 = vmatmul.mubr.msk.f32.gmra.mxu0 %vm512_vm0, %v1915_v61  ;;  %4696 = vmatmul.mubr.msk.f32.gmra.mxu1 %vm512_vm0, %v1916_v62 }
 0x259   : > { %4718 = vmatprep.mubr.msk.f32.mxu0 %vm512_vm0, %v1916_v62  ;;  %4698 = vmatprep.mubr.msk.f32.mxu1 %vm512_vm0, %v1917_v3 }
 0x25a   : > { %4727 = vmatprep.subr.mxu1 %v2175_v63  ;;  %4744 = vmatpush3.msra.mxu0 %v2428_v6  ;;  %v525_v6 = vadd.s32 56, %v5412_v47 }
 0x25b   : > { %4728 = vmatpush3.msra.mxu1 %v2175_v63  ;;  %4745 = vmatprep.subr.mxu0 %v6087_v0  ;;  %v530_v63 = vand.u32 7, %v5412_v47 }
 0x25c   : > { %4719 = vmatmul.mubr.msk.f32.gmra.mxu0 %vm512_vm0, %v1917_v3  ;;  %4699 = vmatmul.mubr.msk.f32.gmra.mxu1 %vm512_vm0, %v1923_v1 }
 0x25d   : > { %4729 = vmatprep.mubr.msk.f32.mxu1 %vm512_vm0, %v1912_v56  ;;  %4749 = vmatprep.mubr.msk.f32.mxu0 %vm5129_vm1, %v6087_v0  ;;  %v520_v56 = vadd.s32 16, %v5412_v47  ;;  %vm622_vm4 = vcmp.gt.s32.totalorder %v530_v63, 0  ;;  %vm646_vm12 = vcmp.lt.s32.totalorder %v530_v63, 7 }
 0x25e   : > { %4746 = vmatpush3.msra.mxu0 %v2427_v5  ;;  %v524_v5 = vadd.s32 48, %v5412_v47 }
 0x25f   : > { %4747 = vmatprep.subr.mxu0 %v6087_v0  ;;  %v544_v2 = vand.u32 7, %v520_v56 }
 0x260   : > { %4730 = vmatmul.mubr.msk.f32.vlgmr.msra.gmra.mxu1 %vm512_vm0, %v1913_v58  ;;  %4748 = vmatpush3.msra.mxu0 %v2426_v7  ;;  %v565_v7 = vand.u32 7, %v523_v57  ;;  %v572_v56 = vand.u32 7, %v524_v5 }
 0x261   : > { %4732 = vmatprep.mubr.msk.f32.mxu1 %vm512_vm0, %v1914_v59  ;;  %4752 = vmatprep.subr.mxu0 %v6087_v0  ;;  %v522_v59 = vadd.s32 32, %v5412_v47  ;;  %vm624_vm6 = vcmp.gt.s32.totalorder %v544_v2, 0  ;;  %v6120_v47 = vmov 0.0   ;;  %vm648_vm14 = vcmp.lt.s32.totalorder %v544_v2, 7 }
 0x262   : > { %vm627_vm7 = vcmp.gt.s32.totalorder %v565_v7, 0  ;;  %vm628_vm10 = vcmp.gt.s32.totalorder %v572_v56, 0  ;;  %vm651_vm15 = vcmp.lt.s32.totalorder %v565_v7, 7 }
 0x263   : > { %v558_v48 = vand.u32 7, %v522_v59  ;;  %v5697_v63 = vsel %vm651_vm15, 1.0, %v6120_v47 }
 0x264   : > { %4733 = vmatmul.mubr.msk.f32.gmra.mxu1 %vm512_vm0, %v1915_v61  ;;  %v682_v61 = vld [vmem:[%s6080_s9] sm:$0x1]  ;;  %6134 = vst [vmem:[#allocation32_spill] sm:$0xff] %v5697_v63 }
 0x265   : > { %4735 = vmatprep.mubr.msk.f32.mxu1 %vm512_vm0, %v1916_v62  ;;  %v537_v62 = vand.u32 7, %v519_v52  ;;  %v753_v52 = vadd.f32 %v5403_v33, %v682_v61  ;;  %vm626_vm8 = vcmp.gt.s32.totalorder %v558_v48, 0  ;;  %v5652_v33 = vsel %vm622_vm4, 1.0, %v6120_v47 }
 0x266   : > { %6122 = vst [vmem:[#allocation20_spill] sm:$0xff] %v5652_v33 }
 0x267   : > { %vm623_vm3 = vcmp.gt.s32.totalorder %v537_v62, 0  ;;  %v5646_v59 = vrot.slane %v753_v52, %v5416_v49  ;;  %v5666_v52 = vsel %vm626_vm8, 1.0, %v6120_v47  ;;  %vm647_vm11 = vcmp.lt.s32.totalorder %v537_v62, 7 }
 0x268   : > { %4736 = vmatmul.mubr.msk.f32.gmra.mxu1 %vm512_vm0, %v1917_v3  ;;  %6127 = vst [vmem:[#allocation25_spill] sm:$0xff] %v5666_v52  ;;  %v5676_v52 = vsel %vm628_vm10, 1.0, %v6120_v47  ;;  %v5681_v62 = vsel %vm647_vm11, 1.0, %v6120_v47 }
 0x269   : > { %4738 = vmatprep.mubr.msk.f32.mxu1 %vm512_vm0, %v1923_v1  ;;  %6119 = vst [vmem:[#allocation18_spill] sm:$0xff] %v5646_v59  ;;  %6129 = vst [vmem:[#allocation27_spill] sm:$0xff] %v5676_v52 }
 0x26a   : > { %6130 = vst [vmem:[#allocation28_spill] sm:$0xff] %v5681_v62 }
 0x26c   : > { %4739 = vmatmul.mubr.msk.f32.gmra.mxu1 %vm512_vm0, %v2173_v4  ;;  %v551_v4 = vand.u32 7, %v521_v55  ;;  %v579_v55 = vand.u32 7, %v525_v6 }
 0x26e   : > { %vm625_vm5 = vcmp.gt.s32.totalorder %v551_v4, 0  ;;  %vm629_vm9 = vcmp.gt.s32.totalorder %v579_v55, 0  ;;  %vm649_vm13 = vcmp.lt.s32.totalorder %v551_v4, 7  ;;  %vm653_vm4 = vcmp.lt.s32.totalorder %v579_v55, 7 }
 0x26f   : > { %v5655_v61 = vsel %vm625_vm5, 1.0, %v6120_v47  ;;  %vm652_vm5 = vcmp.lt.s32.totalorder %v572_v56, 7  ;;  %v5703_v2 = vsel %vm653_vm4, 1.0, %v6120_v47 }
 0x270   : > { %6123 = vst [vmem:[#allocation21_spill] sm:$0xff] %v5655_v61  ;;  %6136 = vst [vmem:[#allocation34_spill] sm:$0xff] %v5703_v2 }
 0x2df   : > { %v5535_v12 = vpop.f32.mrf.mxu0 }
 0x2e0   : > { %v5537_v18 = vpop.f32.mrf.mxu1 }
 0x2e1   : > { %v5539_v25 = vpop.f32.mrf.mxu0  ;;  %v1322_v7 = vadd.f32 %v5535_v12, %v5537_v18 }
 0x2e2   : > { %v5541_v8 = vpop.f32.mrf.mxu1 }
 0x2e3   : > { %v5543_v32 = vpop.f32.mrf.mxu0  ;;  %v1317_v55 = vadd.f32 %v5539_v25, %v5541_v8 }
 0x2e4   : > { %v5545_v9 = vpop.f32.mrf.mxu1 }
 0x2e5   : > { %v5547_v10 = vpop.f32.mrf.mxu0 }
 0x2e6   : > { %v5549_v11 = vpop.f32.mrf.mxu1 }
 0x2e7   : > { %v5551_v13 = vpop.f32.mrf.mxu0 }
 0x2e8   : > { %v5553_v44 = vpop.f32.mrf.mxu1 }
 0x2e9   : > { %v5555_v45 = vpop.f32.mrf.mxu0  ;;  %v1342_v2 = vadd.f32 %v5551_v13, %v5553_v44 }
 0x2ea   : > { %v5557_v14 = vpop.f32.mrf.mxu1 }
 0x2eb   : > { %v5559_v15 = vpop.f32.mrf.mxu0  ;;  %v1337_v25 = vadd.f32 %v5555_v45, %v5557_v14 }
 0x2ec   : > { %v5561_v16 = vpop.f32.mrf.mxu1 }
 0x2ed   : > { %v5563_v17 = vpop.f32.mrf.mxu0  ;;  %v1352_v8 = vadd.f32 %v5559_v15, %v5561_v16 }
 0x2ee   : > { %v5565_v19 = vpop.f32.mrf.mxu1 }
 0x2f0   : > { %v5567_v20 = vpop.f32.mrf.mxu0  ;;  %v5569_v21 = vpop.f32.mrf.mxu1 }
 0x2f2   : > { %v5571_v22 = vpop.f32.mrf.mxu0  ;;  %v5573_v23 = vpop.f32.mrf.mxu1 }
 0x2f3   : > { %v1497_v14 = vadd.f32 %v5573_v23, %v1317_v55 }
 0x2f4   : > { %v5575_v24 = vpop.f32.mrf.mxu0  ;;  %v5577_v26 = vpop.f32.mrf.mxu1 }
 0x2f6   : > { %v5579_v27 = vpop.f32.mrf.mxu0  ;;  %v5581_v28 = vpop.f32.mrf.mxu1 }
 0x2f8   : > { %v5583_v29 = vpop.f32.mrf.mxu0  ;;  %v5585_v30 = vpop.f32.mrf.mxu1 }
 0x2f9   : > { %v1502_v23 = vadd.f32 %v5585_v30, %v1342_v2 }
 0x2fa   : > { %v5587_v31 = vpop.f32.mrf.mxu0  ;;  %v5589_v34 = vpop.f32.mrf.mxu1 }
 0x2fc   : > { %v5591_v35 = vpop.f32.mrf.mxu0  ;;  %v5593_v36 = vpop.f32.mrf.mxu1 }
 0x2fd   : > { %6112 = vst [vmem:[#allocation11_spill] sm:$0xff] %v5593_v36 }
 0x2fe   : > { %v5595_v37 = vpop.f32.mrf.mxu0  ;;  %v5597_v38 = vpop.f32.mrf.mxu1 }
 0x2ff   : > { %6113 = vst [vmem:[#allocation12_spill] sm:$0xff] %v5597_v38 }
 0x300   : > { %v5599_v39 = vpop.f32.mrf.mxu0  ;;  %v4651_v40 = vpop.f32.mrf.mxu1 }
 0x301   : > { %v1727_v59 = vadd.f32 %v4651_v40, %v5567_v20  ;;  %v5684_v20 = vsel %vm646_vm12, 1.0, %v6120_v47 }
 0x302   : > { %v5601_v41 = vpop.f32.mrf.mxu0  ;;  %v1721_v42 = vpop.f32.mrf.mxu1  ;;  %6131 = vst [vmem:[#allocation29_spill] sm:$0xff] %v5684_v20 }
 0x303   : > { %v1903_v56 = vadd.f32 %v5599_v39, %v1727_v59 }
 0x304   : > { %v5603_v43 = vpop.f32.mrf.mxu0  ;;  %v5605_v46 = vpop.f32.mrf.mxu1 }
 0x305   : > { %v1737_v40 = vadd.f32 %v5605_v46, %v5575_v24  ;;  %v5711_v24 = vsel %vm652_vm5, 1.0, %v6120_v47  ;;  %v1332_v46 = vadd.f32 %v5543_v32, %v5545_v9  ;;  %v1347_v32 = vadd.f32 %v5563_v17, %v5565_v19 }
 0x306   : > { %v5607_v50 = vpop.f32.mrf.mxu0  ;;  %v5609_v51 = vpop.f32.mrf.mxu1  ;;  %6137 = vst [vmem:[#allocation35_spill] sm:$0xff] %v5711_v24  ;;  %v1498_v9 = vadd.f32 %v5569_v21, %v1322_v7  ;;  %v5764_v7 = vld [vmem:[%s6078_s7] ss:$0 sm:$0xff] }
 0x307   : > { %6114 = vst [vmem:[#allocation13_spill] sm:$0xff] %v5607_v50  ;;  %v1500_v15 = vadd.f32 %v5577_v26, %v1332_v46  ;;  %v1501_v26 = vadd.f32 %v5589_v34, %v1337_v25 }
 0x308   : > { %v5612_v53 = vpop.f32.mrf.mxu0  ;;  %v5614_v54 = vpop.f32.mrf.mxu1 }
 0x309   : > { %6115 = vst [vmem:[#allocation14_spill] sm:$0xff] %v5612_v53  ;;  %v5663_v53 = vsel %vm627_vm7, 1.0, %v6120_v47  ;;  %v1747_v13 = vadd.f32 %v5614_v54, %v5583_v29 }
 0x30a   : > { %v5619_v58 = vpop.f32.mrf.mxu0  ;;  %v5622_v60 = vpop.f32.mrf.mxu1  ;;  %6126 = vst [vmem:[#allocation24_spill] sm:$0xff] %v5663_v53  ;;  %v5673_v53 = vsel %vm629_vm9, 1.0, %v6120_v47 }
 0x30b   : > { %6116 = vst [vmem:[#allocation15_spill] sm:$0xff] %v5619_v58  ;;  %v5658_v58 = vsel %vm624_vm6, 1.0, %v6120_v47  ;;  %6128 = vst [vmem:[#allocation26_spill] sm:$0xff] %v5673_v53  ;;  %v1742_v44 = vadd.f32 %v5622_v60, %v5587_v31 }
 0x30c   : > { %v5628_v3 = vpop.f32.mrf.mxu0  ;;  %v5630_v1 = vpop.f32.mrf.mxu1  ;;  %6124 = vst [vmem:[#allocation22_spill] sm:$0xff] %v5658_v58  ;;  %v1722_v58 = vadd.f32 %v1721_v42, %v5571_v22  ;;  %v5690_v22 = vsel %vm648_vm14, 1.0, %v6120_v47 }
 0x30d   : > { %6117 = vst [vmem:[#allocation16_spill] sm:$0xff] %v5628_v3  ;;  %6133 = vst [vmem:[#allocation31_spill] sm:$0xff] %v5690_v22 }
 0x30e   : > { %v5634_v0 = vpop.f32.mrf.mxu0  ;;  %v5636_v38 = vpop.f32.mrf.mxu1  ;;  %v1902_v63 = vadd.f32 %v5601_v41, %v1722_v58 }
 0x30f   : > { %6118 = vst [vmem:[#allocation17_spill] sm:$0xff] %v5634_v0  ;;  %v5649_v0 = vsel %vm623_vm3, 1.0, %v6120_v47  ;;  %vm650_vm3 = vcmp.lt.s32.totalorder %v558_v48, 7  ;;  %v5687_v48 = vsel %vm649_vm13, 1.0, %v6120_v47  ;;  %v1752_v29 = vadd.f32 %v5636_v38, %v5595_v37 }
 0x310   : > { %v5639_v36 = vpop.f32.mrf.mxu0  ;;  %v5641_v3 = vpop.f32.mrf.mxu1  ;;  %6121 = vst [vmem:[#allocation19_spill] sm:$0xff] %v5649_v0  ;;  %6132 = vst [vmem:[#allocation30_spill] sm:$0xff] %v5687_v48  ;;  %v5700_v4 = vsel %vm650_vm3, 1.0, %v6120_v47  ;;  %v2317_v16 = vmul.f32 %v5649_v0, %v1903_v56  ;;  %v2316_v21 = vmul.f32 %v5652_v33, %v1902_v63  ;;  %v6139_v54 = vld [vmem:[#allocation14_spill] sm:$0xff] }
 0x311   : > { %6135 = vst [vmem:[#allocation33_spill] sm:$0xff] %v5700_v4  ;;  %v1327_v4 = vadd.f32 %v5547_v10, %v5549_v11  ;;  %v1905_v10 = vadd.f32 %v5603_v43, %v1737_v40  ;;  %v1732_v11 = vadd.f32 %v5609_v51, %v5579_v27  ;;  %v2133_v17 = vadd.f32 %v5639_v36, %v5641_v3  ;;  %v6142_v40 = vld [vmem:[#allocation11_spill] sm:$0xff] }
 0x312   : > { %v5643_v57 = vpop.f32.mrf.mxu1  ;;  %v2127_v6 = vpop.f32.mrf.mxu0  ;;  %v1757_v27 = vadd.f32 %v5630_v1, %v5591_v35  ;;  %v1907_v58 = vadd.f32 %v6139_v54, %v1747_v13  ;;  %v6140_v60 = vld [vmem:[#allocation15_spill] sm:$0xff]  ;;  %v2325_v38 = vadd.f32 %v2317_v16, %v1498_v9  ;;  %v1504_v34 = vadd.f32 %v6142_v40, %v1352_v8 }
 0x313   : > { %v1499_v19 = vadd.f32 %v5581_v28, %v1327_v4  ;;  %v2128_v41 = vadd.f32 %v2127_v6, %v5643_v57  ;;  %v2319_v36 = vmul.f32 %v5655_v61, %v1905_v10  ;;  %v6138_v28 = vld [vmem:[#allocation13_spill] sm:$0xff]  ;;  %v1906_v35 = vadd.f32 %v6140_v60, %v1742_v44  ;;  %v6145_v10 = vld [vmem:[#allocation22_spill] sm:$0xff] }
 0x314   : > { %v5660_v5 = vpop.f32.mrf.mxu1  ;;  %v1904_v51 = vadd.f32 %v6138_v28, %v1732_v11  ;;  %v6143_v63 = vld [vmem:[#allocation16_spill] sm:$0xff]  ;;  %v2324_v55 = vadd.f32 %v2316_v21, %v1497_v14  ;;  %v6147_v44 = vld [vmem:[#allocation25_spill] sm:$0xff] }
 0x315   : > { %6125 = vst [vmem:[#allocation23_spill] sm:$0xff] %v5660_v5  ;;  %v4714_v5 = vpop.f32.mrf.mxu0  ;;  %v1909_v57 = vadd.f32 %v6143_v63, %v1757_v27  ;;  %v6146_v11 = vld [vmem:[#allocation24_spill] sm:$0xff]  ;;  %v2320_v16 = vmul.f32 %v6147_v44, %v1906_v35 }
 0x316   : > { %v5668_v49 = vpop.f32.mrf.mxu1  ;;  %v6144_v6 = vld [vmem:[#allocation17_spill] sm:$0xff]  ;;  %v2318_v8 = vmul.f32 %v6145_v10, %v1904_v51  ;;  %v2321_v13 = vmul.f32 %v6146_v11, %v1907_v58  ;;  %v6149_v58 = vld [vmem:[#allocation18_spill] sm:$0xff] }
 0x317   : > { %v2137_v12 = vpop.f32.mrf.mxu0  ;;  %v1908_v4 = vadd.f32 %v6144_v6, %v1752_v29 }
 0x318   : > { %v5678_v50 = vpop.f32.mrf.mxu1 }
 0x319   : > { %v4717_v31 = vpop.f32.mrf.mxu0 }
 0x31a   : > { %v5694_v42 = vpop.f32.mrf.mxu1  ;;  %v2153_v28 = vadd.f32 %v4717_v31, %v5678_v50 }
 0x31b   : > { %v2147_v2 = vpop.f32.mrf.mxu0 }
 0x31c   : > { %v5720_v18 = vpop.f32.mrf.mxu1  ;;  %v6141_v1 = vld [vmem:[#allocation23_spill] sm:$0xff] }
 0x31d   : > { %v2143_v37 = vadd.f32 %v4714_v5, %v6141_v1  ;;  %v2138_v5 = vadd.f32 %v2137_v12, %v5668_v49  ;;  %v2323_v12 = vmul.f32 %v5673_v53, %v1909_v57  ;;  %v4720_v51 = vpop.f32.mrf.mxu0  ;;  %v2326_v1 = vadd.f32 %v2318_v8, %v1499_v19  ;;  %v6150_v57 = vld [vmem:[#allocation32_spill] sm:$0xff] }
 0x31e   : > { %v5736_v45 = vpop.f32.mrf.mxu1  ;;  %v2163_v19 = vadd.f32 %v4720_v51, %v5720_v18 }
 0x31f   : > { %v2157_v40 = vpop.f32.mrf.mxu0 }
 0x320   : > { %v4731_v39 = vpop.f32.mrf.mxu1 }
 0x321   : > { %v2309_v43 = vadd.f32 %v4731_v39, %v2133_v17  ;;  %v2327_v17 = vadd.f32 %v2319_v36, %v1500_v15 }
 0x322   : > { %v2269_v3 = vpop.f32.mrf.mxu1 }
 0x323   : > { %v2333_v59 = vmul.f32 %v5681_v62, %v2309_v43  ;;  %v2308_v30 = vadd.f32 %v2269_v3, %v2128_v41  ;;  %v6148_v41 = vld [vmem:[#allocation12_spill] sm:$0xff]  ;;  %v2322_v43 = vmul.f32 %v5676_v52, %v1908_v4  ;;  %v2148_v3 = vadd.f32 %v2147_v2, %v5694_v42 }
 0x324   : > { %v4734_v56 = vpop.f32.mrf.mxu1  ;;  %v1503_v49 = vadd.f32 %v6148_v41, %v1347_v32  ;;  %v2331_v42 = vadd.f32 %v2323_v12, %v1504_v34  ;;  %v2158_v34 = vadd.f32 %v2157_v40, %v5736_v45  ;;  %v6152_v41 = vld [vmem:[#allocation34_spill] sm:$0xff] }
 0x325   : > { %v2341_v46 = vadd.f32 %v2333_v59, %v2325_v38  ;;  %v2332_v25 = vmul.f32 %v5684_v20, %v2308_v30  ;;  %v2311_v9 = vadd.f32 %v4734_v56, %v2143_v37  ;;  %v2329_v37 = vadd.f32 %v2321_v13, %v1502_v23 }
 0x326   : > { %v2279_v27 = vpop.f32.mrf.mxu1  ;;  %v2328_v30 = vadd.f32 %v2320_v16, %v1501_v26  ;;  %v2330_v56 = vadd.f32 %v2322_v43, %v1503_v49 }
 0x327   : > { %v2356_v29 = vadd.f32 %v5764_v7, %v2341_v46  ;;  %v2340_v39 = vadd.f32 %v2332_v25, %v2324_v55  ;;  %v2335_v14 = vmul.f32 %v5687_v48, %v2311_v9  ;;  %v2310_v21 = vadd.f32 %v2279_v27, %v2138_v5  ;;  %v6151_v25 = vld [vmem:[#allocation33_spill] sm:$0xff] }
 0x328   : > { %v4737_v54 = vpop.f32.mrf.mxu1 }
 0x329   : > { %v5778_v60 = vadd.f32 %v6149_v58, %v2356_v29  ;;  %v2355_v15 = vadd.f32 %v5764_v7, %v2340_v39  ;;  %v2343_v36 = vadd.f32 %v2335_v14, %v2327_v17  ;;  %v2334_v35 = vmul.f32 %v5690_v22, %v2310_v21 }
 0x32a   : > { %v2313_v32 = vadd.f32 %v4737_v54, %v2153_v28  ;;  %v2289_v38 = vpop.f32.mrf.mxu1 }
 0x32b   : > { %v2397_v59 = vmul.f32 %v5778_v60, %v5778_v60  ;;  %v5786_v50 = vadd.f32 %v6149_v58, %v2355_v15  ;;  %v2358_v31 = vadd.f32 %v5764_v7, %v2343_v36  ;;  %v2342_v63 = vadd.f32 %v2334_v35, %v2326_v1 }
 0x32c   : > { %v2337_v6 = vmul.f32 %v6150_v57, %v2313_v32  ;;  %v2312_v4 = vadd.f32 %v2289_v38, %v2148_v3  ;;  %v4740_v55 = vpop.f32.mrf.mxu1  ;;  %v2376_v18 = vsel %vm512_vm0, %v5778_v60, 0.0 }
 0x32d   : > { %v2396_v23 = vmul.f32 %v5786_v50, %v5786_v50  ;;  %v5794_v2 = vadd.f32 %v6149_v58, %v2358_v31  ;;  %v2375_v5 = vsel %vm512_vm0, %v5786_v50, 0.0  ;;  %v2357_v26 = vadd.f32 %v5764_v7, %v2342_v63 }
 0x32e   : > { %v2345_v46 = vadd.f32 %v2337_v6, %v2329_v37  ;;  %v2336_v9 = vmul.f32 %v6151_v25, %v2312_v4  ;;  %v2299_v8 = vpop.f32.mrf.mxu1  ;;  %v2405_v13 = vsel %vm512_vm0, %v2397_v59, 0.0  ;;  %v2315_v16 = vadd.f32 %v4740_v55, %v2163_v19 }
 0x32f   : > { %v2404_v17 = vsel %vm512_vm0, %v2396_v23, 0.0  ;;  %v5806_v27 = vadd.f32 %v6149_v58, %v2357_v26  ;;  %v2377_v14 = vadd.f32 %v2376_v18, %v2375_v5  ;;  %v2399_v21 = vmul.f32 %v5794_v2, %v5794_v2 }
 0x330   : > { %v2360_v29 = vadd.f32 %v5764_v7, %v2345_v46  ;;  %v2344_v39 = vadd.f32 %v2336_v9, %v2328_v30  ;;  %v2339_v45 = vmul.f32 %v6152_v41, %v2315_v16  ;;  %v2314_v49 = vadd.f32 %v2299_v8, %v2158_v34 }
 0x331   : > { %v2378_v12 = vsel %vm512_vm0, %v5806_v27, 0.0  ;;  %v2398_v43 = vmul.f32 %v5806_v27, %v5806_v27  ;;  %v2406_v54 = vadd.f32 %v2405_v13, %v2404_v17  ;;  %v2380_v3 = vsel %vm512_vm0, %v5794_v2, 0.0 }
 0x332   : > { %v5817_v28 = vadd.f32 %v6149_v58, %v2360_v29  ;;  %v2359_v51 = vadd.f32 %v5764_v7, %v2344_v39  ;;  %v2379_v15 = vadd.f32 %v2378_v12, %v2377_v14  ;;  %v2347_v36 = vadd.f32 %v2339_v45, %v2331_v42 }
 0x333   : > { %v2338_v35 = vmul.f32 %v5711_v24, %v2314_v49  ;;  %v2407_v1 = vsel %vm512_vm0, %v2398_v43, 0.0  ;;  %v2409_v30 = vsel %vm512_vm0, %v2399_v21, 0.0 }
 0x334   : > { %v5825_v32 = vadd.f32 %v6149_v58, %v2359_v51  ;;  %v2408_v37 = vadd.f32 %v2407_v1, %v2406_v54  ;;  %v2381_v38 = vadd.f32 %v2380_v3, %v2379_v15  ;;  %v2362_v59 = vadd.f32 %v5764_v7, %v2347_v36 }
 0x335   : > { %v2346_v31 = vadd.f32 %v2338_v35, %v2330_v56  ;;  %v2401_v40 = vmul.f32 %v5817_v28, %v5817_v28  ;;  %v2384_v56 = vsel %vm512_vm0, %v5817_v28, 0.0 }
 0x336   : > { %v2382_v63 = vsel %vm512_vm0, %v5825_v32, 0.0  ;;  %v2400_v6 = vmul.f32 %v5825_v32, %v5825_v32  ;;  %v2410_v55 = vadd.f32 %v2409_v30, %v2408_v37  ;;  %v5836_v42 = vadd.f32 %v6149_v58, %v2362_v59  ;;  %v2515_v59 = vld [vmem:[%s6076_s5 + $0x10] sm:$0xff]  ;;  %v2513_v30 = vld [vmem:[%s6076_s5] sm:$0xff] }
 0x337   : > { %v2383_v4 = vadd.f32 %v2382_v63, %v2381_v38  ;;  %v2361_v19 = vadd.f32 %v5764_v7, %v2346_v31  ;;  %v2413_v46 = vsel %vm512_vm0, %v2401_v40, 0.0  ;;  %v2516_v38 = vld [vmem:[%s6076_s5 + $0x18] sm:$0xff]  ;;  %v2514_v31 = vld [vmem:[%s6076_s5 + $0x8] sm:$0xff] }
 0x338   : > { %v2411_v23 = vsel %vm512_vm0, %v2400_v6, 0.0  ;;  %v2403_v8 = vmul.f32 %v5836_v42, %v5836_v42  ;;  %v2388_v16 = vsel %vm512_vm0, %v5836_v42, 0.0 }
 0x339   : > { %v2412_v5 = vadd.f32 %v2411_v23, %v2410_v55  ;;  %v5843_v26 = vadd.f32 %v6149_v58, %v2361_v19  ;;  %v2385_v9 = vadd.f32 %v2384_v56, %v2383_v4 }
 0x33a   : > { %v2417_v39 = vsel %vm512_vm0, %v2403_v8, 0.0  ;;  %v2726_v8 = vld [vmem:[#allocation5 + $0x98] sm:$0xff] }
 0x33b   : > { %v2386_v34 = vsel %vm512_vm0, %v5843_v26, 0.0  ;;  %v2402_v7 = vmul.f32 %v5843_v26, %v5843_v26  ;;  %v2414_v18 = vadd.f32 %v2413_v46, %v2412_v5  ;;  %4763 = vmatprep.subr.mxu1 %v2726_v8 }
 0x33c   : > { %v2387_v13 = vadd.f32 %v2386_v34, %v2385_v9  ;;  %v2720_v9 = vld [vmem:[#allocation5 + $0x38] sm:$0xff]  ;;  %v2725_v34 = vld [vmem:[#allocation5 + $0x90] sm:$0xff]  ;;  %4764 = vmatpush3.msra.mxu1 %v2726_v8 }
 0x33d   : > { %v2415_v58 = vsel %vm512_vm0, %v2402_v7, 0.0  ;;  %v2718_v7 = vld [vmem:[#allocation5 + $0x28] sm:$0xff]  ;;  %4765 = vmatprep.subr.mxu1 %v2725_v34 }
 0x33e   : > { %v2389_v17 = vadd.f32 %v2388_v16, %v2387_v13  ;;  %v2416_v29 = vadd.f32 %v2415_v58, %v2414_v18  ;;  %v2724_v18 = vld [vmem:[#allocation5 + $0x88] sm:$0xff]  ;;  %v2717_v13 = vld [vmem:[#allocation5 + $0x20] sm:$0xff]  ;;  %4766 = vmatpush3.msra.mxu1 %v2725_v34 }
 0x33f   : > { %v2723_v16 = vld [vmem:[#allocation5 + $0x80] sm:$0xff]  ;;  %4767 = vmatprep.subr.mxu1 %v2724_v18  ;;  %v2708_v58 = vld [vmem:[#allocation2 + $0x8] sm:$0xff] }
 0x340   : > { %v2390_v14 = vrot.slane %v2389_v17, 4  ;;  %v2418_v21 = vadd.f32 %v2417_v39, %v2416_v29  ;;  %4768 = vmatpush3.msra.mxu1 %v2724_v18  ;;  %v5881_v29 = vld [vmem:[#allocation5 + $0x78] sm:$0xff] }
 0x341   : > { %4769 = vmatprep.subr.mxu1 %v2723_v16 }
 0x342   : > { %v2391_v45 = vadd.f32 %v2390_v14, %v2389_v17  ;;  %v2419_v49 = vrot.slane %v2418_v21, 4  ;;  %v5877_v17 = vld [vmem:[#allocation5 + $0xf8] sm:$0xff]  ;;  %4770 = vmatpush3.msra.mxu1 %v2723_v16  ;;  %v6153_v14 = vld [vmem:[#allocation10_spill] sm:$0xff] }
 0x343   : > { %4803 = vmatprep.subr.mxu1 %v5877_v17 }
 0x344   : > { %v2392_v12 = vrot.slane %v2391_v45, 2  ;;  %v2420_v43 = vadd.f32 %v2419_v49, %v2418_v21 }
 0x346   : > { %v2393_v51 = vadd.f32 %v2392_v12, %v2391_v45  ;;  %v2421_v54 = vrot.slane %v2420_v43, 2  ;;  %v6154_v45 = vld [vmem:[#allocation9_spill] sm:$0xff] }
 0x347   : > { %v6155_v49 = vsub.s32 1, %v6154_v45 }
 0x348   : > { %v2394_v15 = vrot.slane %v2393_v51, 1  ;;  %v2422_v36 = vadd.f32 %v2421_v54, %v2420_v43 }
 0x34a   : > { %v2423_v35 = vrot.slane %v2422_v36, 1  ;;  %v2395_v3 = vadd.f32 %v2394_v15, %v2393_v51 }
 0x34c   : > { %v2424_v1 = vadd.f32 %v2423_v35, %v2422_v36 }
 0x34e   : > { %v2425_v37 = vsel %vm814_vm2, %v2395_v3, %v2424_v1 }
 0x34f   : > { %4750 = vmatmul.mubr.msk.f32.vlgmr.msra.gmra.mxu0 %vm512_vm0, %v2425_v37 }
 0x350   : > { %4760 = vmatprep.mubr.msk.f32.mxu0 %vm5129_vm1, %v6120_v47  ;;  %4753 = vmatpush3.msra.mxu0 %v2516_v38  ;;  %v4200_v38 = vld [vmem:[%s6081_s10] ss:$0 sm:$0xff] }
 0x351   : > { %4754 = vmatprep.subr.mxu0 %v6120_v47 }
 0x352   : > { %4755 = vmatpush3.msra.mxu0 %v2515_v59 }
 0x353   : > { %4756 = vmatprep.subr.mxu0 %v6120_v47 }
 0x354   : > { %4757 = vmatpush3.msra.mxu0 %v2514_v31 }
 0x355   : > { %4758 = vmatprep.subr.mxu0 %v6120_v47  ;;  %v2719_v47 = vld [vmem:[#allocation5 + $0x30] sm:$0xff] }
 0x356   : > { %4759 = vmatpush3.msra.mxu0 %v2513_v30 }
 0x357   : > { %4783 = vmatprep.subr.mxu0 %v2720_v9 }
 0x40f   : > { %v2499_v40 = vpop.f32.mrf.mxu0 }
 0x410   : > { %v2503_v63 = vmul.f32 0.015625, %v2499_v40 }
 0x411   : > { %v4751_v6 = vpop.f32.mrf.mxu0 }
 0x412   : > { %v2504_v4 = vmul.f32 %v2503_v63, %v2503_v63 }
 0x414   : > { %v2506_v55 = vrot.slane %v2504_v4, 7 }
 0x416   : > { %v2508_v19 = vsub.f32 %v2503_v63, %v2506_v55 }
 0x418   : > { %v2509_v23 = vmax.f32 %v2508_v19, 0.0 }
 0x41a   : > { %v2510_v56 = vadd.f32 1e-05, %v2509_v23 }
 0x41c   : > { %5022 = vrsqrt.f32 %v2510_v56 }
 0x429   : > { %v5023_v5 = vpop.eup %5022 }
 0x42a   : > { %v2512_v46 = vsel %vm814_vm2, %v2503_v63, %v5023_v5 }
 0x42b   : > { %4761 = vmatmul.mubr.msk.f32.vlgmr.msra.gmra.mxu0 %vm512_vm0, %v2512_v46 }
 0x42c   : > { %4784 = vmatpush3.msra.mxu0 %v2720_v9  ;;  %4791 = vmatprep.mubr.msk.f32.mxu0 %vm512_vm0, %v2708_v58 }
 0x42d   : > { %4785 = vmatprep.subr.mxu0 %v2719_v47 }
 0x42e   : > { %4786 = vmatpush3.msra.mxu0 %v2719_v47 }
 0x42f   : > { %4787 = vmatprep.subr.mxu0 %v2718_v7 }
 0x430   : > { %4788 = vmatpush3.msra.mxu0 %v2718_v7 }
 0x431   : > { %4789 = vmatprep.subr.mxu0 %v2717_v13 }
 0x432   : > { %4790 = vmatpush3.msra.mxu0 %v2717_v13 }
 0x433   : > { %4823 = vmatprep.subr.mxu0 %v5881_v29 }
 0x4eb   : > { %v2586_v39 = vpop.f32.mrf.mxu0 }
 0x4ec   : > { %v2593_v21 = vrot.slane %v2586_v39, %v6153_v14  ;;  %v2605_v12 = vrot.slane %v2586_v39, %v6155_v49 }
 0x4ed   : > { %v4762_v43 = vpop.f32.mrf.mxu0 }
 0x4ee   : > { %v2594_v51 = vsub.f32 %v5786_v50, %v2593_v21  ;;  %v2595_v54 = vsub.f32 %v5778_v60, %v2593_v21  ;;  %v2596_v15 = vsub.f32 %v5806_v27, %v2593_v21  ;;  %v2597_v36 = vsub.f32 %v5794_v2, %v2593_v21 }
 0x4ef   : > { %v2598_v35 = vsub.f32 %v5825_v32, %v2593_v21  ;;  %v2599_v3 = vsub.f32 %v5817_v28, %v2593_v21  ;;  %v2600_v1 = vsub.f32 %v5843_v26, %v2593_v21  ;;  %v2601_v37 = vsub.f32 %v5836_v42, %v2593_v21  ;;  %v4201_v28 = vld [vmem:[%s6082_s11] ss:$0 sm:$0xff] }
 0x4f0   : > { %v2606_v59 = vmul.f32 %v2605_v12, %v2594_v51  ;;  %v2607_v50 = vmul.f32 %v2605_v12, %v2595_v54  ;;  %v2608_v31 = vmul.f32 %v2605_v12, %v2596_v15  ;;  %v2609_v60 = vmul.f32 %v2605_v12, %v2597_v36 }
 0x4f1   : > { %v2610_v30 = vmul.f32 %v2605_v12, %v2598_v35  ;;  %v2611_v27 = vmul.f32 %v2605_v12, %v2599_v3  ;;  %v2612_v40 = vmul.f32 %v2605_v12, %v2600_v1  ;;  %v2613_v2 = vmul.f32 %v2605_v12, %v2601_v37 }
 0x4f2   : > { %v2621_v32 = vmul.f32 %v4200_v38, %v2606_v59  ;;  %v2622_v26 = vmul.f32 %v4200_v38, %v2607_v50  ;;  %v2623_v63 = vmul.f32 %v4200_v38, %v2608_v31  ;;  %v2624_v42 = vmul.f32 %v4200_v38, %v2609_v60 }
 0x4f3   : > { %v2625_v6 = vmul.f32 %v4200_v38, %v2610_v30  ;;  %v2626_v4 = vmul.f32 %v4200_v38, %v2611_v27  ;;  %v2627_v55 = vmul.f32 %v4200_v38, %v2612_v40  ;;  %v2628_v19 = vmul.f32 %v4200_v38, %v2613_v2 }
 0x4f4   : > { %v2636_v23 = vadd.f32 %v4201_v28, %v2621_v32  ;;  %v2637_v56 = vadd.f32 %v4201_v28, %v2622_v26  ;;  %v2638_v5 = vadd.f32 %v4201_v28, %v2623_v63  ;;  %v2639_v46 = vadd.f32 %v4201_v28, %v2624_v42 }
 0x4f5   : > { %v2640_v9 = vadd.f32 %v4201_v28, %v2625_v6  ;;  %v2641_v8 = vadd.f32 %v4201_v28, %v2626_v4  ;;  %v2642_v34 = vadd.f32 %v4201_v28, %v2627_v55  ;;  %v2643_v13 = vadd.f32 %v4201_v28, %v2628_v19 }
 0x4f6   : > { %v4202_v47 = vmul.f32 -1.442695, %v2636_v23  ;;  %v4203_v7 = vmul.f32 -1.442695, %v2637_v56  ;;  %v4204_v18 = vmul.f32 -1.442695, %v2638_v5 }
 0x4f7   : > { %v4205_v16 = vmul.f32 -1.442695, %v2639_v46  ;;  %v4206_v58 = vmul.f32 -1.442695, %v2640_v9  ;;  %v4207_v39 = vmul.f32 -1.442695, %v2641_v8 }
 0x4f8   : > { %5024 = vpow2.f32 %v4202_v47  ;;  %v4208_v14 = vmul.f32 -1.442695, %v2642_v34  ;;  %v4209_v21 = vmul.f32 -1.442695, %v2643_v13 }
 0x4f9   : > { %5026 = vpow2.f32 %v4203_v7  ;;  %v3130_v7 = vld [vmem:[#allocation5 + $0x70] sm:$0xff] }
 0x4fa   : > { %5028 = vpow2.f32 %v4204_v18 }
 0x4fb   : > { %5030 = vpow2.f32 %v4205_v16 }
 0x4fc   : > { %5032 = vpow2.f32 %v4206_v58  ;;  %v3125_v58 = vld [vmem:[#allocation5 + $0x18] sm:$0xff] }
 0x4fd   : > { %5034 = vpow2.f32 %v4207_v39 }
 0x4fe   : > { %5036 = vpow2.f32 %v4208_v14  ;;  %v3128_v14 = vld [vmem:[#allocation5 + $0x60] sm:$0xff] }
 0x4ff   : > { %5038 = vpow2.f32 %v4209_v21 }
 0x505   : > { %v5025_v45 = vpop.eup %5024 }
 0x506   : > { %v5027_v49 = vpop.eup %5026  ;;  %v2668_v12 = vadd.f32 1.0, %v5025_v45 }
 0x507   : > { %v5029_v43 = vpop.eup %5028  ;;  %v2669_v51 = vadd.f32 1.0, %v5027_v49  ;;  %v3124_v49 = vld [vmem:[#allocation5 + $0x10] sm:$0xff] }
 0x508   : > { %v5031_v54 = vpop.eup %5030  ;;  %v2670_v15 = vadd.f32 1.0, %v5029_v43  ;;  %5040 = vrcp.f32 %v2668_v12  ;;  %v3381_v43 = vld [vmem:[#allocation5 + $0xd8] sm:$0xff] }
 0x509   : > { %v5033_v36 = vpop.eup %5032  ;;  %v2671_v35 = vadd.f32 1.0, %v5031_v54  ;;  %5042 = vrcp.f32 %v2669_v51  ;;  %v3123_v54 = vld [vmem:[#allocation5 + $0x8] sm:$0xff] }
 0x50a   : > { %v5035_v3 = vpop.eup %5034  ;;  %v2672_v1 = vadd.f32 1.0, %v5033_v36  ;;  %5044 = vrcp.f32 %v2670_v15  ;;  %v3380_v36 = vld [vmem:[#allocation5 + $0xd0] sm:$0xff] }
 0x50b   : > { %v5037_v37 = vpop.eup %5036  ;;  %v2673_v38 = vadd.f32 1.0, %v5035_v3  ;;  %5046 = vrcp.f32 %v2671_v35  ;;  %v3122_v3 = vld [vmem:[#allocation5] sm:$0xff] }
 0x50c   : > { %v5039_v59 = vpop.eup %5038  ;;  %v2674_v50 = vadd.f32 1.0, %v5037_v37  ;;  %5048 = vrcp.f32 %v2672_v1  ;;  %v3379_v37 = vld [vmem:[#allocation5 + $0xc8] sm:$0xff] }
 0x50d   : > { %v2675_v31 = vadd.f32 1.0, %v5039_v59  ;;  %5050 = vrcp.f32 %v2673_v38  ;;  %v2971_v38 = vld [vmem:[#allocation2 + $0x50] sm:$0xff] }
 0x50e   : > { %5052 = vrcp.f32 %v2674_v50  ;;  %v3378_v50 = vld [vmem:[#allocation5 + $0xc0] sm:$0xff] }
 0x50f   : > { %5054 = vrcp.f32 %v2675_v31  ;;  %v3114_v31 = vld [vmem:[#allocation2 + $0x7] sm:$0xff] }
 0x515   : > { %v5041_v60 = vpop.eup %5040 }
 0x516   : > { %v5043_v30 = vpop.eup %5042  ;;  %v2692_v27 = vmul.f32 %v5041_v60, %v2636_v23  ;;  %v3537_v60 = vld [vmem:[#allocation5 + $0xb8] sm:$0xff] }
 0x517   : > { %v5045_v40 = vpop.eup %5044  ;;  %v2693_v2 = vmul.f32 %v5043_v30, %v2637_v56  ;;  %v3536_v30 = vld [vmem:[#allocation5 + $0xb0] sm:$0xff] }
 0x518   : > { %v5047_v28 = vpop.eup %5046  ;;  %v2694_v32 = vmul.f32 %v5045_v40, %v2638_v5  ;;  %2700 = vst.msk [vmem:[#allocation2 + $0x10] sm:$0xff] %vm512_vm0, %v2692_v27  ;;  %v3531_v27 = vld [vmem:[#allocation5 + $0x58] sm:$0xff]  ;;  %v3535_v40 = vld [vmem:[#allocation5 + $0xa8] sm:$0xff] }
 0x519   : > { %v5049_v26 = vpop.eup %5048  ;;  %v2695_v63 = vmul.f32 %v5047_v28, %v2639_v46  ;;  %2701 = vst.msk [vmem:[#allocation2 + $0x18] sm:$0xff] %vm512_vm0, %v2693_v2  ;;  %v3530_v2 = vld [vmem:[#allocation5 + $0x50] sm:$0xff]  ;;  %v3534_v28 = vld [vmem:[#allocation5 + $0xa0] sm:$0xff] }
 0x51a   : > { %v5051_v42 = vpop.eup %5050  ;;  %v2696_v6 = vmul.f32 %v5049_v26, %v2640_v9  ;;  %2702 = vst.msk [vmem:[#allocation2 + $0x20] sm:$0xff] %vm512_vm0, %v2694_v32  ;;  %v2975_v9 = vld [vmem:[#allocation5 + $0xf0] sm:$0xff]  ;;  %v3529_v32 = vld [vmem:[#allocation5 + $0x48] sm:$0xff] }
 0x51b   : > { %v5053_v4 = vpop.eup %5052  ;;  %v2697_v55 = vmul.f32 %v5051_v42, %v2641_v8  ;;  %2703 = vst.msk [vmem:[#allocation2 + $0x28] sm:$0xff] %vm512_vm0, %v2695_v63  ;;  %v3528_v63 = vld [vmem:[#allocation5 + $0x40] sm:$0xff] }
 0x51c   : > { %v5055_v19 = vpop.eup %5054  ;;  %v2698_v23 = vmul.f32 %v5053_v4, %v2642_v34  ;;  %2704 = vst.msk [vmem:[#allocation2 + $0x30] sm:$0xff] %vm512_vm0, %v2696_v6  ;;  %v2974_v34 = vld [vmem:[#allocation5 + $0xe8] sm:$0xff]  ;;  %v3787_v6 = vld [vmem:[#allocation5 + $0x118] sm:$0xff] }
 0x51d   : > { %v2699_v56 = vmul.f32 %v5055_v19, %v2643_v13  ;;  %2705 = vst.msk [vmem:[#allocation2 + $0x38] sm:$0xff] %vm512_vm0, %v2697_v55  ;;  %v2973_v13 = vld [vmem:[#allocation5 + $0xe0] sm:$0xff]  ;;  %v3786_v19 = vld [vmem:[#allocation5 + $0x110] sm:$0xff] }
 0x51e   : > { %2706 = vst.msk [vmem:[#allocation2 + $0x40] sm:$0xff] %vm512_vm0, %v2698_v23 }
 0x51f   : > { %2707 = vst.msk [vmem:[#allocation2 + $0x48] sm:$0xff] %vm512_vm0, %v2699_v56  ;;  %v2709_v5 = vld [vmem:[#allocation2 + $0x10] sm:$0xff] }
 0x520   : > { %4771 = vmatprep.mubr.msk.f32.mxu1 %vm512_vm0, %v2709_v5  ;;  %4792 = vmatmul.mubr.msk.f32.vlgmr.msra.gmra.mxu0 %vm512_vm0, %v2709_v5  ;;  %v2710_v46 = vld [vmem:[#allocation2 + $0x18] sm:$0xff]  ;;  %v3115_v21 = vld [vmem:[#allocation2 + $0xf] sm:$0xff] }
 0x521   : > { %4772 = vmatmul.mubr.msk.f32.vlgmr.msra.gmra.mxu1 %vm512_vm0, %v2710_v46  ;;  %4794 = vmatprep.mubr.msk.f32.mxu0 %vm512_vm0, %v2710_v46  ;;  %v2711_v8 = vld [vmem:[#allocation2 + $0x20] sm:$0xff]  ;;  %v3116_v45 = vld [vmem:[#allocation2 + $0x17] sm:$0xff]  ;;  %v3519_v42 = vld [vmem:[#allocation2 + $0x9] sm:$0xff] }
 0x522   : > { %4804 = vmatpush3.msra.mxu1 %v5877_v17  ;;  %4774 = vmatprep.mubr.msk.f32.mxu1 %vm512_vm0, %v2711_v8  ;;  %v2712_v47 = vld [vmem:[#allocation2 + $0x28] sm:$0xff]  ;;  %v3117_v12 = vld [vmem:[#allocation2 + $0x1f] sm:$0xff]  ;;  %v3520_v4 = vld [vmem:[#allocation2 + $0x11] sm:$0xff] }
 0x523   : > { %4805 = vmatprep.subr.mxu1 %v2975_v9  ;;  %4824 = vmatpush3.msra.mxu0 %v5881_v29  ;;  %v2713_v18 = vld [vmem:[#allocation2 + $0x30] sm:$0xff]  ;;  %v3129_v29 = vld [vmem:[#allocation5 + $0x68] sm:$0xff]  ;;  %v3521_v55 = vld [vmem:[#allocation2 + $0x19] sm:$0xff] }
 0x524   : > { %4795 = vmatmul.mubr.msk.f32.gmra.mxu0 %vm512_vm0, %v2711_v8  ;;  %4806 = vmatpush3.msra.mxu1 %v2975_v9  ;;  %v2714_v17 = vld [vmem:[#allocation2 + $0x38] sm:$0xff]  ;;  %v3118_v51 = vld [vmem:[#allocation2 + $0x27] sm:$0xff]  ;;  %v3119_v15 = vld [vmem:[#allocation2 + $0x2f] sm:$0xff] }
 0x525   : > { %4775 = vmatmul.mubr.msk.f32.gmra.mxu1 %vm512_vm0, %v2712_v47  ;;  %4797 = vmatprep.mubr.msk.f32.mxu0 %vm512_vm0, %v2712_v47  ;;  %v2715_v16 = vld [vmem:[#allocation2 + $0x40] sm:$0xff]  ;;  %v3120_v35 = vld [vmem:[#allocation2 + $0x37] sm:$0xff]  ;;  %v3523_v56 = vld [vmem:[#allocation2 + $0x29] sm:$0xff] }
 0x526   : > { %4777 = vmatprep.mubr.msk.f32.mxu1 %vm512_vm0, %v2713_v18  ;;  %4807 = vmatprep.subr.mxu1 %v2974_v34  ;;  %v2721_v39 = vld [vmem:[#allocation2 + $0x48] sm:$0xff]  ;;  %v3121_v1 = vld [vmem:[#allocation2 + $0x3f] sm:$0xff] }
 0x527   : > { %4808 = vmatpush3.msra.mxu1 %v2974_v34  ;;  %4825 = vmatprep.subr.mxu0 %v3130_v7  ;;  %v3126_v59 = vld [vmem:[#allocation2 + $0x47] sm:$0xff]  ;;  %v3376_v26 = vld [vmem:[#allocation2 + $0x4f] sm:$0xff]  ;;  %v3525_v9 = vld [vmem:[#allocation2 + $0x39] sm:$0xff] }
 0x528   : > { %4798 = vmatmul.mubr.msk.f32.gmra.mxu0 %vm512_vm0, %v2713_v18  ;;  %4809 = vmatprep.subr.mxu1 %v2973_v13  ;;  %v3522_v23 = vld [vmem:[#allocation2 + $0x21] sm:$0xff] }
 0x529   : > { %4778 = vmatmul.mubr.msk.f32.gmra.mxu1 %vm512_vm0, %v2714_v17  ;;  %4800 = vmatprep.mubr.msk.f32.mxu0 %vm512_vm0, %v2714_v17  ;;  %v3785_v5 = vld [vmem:[#allocation5 + $0x108] sm:$0xff] }
 0x52a   : > { %4780 = vmatprep.mubr.msk.f32.mxu1 %vm512_vm0, %v2715_v16  ;;  %4826 = vmatpush3.msra.mxu0 %v3130_v7  ;;  %v3526_v34 = vld [vmem:[#allocation2 + $0x41] sm:$0xff]  ;;  %v3782_v7 = vld [vmem:[#allocation2 + $0x51] sm:$0xff] }
 0x52b   : > { %4827 = vmatprep.subr.mxu0 %v3129_v29  ;;  %4810 = vmatpush3.msra.mxu1 %v2973_v13 }
 0x52c   : > { %4801 = vmatmul.mubr.msk.f32.gmra.mxu0 %vm512_vm0, %v2715_v16  ;;  %4843 = vmatprep.subr.mxu1 %v3125_v58 }
 0x52d   : > { %4781 = vmatmul.mubr.msk.f32.gmra.mxu1 %vm512_vm0, %v2721_v39  ;;  %4828 = vmatpush3.msra.mxu0 %v3129_v29 }
 0x52e   : > { %4831 = vmatprep.mubr.msk.f32.mxu0 %vm512_vm0, %v3115_v21  ;;  %4811 = vmatprep.mubr.msk.f32.mxu1 %vm512_vm0, %v2710_v46  ;;  %v3524_v46 = vld [vmem:[#allocation2 + $0x31] sm:$0xff] }
 0x52f   : > { %4829 = vmatprep.subr.mxu0 %v3128_v14 }
 0x530   : > { %4830 = vmatpush3.msra.mxu0 %v3128_v14 }
 0x531   : > { %4832 = vmatmul.mubr.msk.f32.vlgmr.msra.gmra.mxu0 %vm512_vm0, %v3116_v45  ;;  %4812 = vmatmul.mubr.msk.f32.vlgmr.msra.gmra.mxu1 %vm512_vm0, %v2711_v8  ;;  %v3784_v8 = vld [vmem:[#allocation5 + $0x100] sm:$0xff] }
 0x532   : > { %4834 = vmatprep.mubr.msk.f32.mxu0 %vm512_vm0, %v3117_v12  ;;  %4844 = vmatpush3.msra.mxu1 %v3125_v58 }
 0x533   : > { %4814 = vmatprep.mubr.msk.f32.mxu1 %vm512_vm0, %v2712_v47  ;;  %4845 = vmatprep.subr.mxu1 %v3124_v49  ;;  %v3532_v47 = vld [vmem:[#allocation2 + $0x49] sm:$0xff] }
 0x534   : > { %4846 = vmatpush3.msra.mxu1 %v3124_v49  ;;  %4863 = vmatprep.subr.mxu0 %v3381_v43 }
 0x535   : > { %4835 = vmatmul.mubr.msk.f32.gmra.mxu0 %vm512_vm0, %v3118_v51  ;;  %4815 = vmatmul.mubr.msk.f32.gmra.mxu1 %vm512_vm0, %v2713_v18 }
 0x536   : > { %4837 = vmatprep.mubr.msk.f32.mxu0 %vm512_vm0, %v3119_v15  ;;  %4817 = vmatprep.mubr.msk.f32.mxu1 %vm512_vm0, %v2714_v17 }
 0x537   : > { %4847 = vmatprep.subr.mxu1 %v3123_v54  ;;  %4864 = vmatpush3.msra.mxu0 %v3381_v43 }
 0x538   : > { %4848 = vmatpush3.msra.mxu1 %v3123_v54  ;;  %4865 = vmatprep.subr.mxu0 %v3380_v36 }
 0x539   : > { %4838 = vmatmul.mubr.msk.f32.gmra.mxu0 %vm512_vm0, %v3120_v35  ;;  %4818 = vmatmul.mubr.msk.f32.gmra.mxu1 %vm512_vm0, %v2715_v16 }
 0x53a   : > { %4840 = vmatprep.mubr.msk.f32.mxu0 %vm512_vm0, %v3121_v1  ;;  %4820 = vmatprep.mubr.msk.f32.mxu1 %vm512_vm0, %v2721_v39 }
 0x53b   : > { %4866 = vmatpush3.msra.mxu0 %v3380_v36  ;;  %4849 = vmatprep.subr.mxu1 %v3122_v3 }
 0x53c   : > { %4867 = vmatprep.subr.mxu0 %v3379_v37  ;;  %4850 = vmatpush3.msra.mxu1 %v3122_v3 }
 0x53d   : > { %4841 = vmatmul.mubr.msk.f32.gmra.mxu0 %vm512_vm0, %v3126_v59  ;;  %4821 = vmatmul.mubr.msk.f32.gmra.mxu1 %vm512_vm0, %v2971_v38 }
 0x53e   : > { %4868 = vmatpush3.msra.mxu0 %v3379_v37  ;;  %4871 = vmatprep.mubr.msk.f32.mxu0 %vm512_vm0, %v3116_v45 }
 0x53f   : > { %4869 = vmatprep.subr.mxu0 %v3378_v50  ;;  %4851 = vmatprep.mubr.msk.f32.mxu1 %vm512_vm0, %v3114_v31 }
 0x540   : > { %4870 = vmatpush3.msra.mxu0 %v3378_v50  ;;  %4883 = vmatprep.subr.mxu1 %v3537_v60 }
 0x541   : > { %4872 = vmatmul.mubr.msk.f32.vlgmr.msra.gmra.mxu0 %vm512_vm0, %v3117_v12  ;;  %4852 = vmatmul.mubr.msk.f32.vlgmr.msra.gmra.mxu1 %vm512_vm0, %v3115_v21 }
 0x542   : > { %4874 = vmatprep.mubr.msk.f32.mxu0 %vm512_vm0, %v3118_v51  ;;  %4884 = vmatpush3.msra.mxu1 %v3537_v60 }
 0x543   : > { %4854 = vmatprep.mubr.msk.f32.mxu1 %vm512_vm0, %v3116_v45  ;;  %4885 = vmatprep.subr.mxu1 %v3536_v30 }
 0x544   : > { %4886 = vmatpush3.msra.mxu1 %v3536_v30  ;;  %4903 = vmatprep.subr.mxu0 %v3531_v27 }
 0x545   : > { %4875 = vmatmul.mubr.msk.f32.gmra.mxu0 %vm512_vm0, %v3119_v15  ;;  %4855 = vmatmul.mubr.msk.f32.gmra.mxu1 %vm512_vm0, %v3117_v12 }
 0x546   : > { %4877 = vmatprep.mubr.msk.f32.mxu0 %vm512_vm0, %v3120_v35  ;;  %4857 = vmatprep.mubr.msk.f32.mxu1 %vm512_vm0, %v3118_v51 }
 0x547   : > { %4887 = vmatprep.subr.mxu1 %v3535_v40  ;;  %4904 = vmatpush3.msra.mxu0 %v3531_v27 }
 0x548   : > { %4888 = vmatpush3.msra.mxu1 %v3535_v40  ;;  %4905 = vmatprep.subr.mxu0 %v3530_v2 }
 0x549   : > { %4878 = vmatmul.mubr.msk.f32.gmra.mxu0 %vm512_vm0, %v3121_v1  ;;  %4858 = vmatmul.mubr.msk.f32.gmra.mxu1 %vm512_vm0, %v3119_v15 }
 0x54a   : > { %4880 = vmatprep.mubr.msk.f32.mxu0 %vm512_vm0, %v3126_v59  ;;  %4860 = vmatprep.mubr.msk.f32.mxu1 %vm512_vm0, %v3120_v35 }
 0x54b   : > { %4906 = vmatpush3.msra.mxu0 %v3530_v2  ;;  %4889 = vmatprep.subr.mxu1 %v3534_v28 }
 0x54c   : > { %4907 = vmatprep.subr.mxu0 %v3529_v32  ;;  %4890 = vmatpush3.msra.mxu1 %v3534_v28 }
 0x54d   : > { %4881 = vmatmul.mubr.msk.f32.gmra.mxu0 %vm512_vm0, %v3376_v26  ;;  %4861 = vmatmul.mubr.msk.f32.gmra.mxu1 %vm512_vm0, %v3121_v1 }
 0x54e   : > { %4908 = vmatpush3.msra.mxu0 %v3529_v32  ;;  %4911 = vmatprep.mubr.msk.f32.mxu0 %vm512_vm0, %v3519_v42 }
 0x54f   : > { %4891 = vmatprep.mubr.msk.f32.mxu1 %vm512_vm0, %v3520_v4  ;;  %4909 = vmatprep.subr.mxu0 %v3528_v63 }
 0x550   : > { %4910 = vmatpush3.msra.mxu0 %v3528_v63  ;;  %4943 = vmatprep.subr.mxu1 %v3787_v6 }
 0x551   : > { %4912 = vmatmul.mubr.msk.f32.vlgmr.msra.gmra.mxu0 %vm512_vm0, %v3520_v4  ;;  %4892 = vmatmul.mubr.msk.f32.vlgmr.msra.gmra.mxu1 %vm512_vm0, %v3521_v55 }
 0x552   : > { %4914 = vmatprep.mubr.msk.f32.mxu0 %vm512_vm0, %v3521_v55  ;;  %4947 = vmatpush3.msra.mxu1 %v3787_v6 }
 0x553   : > { %4894 = vmatprep.mubr.msk.f32.mxu1 %vm512_vm0, %v3522_v23  ;;  %4944 = vmatprep.subr.mxu1 %v3786_v19 }
 0x554   : > { %4948 = vmatpush3.msra.mxu1 %v3786_v19  ;;  %4923 = vmatprep.subr.mxu0 %v3787_v6 }
 0x555   : > { %4915 = vmatmul.mubr.msk.f32.gmra.mxu0 %vm512_vm0, %v3522_v23  ;;  %4895 = vmatmul.mubr.msk.f32.gmra.mxu1 %vm512_vm0, %v3523_v56 }
 0x556   : > { %4917 = vmatprep.mubr.msk.f32.mxu0 %vm512_vm0, %v3523_v56  ;;  %4897 = vmatprep.mubr.msk.f32.mxu1 %vm512_vm0, %v3524_v46 }
 0x557   : > { %4945 = vmatprep.subr.mxu1 %v3785_v5  ;;  %4924 = vmatpush3.msra.mxu0 %v3787_v6 }
 0x558   : > { %4949 = vmatpush3.msra.mxu1 %v3785_v5  ;;  %4925 = vmatprep.subr.mxu0 %v3786_v19 }
 0x559   : > { %4918 = vmatmul.mubr.msk.f32.gmra.mxu0 %vm512_vm0, %v3524_v46  ;;  %4898 = vmatmul.mubr.msk.f32.gmra.mxu1 %vm512_vm0, %v3525_v9 }
 0x55a   : > { %4920 = vmatprep.mubr.msk.f32.mxu0 %vm512_vm0, %v3525_v9  ;;  %4900 = vmatprep.mubr.msk.f32.mxu1 %vm512_vm0, %v3526_v34 }
 0x55b   : > { %4926 = vmatpush3.msra.mxu0 %v3786_v19  ;;  %4946 = vmatprep.subr.mxu1 %v3784_v8 }
 0x55c   : > { %4927 = vmatprep.subr.mxu0 %v3785_v5  ;;  %4950 = vmatpush3.msra.mxu1 %v3784_v8 }
 0x55d   : > { %4921 = vmatmul.mubr.msk.f32.gmra.mxu0 %vm512_vm0, %v3526_v34  ;;  %4901 = vmatmul.mubr.msk.f32.gmra.mxu1 %vm512_vm0, %v3532_v47 }
 0x55e   : > { %4928 = vmatpush3.msra.mxu0 %v3785_v5  ;;  %4931 = vmatprep.mubr.msk.f32.mxu0 %vm512_vm0, %v3521_v55 }
 0x55f   : > { %4929 = vmatprep.subr.mxu0 %v3784_v8  ;;  %4934 = vmatprep.mubr.msk.f32.mxu1 %vm512_vm0, %v3523_v56 }
 0x560   : > { %4930 = vmatpush3.msra.mxu0 %v3784_v8 }
 0x561   : > { %4932 = vmatmul.mubr.msk.f32.vlgmr.msra.gmra.mxu0 %vm512_vm0, %v3522_v23  ;;  %4935 = vmatmul.mubr.msk.f32.vlgmr.msra.gmra.mxu1 %vm512_vm0, %v3524_v46 }
 0x562   : > { %4937 = vmatprep.mubr.msk.f32.mxu1 %vm512_vm0, %v3525_v9 }
 0x565   : > { %4938 = vmatmul.mubr.msk.f32.gmra.mxu1 %vm512_vm0, %v3526_v34 }
 0x566   : > { %4940 = vmatprep.mubr.msk.f32.mxu1 %vm512_vm0, %v3532_v47 }
 0x569   : > { %4941 = vmatmul.mubr.msk.f32.gmra.mxu1 %vm512_vm0, %v3782_v7 }
 0x5e0   : > { %v5982_v18 = vpop.f32.mrf.mxu0 }
 0x5e1   : > { %v5984_v13 = vpop.f32.mrf.mxu1 }
 0x5e2   : > { %v5986_v17 = vpop.f32.mrf.mxu0 }
 0x5e3   : > { %v2817_v29 = vpop.f32.mrf.mxu1 }
 0x5e4   : > { %v4796_v16 = vpop.f32.mrf.mxu0  ;;  %v2926_v61 = vadd.f32 %v5986_v17, %v2817_v29 }
 0x5e5   : > { %v4776_v58 = vpop.f32.mrf.mxu1 }
 0x5e6   : > { %v2935_v39 = vpop.f32.mrf.mxu0  ;;  %v2941_v33 = vadd.f32 %v4796_v16, %v4776_v58 }
 0x5e7   : > { %v2827_v14 = vpop.f32.mrf.mxu1 }
 0x5e8   : > { %v4799_v21 = vpop.f32.mrf.mxu0 }
 0x5e9   : > { %v4779_v45 = vpop.f32.mrf.mxu1 }
 0x5ea   : > { %v5988_v49 = vpop.f32.mrf.mxu0 }
 0x5eb   : > { %v2837_v12 = vpop.f32.mrf.mxu1 }
 0x5ec   : > { %v4802_v43 = vpop.f32.mrf.mxu0 }
 0x5ed   : > { %v4782_v51 = vpop.f32.mrf.mxu1 }
 0x5ee   : > { %v2955_v54 = vpop.f32.mrf.mxu0 }
 0x5ef   : > { %v2847_v15 = vpop.f32.mrf.mxu1 }
 0x5f1   : > { %v4833_v36 = vpop.f32.mrf.mxu0  ;;  %v4813_v35 = vpop.f32.mrf.mxu1 }
 0x5f3   : > { %v3222_v3 = vpop.f32.mrf.mxu0  ;;  %v5990_v1 = vpop.f32.mrf.mxu1 }
 0x5f4   : > { %6156 = vst [vmem:[#allocation13_spill] sm:$0xff] %v5990_v1  ;;  %v2951_v1 = vadd.f32 %v4799_v21, %v4779_v45  ;;  %v6166_v45 = vld [vmem:[#allocation21_spill] sm:$0xff] }
 0x5f5   : > { %v4836_v37 = vpop.f32.mrf.mxu0  ;;  %v5992_v38 = vpop.f32.mrf.mxu1 }
 0x5f6   : > { %6157 = vst [vmem:[#allocation14_spill] sm:$0xff] %v5992_v38  ;;  %v2936_v38 = vadd.f32 %v2935_v39, %v2827_v14  ;;  %v6165_v14 = vld [vmem:[#allocation20_spill] sm:$0xff] }
 0x5f7   : > { %v3232_v59 = vpop.f32.mrf.mxu0  ;;  %v3077_v50 = vpop.f32.mrf.mxu1 }
 0x5f9   : > { %v4839_v31 = vpop.f32.mrf.mxu0  ;;  %v4819_v60 = vpop.f32.mrf.mxu1 }
 0x5fa   : > { %v3111_v39 = vadd.f32 %v4819_v60, %v2951_v1 }
 0x5fb   : > { %v3242_v30 = vpop.f32.mrf.mxu0  ;;  %v5994_v27 = vpop.f32.mrf.mxu1  ;;  %v6163_v29 = vld [vmem:[#allocation13_spill] sm:$0xff] }
 0x5fc   : > { %6158 = vst [vmem:[#allocation15_spill] sm:$0xff] %v5994_v27  ;;  %v3106_v16 = vadd.f32 %v6163_v29, %v2926_v61  ;;  %v6169_v61 = vld [vmem:[#allocation22_spill] sm:$0xff] }
 0x5fd   : > { %v4842_v40 = vpop.f32.mrf.mxu0  ;;  %v5996_v2 = vpop.f32.mrf.mxu1  ;;  %v6164_v58 = vld [vmem:[#allocation14_spill] sm:$0xff] }
 0x5fe   : > { %6159 = vst [vmem:[#allocation23_spill] sm:$0xff] %v5996_v2 }
 0x5ff   : > { %v3252_v28 = vpop.f32.mrf.mxu0  ;;  %v5998_v32 = vpop.f32.mrf.mxu1 }
 0x600   : > { %6160 = vst [vmem:[#allocation11_spill] sm:$0xff] %v5998_v32 }
 0x601   : > { %v4873_v26 = vpop.f32.mrf.mxu0  ;;  %v4853_v63 = vpop.f32.mrf.mxu1 }
 0x602   : > { %v3336_v57 = vadd.f32 %v4853_v63, %v4833_v36 }
 0x603   : > { %v3472_v42 = vpop.f32.mrf.mxu0  ;;  %v3330_v6 = vpop.f32.mrf.mxu1 }
 0x604   : > { %v3331_v22 = vadd.f32 %v3330_v6, %v3222_v3  ;;  %v3512_v62 = vadd.f32 %v4873_v26, %v3336_v57  ;;  %v2961_v6 = vadd.f32 %v4802_v43, %v4782_v51  ;;  %v6006_v57 = vadd.f32 %v2955_v54, %v2847_v15 }
 0x605   : > { %v4876_v4 = vpop.f32.mrf.mxu0  ;;  %v4856_v55 = vpop.f32.mrf.mxu1 }
 0x606   : > { %v3346_v20 = vadd.f32 %v4856_v55, %v4836_v37  ;;  %v3511_v36 = vadd.f32 %v3472_v42, %v3331_v22  ;;  %v2946_v37 = vadd.f32 %v5988_v49, %v2837_v12  ;;  %v3109_v22 = vadd.f32 %v6164_v58, %v2941_v33  ;;  %v6170_v33 = vld [vmem:[#allocation24_spill] sm:$0xff] }
 0x607   : > { %v3482_v19 = vpop.f32.mrf.mxu0  ;;  %v3340_v23 = vpop.f32.mrf.mxu1 }
 0x608   : > { %v3341_v11 = vadd.f32 %v3340_v23, %v3232_v59  ;;  %v3514_v63 = vadd.f32 %v4876_v4, %v3346_v20  ;;  %v3108_v20 = vadd.f32 %v3077_v50, %v2936_v38  ;;  %v3925_v21 = vmul.f32 %v6165_v14, %v3511_v36  ;;  %v3973_v14 = vld [vmem:[%s5280_s18 + $0x8] sm:$0xff] }
 0x609   : > { %v4879_v56 = vpop.f32.mrf.mxu0  ;;  %v4859_v5 = vpop.f32.mrf.mxu1 }
 0x60a   : > { %v3356_v10 = vadd.f32 %v4859_v5, %v4839_v31  ;;  %v6162_v31 = vld [vmem:[#allocation19_spill] sm:$0xff]  ;;  %v3513_v55 = vadd.f32 %v3482_v19, %v3341_v11  ;;  %v3928_v49 = vmul.f32 %v6166_v45, %v3514_v63  ;;  %v3933_v36 = vadd.f32 %v3925_v21, %v3106_v16  ;;  %v6177_v16 = vld [vmem:[#allocation26_spill] sm:$0xff]  ;;  %v3975_v21 = vld [vmem:[%s5280_s18 + $0x18] sm:$0xff] }
 0x60b   : > { %v3492_v46 = vpop.f32.mrf.mxu0  ;;  %v3350_v9 = vpop.f32.mrf.mxu1  ;;  %v3926_v26 = vmul.f32 %v6162_v31, %v3512_v62  ;;  %v6167_v62 = vld [vmem:[#allocation15_spill] sm:$0xff] }
 0x60c   : > { %v3516_v23 = vadd.f32 %v4879_v56, %v3356_v10  ;;  %v3110_v11 = vadd.f32 %v6167_v62, %v2946_v37  ;;  %v6168_v10 = vld [vmem:[#allocation23_spill] sm:$0xff]  ;;  %v3927_v42 = vmul.f32 %v6169_v61, %v3513_v55  ;;  %v6175_v55 = vld [vmem:[#allocation29_spill] sm:$0xff] }
 0x60d   : > { %v6000_v8 = vpop.f32.mrf.mxu0  ;;  %v4862_v34 = vpop.f32.mrf.mxu1  ;;  %v6015_v15 = vadd.f32 %v6168_v10, %v2961_v6  ;;  %v6174_v6 = vld [vmem:[#allocation25_spill] sm:$0xff] }
 0x60e   : > { %6161 = vst [vmem:[#allocation16_spill] sm:$0xff] %v6000_v8  ;;  %v2931_v8 = vadd.f32 %v5982_v18, %v5984_v13  ;;  %v3351_v18 = vadd.f32 %v3350_v9, %v3242_v30  ;;  %v3366_v12 = vadd.f32 %v4862_v34, %v4842_v40  ;;  %v3930_v38 = vmul.f32 %v6170_v33, %v3516_v23 }
 0x60f   : > { %v3502_v47 = vpop.f32.mrf.mxu0  ;;  %v3360_v7 = vpop.f32.mrf.mxu1  ;;  %v3936_v34 = vadd.f32 %v3928_v49, %v3109_v22  ;;  %v6178_v22 = vld [vmem:[#allocation27_spill] sm:$0xff] }
 0x610   : > { %v3107_v59 = vadd.f32 %v4813_v35, %v2931_v8  ;;  %v3361_v43 = vadd.f32 %v3360_v7, %v3252_v28  ;;  %v3515_v1 = vadd.f32 %v3492_v46, %v3351_v18  ;;  %v6176_v18 = vld [vmem:[#allocation31_spill] sm:$0xff] }
 0x611   : > { %v4913_v24 = vpop.f32.mrf.mxu0  ;;  %v4893_v41 = vpop.f32.mrf.mxu1 }
 0x612   : > { %v3742_v35 = vadd.f32 %v4913_v24, %v4893_v41  ;;  %v3934_v60 = vadd.f32 %v3926_v26, %v3107_v59  ;;  %v3517_v8 = vadd.f32 %v3502_v47, %v3361_v43  ;;  %v6173_v41 = vld [vmem:[#allocation30_spill] sm:$0xff]  ;;  %v3938_v59 = vadd.f32 %v3930_v38, %v3111_v39 }
 0x613   : > { %v3736_v32 = vpop.f32.mrf.mxu0  ;;  %v3628_v25 = vpop.f32.mrf.mxu1 }
 0x614   : > { %v3737_v19 = vadd.f32 %v3736_v32, %v3628_v25  ;;  %v3929_v25 = vmul.f32 %v6174_v6, %v3515_v1  ;;  %v3935_v32 = vadd.f32 %v3927_v42, %v3108_v20 }
 0x615   : > { %v4916_v52 = vpop.f32.mrf.mxu0  ;;  %v4896_v53 = vpop.f32.mrf.mxu1  ;;  %v6171_v5 = vld [vmem:[#allocation16_spill] sm:$0xff] }
 0x616   : > { %v3752_v30 = vadd.f32 %v4916_v52, %v4896_v53  ;;  %v3518_v9 = vadd.f32 %v6171_v5, %v3366_v12  ;;  %v6172_v53 = vld [vmem:[#allocation28_spill] sm:$0xff]  ;;  %v3977_v5 = vld [vmem:[%s5280_s18 + $0x28] sm:$0xff] }
 0x617   : > { %v3746_v44 = vpop.f32.mrf.mxu0  ;;  %v3638_v48 = vpop.f32.mrf.mxu1 }
 0x618   : > { %v3747_v40 = vadd.f32 %v3746_v44, %v3638_v48  ;;  %v4282_v44 = vld [vmem:[%s6084_s13] ss:$0 sm:$0xff]  ;;  %v3932_v58 = vmul.f32 %v6177_v16, %v3518_v9 }
 0x619   : > { %v4919_v2 = vpop.f32.mrf.mxu0  ;;  %v4899_v27 = vpop.f32.mrf.mxu1 }
 0x61a   : > { %v3762_v48 = vadd.f32 %v4919_v2, %v4899_v27  ;;  %v3931_v27 = vmul.f32 %v6178_v22, %v3517_v8 }
 0x61b   : > { %v3756_v0 = vpop.f32.mrf.mxu0  ;;  %v3648_v3 = vpop.f32.mrf.mxu1 }
 0x61c   : > { %v3757_v2 = vadd.f32 %v3756_v0, %v3648_v3  ;;  %v3974_v0 = vld [vmem:[%s5280_s18 + $0x10] sm:$0xff]  ;;  %v6179_v3 = vld [vmem:[#allocation32_spill] sm:$0xff] }
 0x61d   : > { %v4922_v13 = vpop.f32.mrf.mxu0  ;;  %v4902_v17 = vpop.f32.mrf.mxu1 }
 0x61e   : > { %v3772_v62 = vadd.f32 %v4922_v13, %v4902_v17 }
 0x61f   : > { %v3766_v51 = vpop.f32.mrf.mxu0  ;;  %v3658_v54 = vpop.f32.mrf.mxu1 }
 0x620   : > { %v3767_v10 = vadd.f32 %v3766_v51, %v3658_v54  ;;  %v3937_v51 = vadd.f32 %v3929_v25, %v3110_v11  ;;  %v6180_v54 = vld [vmem:[#allocation33_spill] sm:$0xff] }
 0x621   : > { %v4933_v50 = vpop.f32.mrf.mxu0  ;;  %v4936_v4 = vpop.f32.mrf.mxu1 }
 0x622   : > { %v3918_v28 = vadd.f32 %v4933_v50, %v3742_v35  ;;  %v3920_v56 = vadd.f32 %v4936_v4, %v3752_v30  ;;  %v3972_v35 = vld [vmem:[%s5280_s18] sm:$0xff] }
 0x623   : > { %v3878_v7 = vpop.f32.mrf.mxu0  ;;  %v3888_v24 = vpop.f32.mrf.mxu1 }
 0x624   : > { %v3942_v52 = vmul.f32 %v6172_v53, %v3918_v28  ;;  %v3944_v63 = vmul.f32 %v6173_v41, %v3920_v56  ;;  %v3917_v46 = vadd.f32 %v3878_v7, %v3737_v19  ;;  %v3919_v37 = vadd.f32 %v3888_v24, %v3747_v40  ;;  %v6181_v19 = vld [vmem:[#allocation11_spill] sm:$0xff]  ;;  %v6182_v7 = vld [vmem:[#allocation34_spill] sm:$0xff] }
 0x625   : > { %v4939_v47 = vpop.f32.mrf.mxu1  ;;  %v3112_v40 = vadd.f32 %v6181_v19, %v6006_v57  ;;  %v3976_v57 = vld [vmem:[%s5280_s18 + $0x20] sm:$0xff]  ;;  %v6183_v53 = vld [vmem:[#allocation35_spill] sm:$0xff] }
 0x626   : > { %v3950_v31 = vadd.f32 %v3942_v52, %v3934_v60  ;;  %v3952_v26 = vadd.f32 %v3944_v63, %v3936_v34  ;;  %v3941_v23 = vmul.f32 %v6175_v55, %v3917_v46  ;;  %v3943_v29 = vmul.f32 %v6176_v18, %v3919_v37  ;;  %v3979_v37 = vld [vmem:[%s5280_s18 + $0x38] sm:$0xff] }
 0x627   : > { %v3922_v45 = vadd.f32 %v4939_v47, %v3762_v48  ;;  %v3898_v20 = vpop.f32.mrf.mxu1  ;;  %v3940_v34 = vadd.f32 %v3932_v58, %v6015_v15  ;;  %v3939_v24 = vadd.f32 %v3931_v27, %v3112_v40  ;;  %v3978_v48 = vld [vmem:[%s5280_s18 + $0x30] sm:$0xff] }
 0x628   : > { %v3965_v49 = vadd.f32 %v4282_v44, %v3950_v31  ;;  %v3967_v39 = vadd.f32 %v4282_v44, %v3952_v26  ;;  %v3949_v12 = vadd.f32 %v3941_v23, %v3933_v36  ;;  %v3951_v43 = vadd.f32 %v3943_v29, %v3935_v32 }
 0x629   : > { %v3946_v30 = vmul.f32 %v6179_v3, %v3922_v45  ;;  %v3921_v61 = vadd.f32 %v3898_v20, %v3757_v2  ;;  %v4942_v42 = vpop.f32.mrf.mxu1 }
 0x62a   : > { %v3981_v33 = vadd.f32 %v3973_v14, %v3965_v49  ;;  %v3983_v38 = vadd.f32 %v3975_v21, %v3967_v39  ;;  %v3964_v1 = vadd.f32 %v4282_v44, %v3949_v12  ;;  %v3966_v13 = vadd.f32 %v4282_v44, %v3951_v43 }
 0x62b   : > { %v3954_v17 = vadd.f32 %v3946_v30, %v3938_v59  ;;  %v3945_v50 = vmul.f32 %v6180_v54, %v3921_v61  ;;  %v3924_v60 = vadd.f32 %v4942_v42, %v3772_v62  ;;  %v3908_v4 = vpop.f32.mrf.mxu1 }
 0x62c   : > { %3989 = vst.msk [vmem:[%s6037_s17 + $0x8] sm:$0xff] %vm512_vm0, %v3981_v33  ;;  %3991 = vst.msk [vmem:[%s6037_s17 + $0x18] sm:$0xff] %vm512_vm0, %v3983_v38  ;;  %v3980_v28 = vadd.f32 %v3972_v35, %v3964_v1  ;;  %v3982_v56 = vadd.f32 %v3974_v0, %v3966_v13  ;;  %v3923_v9 = vadd.f32 %v3908_v4, %v3767_v10 }
 0x62d   : > { %v3969_v11 = vadd.f32 %v4282_v44, %v3954_v17  ;;  %v3953_v8 = vadd.f32 %v3945_v50, %v3937_v51  ;;  %v3948_v36 = vmul.f32 %v6182_v7, %v3924_v60 }
 0x62e   : > { %3988 = vst.msk [vmem:[%s6037_s17] sm:$0xff] %vm512_vm0, %v3980_v28  ;;  %3990 = vst.msk [vmem:[%s6037_s17 + $0x10] sm:$0xff] %vm512_vm0, %v3982_v56  ;;  %v3947_v52 = vmul.f32 %v6183_v53, %v3923_v9 }
 0x62f   : > { %v3985_v41 = vadd.f32 %v3977_v5, %v3969_v11  ;;  %v3968_v63 = vadd.f32 %v4282_v44, %v3953_v8  ;;  %v3956_v46 = vadd.f32 %v3948_v36, %v3940_v34 }
 0x630   : > { %v3955_v6 = vadd.f32 %v3947_v52, %v3939_v24 }
 0x631   : > { %3993 = vst.msk [vmem:[%s6037_s17 + $0x28] sm:$0xff] %vm512_vm0, %v3985_v41  ;;  %v3984_v15 = vadd.f32 %v3976_v57, %v3968_v63  ;;  %v3971_v25 = vadd.f32 %v4282_v44, %v3956_v46 }
 0x632   : > { %v3970_v32 = vadd.f32 %v4282_v44, %v3955_v6 }
 0x633   : > { %3992 = vst.msk [vmem:[%s6037_s17 + $0x20] sm:$0xff] %vm512_vm0, %v3984_v15  ;;  %v3987_v47 = vadd.f32 %v3979_v37, %v3971_v25 }
 0x634   : > { %v3986_v59 = vadd.f32 %v3978_v48, %v3970_v32 }
 0x635   : > { %3995 = vst.msk [vmem:[%s6037_s17 + $0x38] sm:$0xff] %vm512_vm0, %v3987_v47 }
 0x636   : > { %3994 = vst.msk [vmem:[%s6037_s17 + $0x30] sm:$0xff] %vm512_vm0, %v3986_v59 }
 0x637 PF: > { %s26_s29 = sadd.s32 1, %s5122_s29  }
 0x638   : > { %p23_p2 = scmp.ge.s32.totalorder %s26_s29, 4  }
 0x63a   :  { %25 = sbr.rel (!%p23_p2) target bundleno = 2 (0x2), region = 134 }
 0x63f   :  { %4017 = vsyncpa [#allocation4], 1 }
 0x640   :  { %4019 = vsyncpa [#allocation4 + $0x1], 1 }
 0x641   :  { %4020 = vsyncpa [#allocation6], 1 }

</bundles_post_ra>
